<compile_context>
chip_gen: v5e
topology: v5e:2x2
jax: 0.10.0
libtpu: 0.0.40
codegen_flags: <defaults>
</compile_context>

<pallas_src>
import functools

import jax
import jax.numpy as jnp
from jax.experimental import pallas as pl
from jax.experimental.pallas import tpu as pltpu


_LANES = 128                 # vreg lane width
_SUBLANES = 8                # f32 sublanes per vreg
_MAX_TILE_ROWS = 2048        # (2048, 128) f32 = 1 MiB per pipeline buffer
_PALLAS_MIN_ELEMS = 65536    # below this, XLA's fused mean beats a kernel launch
_DEFAULT_SHARDS = 2          # leading "parallel" axis (both TensorCores on v7x)


def _cdiv(a, b):
    return -(-a // b)


def _round_up(x, m):
    return _cdiv(x, m) * m


def _sublane_pack(dtype):
    # Rows of one (pack, 128) vreg tile for this dtype: f32 -> 8, bf16/f16 -> 16.
    return _SUBLANES * (4 // jnp.dtype(dtype).itemsize)


# ---------------------------------------------------------------------------
# Wrapper-side layout plumbing (copy-free whenever possible)
# ---------------------------------------------------------------------------

def _as_slab(x):
    """Return (slab, rows): a (rows, 128) lane-dense slab in native dtype.

    Zero-copy (bitcast reshape) when x.size is a multiple of one (pack, 128)
    vreg tile; otherwise a single jnp.pad copy appending < pack*128 zeros
    (zeros do not bias the sum; division uses the true element count).
    """
    if not jnp.issubdtype(x.dtype, jnp.floating) or x.dtype.itemsize not in (2, 4):
        x = x.astype(jnp.float32)        # rare path (ints / f64 / fp8 predictions)
    n = x.size
    pack = _sublane_pack(x.dtype)
    flat = x.reshape(-1)
    if n % (pack * _LANES) == 0:
        rows = n // _LANES
        return flat.reshape(rows, _LANES), rows
    rows = _round_up(_cdiv(n, _LANES), pack)
    flat = jnp.pad(flat, (0, rows * _LANES - n))
    return flat.reshape(rows, _LANES), rows


# ---------------------------------------------------------------------------
# Kernel bodies
# ---------------------------------------------------------------------------

def _accum_stream(tile_ref, out_ref, blk, rows, n_blocks, tile_rows):
    """Add this block's column sums (masked on the final partial block) into
    the shard's resident (1, 8, 128) f32 output accumulator.

    rows / n_blocks / tile_rows are Python ints (static), so full blocks carry
    no mask and streams that ran out of data are skipped entirely.
    """
    last_rows = rows - (n_blocks - 1) * tile_rows   # rows in the final block

    def add(valid_rows):
        x = tile_ref[...].astype(jnp.float32)       # native-dtype DMA, f32 math
        if valid_rows is not None:                  # only the ragged final block
            rid = jax.lax.broadcasted_iota(jnp.int32, x.shape, 0)
            x = jnp.where(rid < valid_rows, x, 0.0)
        # (tr, 128) -> (tr//8, 8, 128) -> (8, 128): pure VALU vreg adds, no XLU.
        part = jnp.sum(x.reshape(tile_rows // _SUBLANES, _SUBLANES, _LANES), axis=0)
        out_ref[...] += part[jnp.newaxis]

    if last_rows == tile_rows:                      # rows divide evenly: no mask
        @pl.when(blk < n_blocks)
        def _():
            add(None)
    else:
        @pl.when(blk < n_blocks - 1)
        def _():
            add(None)

        @pl.when(blk == n_blocks - 1)
        def _():
            add(last_rows)


def _make_critic_kernel(tile_rows, bps, rows_f, nbf, rows_r, nbr):
    def kernel(fake_ref, real_ref, outf_ref, outr_ref):
        s = pl.program_id(0)                        # shard ("parallel")
        j = pl.program_id(1)                        # block within shard ("arbitrary")
        blk = s * bps + j                           # global block index

        @pl.when(j == 0)
        def _init():
            outf_ref[...] = jnp.zeros_like(outf_ref)
            outr_ref[...] = jnp.zeros_like(outr_ref)

        _accum_stream(fake_ref, outf_ref, blk, rows_f, nbf, tile_rows)
        _accum_stream(real_ref, outr_ref, blk, rows_r, nbr, tile_rows)

    return kernel


def _make_gen_kernel(tile_rows, bps, rows_f, nbf):
    def kernel(fake_ref, outf_ref):
        s = pl.program_id(0)
        j = pl.program_id(1)
        blk = s * bps + j

        @pl.when(j == 0)
        def _init():
            outf_ref[...] = jnp.zeros_like(outf_ref)

        _accum_stream(fake_ref, outf_ref, blk, rows_f, nbf, tile_rows)

    return kernel


# ---------------------------------------------------------------------------
# Pallas wrappers
# ---------------------------------------------------------------------------

def _pick_tile(rows_max, tile_rows):
    tr = _MAX_TILE_ROWS if tile_rows is None else int(tile_rows)
    tr = min(tr, _round_up(rows_max, 32))           # never bigger than the data
    return max(32, _round_up(tr, 32))               # safe for f32/bf16/int8 tiling


@functools.partial(jax.jit, static_argnames=("tile_rows", "num_shards"))
def _critic_losses_pallas(fake_pred, real_pred, *, tile_rows=None,
                          num_shards=_DEFAULT_SHARDS):
    n_fake = int(fake_pred.size)
    n_real = int(real_pred.size)
    fake2d, rows_f = _as_slab(fake_pred)
    real2d, rows_r = _as_slab(real_pred)

    tr = _pick_tile(max(rows_f, rows_r), tile_rows)
    nbf = _cdiv(rows_f, tr)
    nbr = _cdiv(rows_r, tr)
    n_blocks = max(nbf, nbr)
    shards = max(1, min(num_shards, n_blocks))
    bps = _cdiv(n_blocks, shards)

    out_shape = jax.ShapeDtypeStruct((shards, _SUBLANES, _LANES), jnp.float32)
    out_spec = pl.BlockSpec((1, _SUBLANES, _LANES), lambda s, j: (s, 0, 0))

    sums_f, sums_r = pl.pallas_call(
        _make_critic_kernel(tr, bps, rows_f, nbf, rows_r, nbr),
        out_shape=(out_shape, out_shape),
        grid=(shards, bps),
        in_specs=[
            # Clamp each stream to its own last block; once a stream is out of
            # real data its accumulate is skipped in-kernel via pl.when.
            pl.BlockSpec((tr, _LANES),
                         lambda s, j: (jnp.minimum(s * bps + j, nbf - 1), 0)),
            pl.BlockSpec((tr, _LANES),
                         lambda s, j: (jnp.minimum(s * bps + j, nbr - 1), 0)),
        ],
        out_specs=(out_spec, out_spec),
        compiler_params=pltpu.CompilerParams(
            dimension_semantics=("parallel", "arbitrary")),
    )(fake2d, real2d)

    # Tiny cross-shard + cross-lane combine (and the divide / sign) in the wrapper.
    fake_mean = jnp.sum(sums_f) / n_fake
    real_mean = jnp.sum(sums_r) / n_real
    return fake_mean - real_mean, -fake_mean        # (critic_loss, generator_loss)


@functools.partial(jax.jit, static_argnames=("tile_rows", "num_shards"))
def _gen_loss_pallas(fake_pred, *, tile_rows=None, num_shards=_DEFAULT_SHARDS):
    n_fake = int(fake_pred.size)
    fake2d, rows_f = _as_slab(fake_pred)

    tr = _pick_tile(rows_f, tile_rows)
    nbf = _cdiv(rows_f, tr)
    shards = max(1, min(num_shards, nbf))
    bps = _cdiv(nbf, shards)

    sums_f = pl.pallas_call(
        _make_gen_kernel(tr, bps, rows_f, nbf),
        out_shape=jax.ShapeDtypeStruct((shards, _SUBLANES, _LANES), jnp.float32),
        grid=(shards, bps),
        in_specs=[pl.BlockSpec((tr, _LANES),
                               lambda s, j: (jnp.minimum(s * bps + j, nbf - 1), 0))],
        out_specs=pl.BlockSpec((1, _SUBLANES, _LANES), lambda s, j: (s, 0, 0)),
        compiler_params=pltpu.CompilerParams(
            dimension_semantics=("parallel", "arbitrary")),
    )(fake2d)

    return -(jnp.sum(sums_f) / n_fake)


# ---------------------------------------------------------------------------
# Public API
# ---------------------------------------------------------------------------

def wgan_losses(fake_pred, real_pred, *, tile_rows=None,
                num_shards=_DEFAULT_SHARDS, min_pallas_elems=_PALLAS_MIN_ELEMS):
    """Return (critic_loss, generator_loss) from one fused streaming reduction.

    Note: empty inputs fall through the jnp gate and yield NaN (matching
    torch.mean of an empty tensor).
    """
    if max(int(fake_pred.size), int(real_pred.size)) < min_pallas_elems:
        fake_mean = jnp.mean(fake_pred.astype(jnp.float32))
        real_mean = jnp.mean(real_pred.astype(jnp.float32))
        return -(real_mean - fake_mean), -fake_mean
    return _critic_losses_pallas(fake_pred, real_pred,
                                 tile_rows=tile_rows, num_shards=num_shards)


def wgan_loss(fake_pred, real_pred=None, *, tile_rows=None,
              num_shards=_DEFAULT_SHARDS, min_pallas_elems=_PALLAS_MIN_ELEMS):
    """Pallas implementation of WGANLossFunction.forward (float32 scalar)."""
    if real_pred is not None:
        critic_loss, _ = wgan_losses(fake_pred, real_pred, tile_rows=tile_rows,
                                     num_shards=num_shards,
                                     min_pallas_elems=min_pallas_elems)
        return critic_loss
    if int(fake_pred.size) < min_pallas_elems:
        return -jnp.mean(fake_pred.astype(jnp.float32))
    return _gen_loss_pallas(fake_pred, tile_rows=tile_rows, num_shards=num_shards)


if __name__ == "__main__":
    key = jax.random.PRNGKey(0)
    k1, k2, k3, k4, k5, k6 = jax.random.split(key, 6)

    # --- Small, module-consistent critic scores (batch=8, 1 score each):
    # below the gate -> fused jnp path (a Pallas launch is pure overhead here).
    fake_small = jax.random.normal(k1, (8, 1), dtype=jnp.float32)
    real_small = jax.random.normal(k2, (8, 1), dtype=jnp.float32)
    critic_small = wgan_loss(fake_small, real_small)
    gen_small = wgan_loss(fake_small)
    jax.block_until_ready((critic_small, gen_small))
    assert jnp.allclose(critic_small,
                        -(jnp.mean(real_small) - jnp.mean(fake_small)), atol=1e-6)
    assert jnp.allclose(gen_small, -jnp.mean(fake_small), atol=1e-6)

    # --- PatchGAN-style critic maps, large enough for the Pallas path.
    # fake: 460800 elems (zero-copy reshape, 2 row blocks, masked ragged tail);
    # real: 172800 elems (padded-tail path, 1 block -> exercises the guard that
    # skips DMA/compute for the shorter stream); num_shards=2 exercises the
    # leading "parallel" axis.
    fake_big = jax.random.normal(k3, (512, 1, 30, 30), dtype=jnp.float32)
    real_big = jax.random.normal(k4, (192, 1, 30, 30), dtype=jnp.float32)

    critic_loss = wgan_loss(fake_big, real_big)                 # critic-only
    gen_loss = wgan_loss(fake_big)                              # generator-only
    critic_fused, gen_fused = wgan_losses(fake_big, real_big)   # one launch, both
    jax.block_until_ready((critic_loss, gen_loss, critic_fused, gen_fused))

    ref_critic = -(jnp.mean(real_big) - jnp.mean(fake_big))
    ref_gen = -jnp.mean(fake_big)
    assert jnp.allclose(critic_loss, ref_critic, atol=1e-5), (critic_loss, ref_critic)
    assert jnp.allclose(gen_loss, ref_gen, atol=1e-5), (gen_loss, ref_gen)
    assert jnp.allclose(critic_fused, ref_critic, atol=1e-5), (critic_fused, ref_critic)
    assert jnp.allclose(gen_fused, ref_gen, atol=1e-5), (gen_fused, ref_gen)

    # --- bf16 predictions: stay bf16 in HBM (half the DMA bytes), upcast in-kernel.
    fake_bf = jax.random.normal(k5, (640, 1, 16, 16), dtype=jnp.bfloat16)
    real_bf = jax.random.normal(k6, (320, 1, 16, 16), dtype=jnp.bfloat16)
    critic_bf, gen_bf = wgan_losses(fake_bf, real_bf)
    jax.block_until_ready((critic_bf, gen_bf))
    ref_critic_bf = -(jnp.mean(real_bf.astype(jnp.float32))
                      - jnp.mean(fake_bf.astype(jnp.float32)))
    ref_gen_bf = -jnp.mean(fake_bf.astype(jnp.float32))
    assert jnp.allclose(critic_bf, ref_critic_bf, atol=1e-4), (critic_bf, ref_critic_bf)
    assert jnp.allclose(gen_bf, ref_gen_bf, atol=1e-4), (gen_bf, ref_gen_bf)

    print("KERNEL_OK")
</pallas_src>

<mosaic_0001>
module attributes {stable_mosaic.version = 11 : i64} {
  func.func @kernel(%arg0: i32, %arg1: i32, %arg2: memref<2048x128xf32, #tpu.memory_space<vmem>>, %arg3: memref<2048x128xf32, #tpu.memory_space<vmem>>, %arg4: memref<1x8x128xf32, #tpu.memory_space<vmem>>, %arg5: memref<1x8x128xf32, #tpu.memory_space<vmem>>) attributes {dimension_semantics = [#tpu.dimension_semantics<parallel>, #tpu.dimension_semantics<arbitrary>], iteration_bounds = array<i64: 2, 1>, scalar_prefetch = 0 : i64, scratch_operands = 0 : i64, tpu.core_type = #tpu.core_type<tc>, window_params = [{transform_indices = @transform_0, window_bounds = array<i64: 2048, 128>}, {transform_indices = @transform_1, window_bounds = array<i64: 2048, 128>}, {transform_indices = @transform_2, window_bounds = array<i64: 1, 8, 128>}, {transform_indices = @transform_3, window_bounds = array<i64: 1, 8, 128>}]} {
    %c1_i32 = arith.constant 1 : i32
    %0 = arith.muli %arg0, %c1_i32 : i32
    %1 = arith.addi %0, %arg1 : i32
    %c0_i32 = arith.constant 0 : i32
    %2 = arith.cmpi eq, %arg1, %c0_i32 : i32
    %3 = arith.extui %2 : i1 to i32
    %c0_i32_0 = arith.constant 0 : i32
    %4 = arith.cmpi ne, %3, %c0_i32_0 : i32
    scf.if %4 {
      %cst = arith.constant 0.000000e+00 : f32
      %17 = vector.broadcast %cst : f32 to vector<1x8x128xf32>
      %c0 = arith.constant 0 : index
      %c0_9 = arith.constant 0 : index
      %c0_10 = arith.constant 0 : index
      %18 = vector.load %arg4[%c0, %c0_9, %c0_10] : memref<1x8x128xf32, #tpu.memory_space<vmem>>, vector<1x8x128xf32>
      tpu.vector_store %arg4[%c0, %c0_9, %c0_10], %17 {strides = array<i32>} : memref<1x8x128xf32, #tpu.memory_space<vmem>>, vector<1x8x128xf32>,
      %cst_11 = arith.constant 0.000000e+00 : f32
      %19 = vector.broadcast %cst_11 : f32 to vector<1x8x128xf32>
      %c0_12 = arith.constant 0 : index
      %c0_13 = arith.constant 0 : index
      %c0_14 = arith.constant 0 : index
      %20 = vector.load %arg5[%c0_12, %c0_13, %c0_14] : memref<1x8x128xf32, #tpu.memory_space<vmem>>, vector<1x8x128xf32>
      tpu.vector_store %arg5[%c0_12, %c0_13, %c0_14], %19 {strides = array<i32>} : memref<1x8x128xf32, #tpu.memory_space<vmem>>, vector<1x8x128xf32>,
    } else {
    }
    %c1_i32_1 = arith.constant 1 : i32
    %5 = arith.cmpi slt, %1, %c1_i32_1 : i32
    %6 = arith.extui %5 : i1 to i32
    %c0_i32_2 = arith.constant 0 : i32
    %7 = arith.cmpi ne, %6, %c0_i32_2 : i32
    scf.if %7 {
      %c0 = arith.constant 0 : index
      %c0_9 = arith.constant 0 : index
      %17 = vector.load %arg2[%c0, %c0_9] : memref<2048x128xf32, #tpu.memory_space<vmem>>, vector<2048x128xf32>
      %18 = vector.shape_cast %17 : vector<2048x128xf32> to vector<256x8x128xf32>
      %cst = arith.constant dense<0.000000e+00> : vector<8x128xf32>
      %19 = vector.multi_reduction <add>, %18, %cst [0] : vector<256x8x128xf32> to vector<8x128xf32>
      %c0_10 = arith.constant 0 : index
      %c0_11 = arith.constant 0 : index
      %c0_12 = arith.constant 0 : index
      %20 = vector.load %arg4[%c0_10, %c0_11, %c0_12] : memref<1x8x128xf32, #tpu.memory_space<vmem>>, vector<1x8x128xf32>
      %21 = vector.shape_cast %19 : vector<8x128xf32> to vector<1x8x128xf32>
      %22 = arith.addf %20, %21 : vector<1x8x128xf32>
      %c0_13 = arith.constant 0 : index
      %c0_14 = arith.constant 0 : index
      %c0_15 = arith.constant 0 : index
      %23 = vector.load %arg4[%c0_13, %c0_14, %c0_15] : memref<1x8x128xf32, #tpu.memory_space<vmem>>, vector<1x8x128xf32>
      tpu.vector_store %arg4[%c0_13, %c0_14, %c0_15], %22 {strides = array<i32>} : memref<1x8x128xf32, #tpu.memory_space<vmem>>, vector<1x8x128xf32>,
    } else {
    }
    %c1_i32_3 = arith.constant 1 : i32
    %8 = arith.cmpi eq, %1, %c1_i32_3 : i32
    %9 = arith.extui %8 : i1 to i32
    %c0_i32_4 = arith.constant 0 : i32
    %10 = arith.cmpi ne, %9, %c0_i32_4 : i32
    scf.if %10 {
      %c0 = arith.constant 0 : index
      %c0_9 = arith.constant 0 : index
      %17 = vector.load %arg2[%c0, %c0_9] : memref<2048x128xf32, #tpu.memory_space<vmem>>, vector<2048x128xf32>
      %18 = tpu.iota {dimensions = array<i32: 0>} : vector<2048x128xi32>
      %c1552_i32 = arith.constant 1552 : i32
      %19 = vector.broadcast %c1552_i32 : i32 to vector<2048x128xi32>
      %20 = arith.cmpi slt, %18, %19 : vector<2048x128xi32>
      %cst = arith.constant 0.000000e+00 : f32
      %21 = vector.broadcast %cst : f32 to vector<2048x128xf32>
      %22 = arith.select %20, %17, %21 : vector<2048x128xi1>, vector<2048x128xf32>
      %23 = vector.shape_cast %22 : vector<2048x128xf32> to vector<256x8x128xf32>
      %cst_10 = arith.constant dense<0.000000e+00> : vector<8x128xf32>
      %24 = vector.multi_reduction <add>, %23, %cst_10 [0] : vector<256x8x128xf32> to vector<8x128xf32>
      %c0_11 = arith.constant 0 : index
      %c0_12 = arith.constant 0 : index
      %c0_13 = arith.constant 0 : index
      %25 = vector.load %arg4[%c0_11, %c0_12, %c0_13] : memref<1x8x128xf32, #tpu.memory_space<vmem>>, vector<1x8x128xf32>
      %26 = vector.shape_cast %24 : vector<8x128xf32> to vector<1x8x128xf32>
      %27 = arith.addf %25, %26 : vector<1x8x128xf32>
      %c0_14 = arith.constant 0 : index
      %c0_15 = arith.constant 0 : index
      %c0_16 = arith.constant 0 : index
      %28 = vector.load %arg4[%c0_14, %c0_15, %c0_16] : memref<1x8x128xf32, #tpu.memory_space<vmem>>, vector<1x8x128xf32>
      tpu.vector_store %arg4[%c0_14, %c0_15, %c0_16], %27 {strides = array<i32>} : memref<1x8x128xf32, #tpu.memory_space<vmem>>, vector<1x8x128xf32>,
    } else {
    }
    %c0_i32_5 = arith.constant 0 : i32
    %11 = arith.cmpi slt, %1, %c0_i32_5 : i32
    %12 = arith.extui %11 : i1 to i32
    %c0_i32_6 = arith.constant 0 : i32
    %13 = arith.cmpi ne, %12, %c0_i32_6 : i32
    scf.if %13 {
      %c0 = arith.constant 0 : index
      %c0_9 = arith.constant 0 : index
      %17 = vector.load %arg3[%c0, %c0_9] : memref<2048x128xf32, #tpu.memory_space<vmem>>, vector<2048x128xf32>
      %18 = vector.shape_cast %17 : vector<2048x128xf32> to vector<256x8x128xf32>
      %cst = arith.constant dense<0.000000e+00> : vector<8x128xf32>
      %19 = vector.multi_reduction <add>, %18, %cst [0] : vector<256x8x128xf32> to vector<8x128xf32>
      %c0_10 = arith.constant 0 : index
      %c0_11 = arith.constant 0 : index
      %c0_12 = arith.constant 0 : index
      %20 = vector.load %arg5[%c0_10, %c0_11, %c0_12] : memref<1x8x128xf32, #tpu.memory_space<vmem>>, vector<1x8x128xf32>
      %21 = vector.shape_cast %19 : vector<8x128xf32> to vector<1x8x128xf32>
      %22 = arith.addf %20, %21 : vector<1x8x128xf32>
      %c0_13 = arith.constant 0 : index
      %c0_14 = arith.constant 0 : index
      %c0_15 = arith.constant 0 : index
      %23 = vector.load %arg5[%c0_13, %c0_14, %c0_15] : memref<1x8x128xf32, #tpu.memory_space<vmem>>, vector<1x8x128xf32>
      tpu.vector_store %arg5[%c0_13, %c0_14, %c0_15], %22 {strides = array<i32>} : memref<1x8x128xf32, #tpu.memory_space<vmem>>, vector<1x8x128xf32>,
    } else {
    }
    %c0_i32_7 = arith.constant 0 : i32
    %14 = arith.cmpi eq, %1, %c0_i32_7 : i32
    %15 = arith.extui %14 : i1 to i32
    %c0_i32_8 = arith.constant 0 : i32
    %16 = arith.cmpi ne, %15, %c0_i32_8 : i32
    scf.if %16 {
      %c0 = arith.constant 0 : index
      %c0_9 = arith.constant 0 : index
      %17 = vector.load %arg3[%c0, %c0_9] : memref<2048x128xf32, #tpu.memory_space<vmem>>, vector<2048x128xf32>
      %18 = tpu.iota {dimensions = array<i32: 0>} : vector<2048x128xi32>
      %c1352_i32 = arith.constant 1352 : i32
      %19 = vector.broadcast %c1352_i32 : i32 to vector<2048x128xi32>
      %20 = arith.cmpi slt, %18, %19 : vector<2048x128xi32>
      %cst = arith.constant 0.000000e+00 : f32
      %21 = vector.broadcast %cst : f32 to vector<2048x128xf32>
      %22 = arith.select %20, %17, %21 : vector<2048x128xi1>, vector<2048x128xf32>
      %23 = vector.shape_cast %22 : vector<2048x128xf32> to vector<256x8x128xf32>
      %cst_10 = arith.constant dense<0.000000e+00> : vector<8x128xf32>
      %24 = vector.multi_reduction <add>, %23, %cst_10 [0] : vector<256x8x128xf32> to vector<8x128xf32>
      %c0_11 = arith.constant 0 : index
      %c0_12 = arith.constant 0 : index
      %c0_13 = arith.constant 0 : index
      %25 = vector.load %arg5[%c0_11, %c0_12, %c0_13] : memref<1x8x128xf32, #tpu.memory_space<vmem>>, vector<1x8x128xf32>
      %26 = vector.shape_cast %24 : vector<8x128xf32> to vector<1x8x128xf32>
      %27 = arith.addf %25, %26 : vector<1x8x128xf32>
      %c0_14 = arith.constant 0 : index
      %c0_15 = arith.constant 0 : index
      %c0_16 = arith.constant 0 : index
      %28 = vector.load %arg5[%c0_14, %c0_15, %c0_16] : memref<1x8x128xf32, #tpu.memory_space<vmem>>, vector<1x8x128xf32>
      tpu.vector_store %arg5[%c0_14, %c0_15, %c0_16], %27 {strides = array<i32>} : memref<1x8x128xf32, #tpu.memory_space<vmem>>, vector<1x8x128xf32>,
    } else {
    }
    return
  }
  func.func @transform_0(%arg0: i32, %arg1: i32) -> (i32, i32) {
    %c1_i32 = arith.constant 1 : i32
    %0 = arith.muli %arg0, %c1_i32 : i32
    %1 = arith.addi %0, %arg1 : i32
    %c1_i32_0 = arith.constant 1 : i32
    %2 = arith.minsi %1, %c1_i32_0 : i32
    %c0_i32 = arith.constant 0 : i32
    %c0_i32_1 = arith.constant 0 : i32
    return %2, %c0_i32 : i32, i32
  }
  func.func @transform_1(%arg0: i32, %arg1: i32) -> (i32, i32) {
    %c1_i32 = arith.constant 1 : i32
    %0 = arith.muli %arg0, %c1_i32 : i32
    %1 = arith.addi %0, %arg1 : i32
    %c0_i32 = arith.constant 0 : i32
    %2 = arith.minsi %1, %c0_i32 : i32
    %c0_i32_0 = arith.constant 0 : i32
    %c0_i32_1 = arith.constant 0 : i32
    return %2, %c0_i32_0 : i32, i32
  }
  func.func @transform_2(%arg0: i32, %arg1: i32) -> (i32, i32, i32) {
    %c0_i32 = arith.constant 0 : i32
    %c0_i32_0 = arith.constant 0 : i32
    %c0_i32_1 = arith.constant 0 : i32
    return %arg0, %c0_i32, %c0_i32_0 : i32, i32, i32
  }
  func.func @transform_3(%arg0: i32, %arg1: i32) -> (i32, i32, i32) {
    %c0_i32 = arith.constant 0 : i32
    %c0_i32_0 = arith.constant 0 : i32
    %c0_i32_1 = arith.constant 0 : i32
    return %arg0, %c0_i32, %c0_i32_0 : i32, i32, i32
  }
}

</mosaic_0001>

<bundles_post_ra>
// kernel: _critic_losses_pallas.1
= control target key start
LH: loop header
LB: loop body
LE: loop exit
PB: predicated region body
PF: predicated region fallthrough
CT: control target
= control target key end

     0   :  { %s4096_s12 = smov 0   ;;  %s4098_s13 = smov 0   ;;  %s5038_s0 = inlined_call_operand.vmem [shape: f32[3600,128], index: 0, kind: input, shape index: {}]   ;;  %s5039_s1 = inlined_call_operand.vmem [shape: f32[1352,128], index: 1, kind: input, shape index: {}]   ;;  %s5040_s2 = inlined_call_operand.vmem [shape: f32[2,8,128], index: 2, kind: output, shape index: {0}]   ;;  %s5041_s3 = inlined_call_operand.vmem [shape: f32[2,8,128], index: 3, kind: output, shape index: {1}]  }
   0x1   :  { %s4100_s14 = smov 0  }
   0x2 LB: > { %s26_s15 = sadd.s32 1, %s4069_s13  ;;  %p4013_p0 = scmp.ge.s32.totalorder %s4073_s14, 1  ;;  %s4073_s14 = sphi %s4100_s14, %s14_s14   ;;  %s4069_s13 = sphi %s4098_s13, %s5043_s13   ;;  %s4065_s12 = sphi %s4096_s12, %s5042_s12  }
   0x3   : > { %p28_p1 = scmp.ge.s32.totalorder %s26_s15, 2  ;;  %p200_p2 = scmp.lt.s32.totalorder %s4073_s14, 3 }
   0x5   : > { %s5045_s15 = smov (%p28_p1, %s26_s15), 0  ;;  %p201_p3 = pnand %p4013_p0, %p200_p2 }
   0x6   : > { %p245_p4 = scmp.lt.s32.totalorder (!%p201_p3), %s4065_s12, 1  ;;  %p265_p5 = scmp.lt.s32.totalorder (!%p201_p3), %s4065_s12, 0 }
   0x7   : > { %204 = sbr.rel (%p201_p3) target bundleno = 1804 (0x70c), region = 28  ;;  %p4020_p8 = scmp.ge.s32.totalorder (!%p201_p3), %s4065_s12, 1 }
   0xc   : > { %s246_s16 = scalar_select %p245_p4, %s4065_s12, 1  ;;  %v4075_v0 = vmov 0.0  }
   0xd   : > { %s266_s17 = scalar_select %p265_p5, %s4065_s12, 0 }
   0xe   : > { %s4014_s18 = sshll.u32 %s246_s16, 8  ;;  %s4018_s19 = sshll.u32 %s246_s16, 3 }
   0xf   : > { %p252_p6 = scmp.lt.s32.totalorder %s4014_s18, 449  ;;  %s4016_s20 = sshll.u32 %s266_s17, 8 }
  0x10   : > { %p270_p7 = scmp.lt.s32.totalorder %s4016_s20, 168  ;;  %s4123_s23 = scalar_lea.vmem %s5040_s2, %s4018_s19 }
  0x11   : > { %s5047_s18 = smov (!%p252_p6, %s4014_s18), 449  ;;  %293 = vst [vmem:[%s4123_s23] sm:$0xff] %v4075_v0  ;;  %s4129_s27 = scalar_lea.vmem %s5041_s3, %s4018_s19 }
  0x12   : > { %s5049_s20 = smov (!%p270_p7, %s4016_s20), 168  ;;  %s4015_s24 = sshll.u32 %s5047_s18, 3  ;;  %294 = vst [vmem:[%s4129_s27] sm:$0xff] %v4075_v0 }
  0x13   : > { %s4134_s30 = scalar_lea.vmem %s5038_s0, %s4015_s24  ;;  %s4017_s4 = sshll.u32 %s5049_s20, 3 }
  0x14   : > { %s4140_s7 = scalar_lea.vmem %s5039_s1, %s4017_s4  ;;  %298 = sbr.rel (%p4020_p8) target bundleno = 539 (0x21b), region = 36 }
  0x19   : > { %v299_v1 = vld [vmem:[%s4134_s30] sm:$0xff]  ;;  %v300_v2 = vld [vmem:[%s4134_s30 + $0x8] sm:$0xff]  ;;  %v301_v3 = vld [vmem:[%s4134_s30 + $0x10] sm:$0xff] }
  0x1a   : > { %v555_v4 = vadd.f32 %v300_v2, %v299_v1  ;;  %v302_v5 = vld [vmem:[%s4134_s30 + $0x18] sm:$0xff]  ;;  %v303_v7 = vld [vmem:[%s4134_s30 + $0x20] sm:$0xff]  ;;  %v304_v9 = vld [vmem:[%s4134_s30 + $0x28] sm:$0xff] }
  0x1b   : > { %v305_v11 = vld [vmem:[%s4134_s30 + $0x30] sm:$0xff]  ;;  %v306_v13 = vld [vmem:[%s4134_s30 + $0x38] sm:$0xff]  ;;  %v307_v15 = vld [vmem:[%s4134_s30 + $0x40] sm:$0xff] }
  0x1c   : > { %v556_v6 = vadd.f32 %v555_v4, %v301_v3  ;;  %v308_v17 = vld [vmem:[%s4134_s30 + $0x48] sm:$0xff]  ;;  %v309_v19 = vld [vmem:[%s4134_s30 + $0x50] sm:$0xff]  ;;  %v310_v21 = vld [vmem:[%s4134_s30 + $0x58] sm:$0xff] }
  0x1d   : > { %v311_v23 = vld [vmem:[%s4134_s30 + $0x60] sm:$0xff]  ;;  %v312_v25 = vld [vmem:[%s4134_s30 + $0x68] sm:$0xff]  ;;  %v313_v27 = vld [vmem:[%s4134_s30 + $0x70] sm:$0xff] }
  0x1e   : > { %v557_v8 = vadd.f32 %v556_v6, %v302_v5  ;;  %v314_v29 = vld [vmem:[%s4134_s30 + $0x78] sm:$0xff]  ;;  %v315_v31 = vld [vmem:[%s4134_s30 + $0x80] sm:$0xff]  ;;  %v316_v33 = vld [vmem:[%s4134_s30 + $0x88] sm:$0xff] }
  0x1f   : > { %v317_v35 = vld [vmem:[%s4134_s30 + $0x90] sm:$0xff]  ;;  %v318_v37 = vld [vmem:[%s4134_s30 + $0x98] sm:$0xff]  ;;  %v319_v39 = vld [vmem:[%s4134_s30 + $0xa0] sm:$0xff] }
  0x20   : > { %v558_v10 = vadd.f32 %v557_v8, %v303_v7  ;;  %v320_v41 = vld [vmem:[%s4134_s30 + $0xa8] sm:$0xff]  ;;  %v321_v43 = vld [vmem:[%s4134_s30 + $0xb0] sm:$0xff]  ;;  %v322_v45 = vld [vmem:[%s4134_s30 + $0xb8] sm:$0xff] }
  0x21   : > { %v323_v47 = vld [vmem:[%s4134_s30 + $0xc0] sm:$0xff]  ;;  %v324_v49 = vld [vmem:[%s4134_s30 + $0xc8] sm:$0xff]  ;;  %v325_v51 = vld [vmem:[%s4134_s30 + $0xd0] sm:$0xff] }
  0x22   : > { %v559_v12 = vadd.f32 %v558_v10, %v304_v9  ;;  %v326_v53 = vld [vmem:[%s4134_s30 + $0xd8] sm:$0xff]  ;;  %v327_v55 = vld [vmem:[%s4134_s30 + $0xe0] sm:$0xff]  ;;  %v328_v57 = vld [vmem:[%s4134_s30 + $0xe8] sm:$0xff] }
  0x23   : > { %v329_v59 = vld [vmem:[%s4134_s30 + $0xf0] sm:$0xff]  ;;  %v330_v61 = vld [vmem:[%s4134_s30 + $0xf8] sm:$0xff]  ;;  %v331_v63 = vld [vmem:[%s4134_s30 + $0x100] sm:$0xff] }
  0x24   : > { %v560_v14 = vadd.f32 %v559_v12, %v305_v11  ;;  %v332_v1 = vld [vmem:[%s4134_s30 + $0x108] sm:$0xff]  ;;  %v333_v3 = vld [vmem:[%s4134_s30 + $0x110] sm:$0xff]  ;;  %v334_v5 = vld [vmem:[%s4134_s30 + $0x118] sm:$0xff] }
  0x25   : > { %v335_v7 = vld [vmem:[%s4134_s30 + $0x120] sm:$0xff]  ;;  %v336_v9 = vld [vmem:[%s4134_s30 + $0x128] sm:$0xff]  ;;  %v337_v11 = vld [vmem:[%s4134_s30 + $0x130] sm:$0xff] }
  0x26   : > { %v561_v16 = vadd.f32 %v560_v14, %v306_v13  ;;  %v338_v13 = vld [vmem:[%s4134_s30 + $0x138] sm:$0xff] }
  0x28   : > { %v562_v18 = vadd.f32 %v561_v16, %v307_v15  ;;  %v339_v15 = vld [vmem:[%s4134_s30 + $0x140] sm:$0xff] }
  0x2a   : > { %v563_v20 = vadd.f32 %v562_v18, %v308_v17  ;;  %v340_v17 = vld [vmem:[%s4134_s30 + $0x148] sm:$0xff] }
  0x2c   : > { %v564_v22 = vadd.f32 %v563_v20, %v309_v19  ;;  %v341_v19 = vld [vmem:[%s4134_s30 + $0x150] sm:$0xff] }
  0x2e   : > { %v565_v24 = vadd.f32 %v564_v22, %v310_v21  ;;  %v342_v21 = vld [vmem:[%s4134_s30 + $0x158] sm:$0xff] }
  0x30   : > { %v566_v26 = vadd.f32 %v565_v24, %v311_v23  ;;  %v343_v23 = vld [vmem:[%s4134_s30 + $0x160] sm:$0xff] }
  0x32   : > { %v567_v28 = vadd.f32 %v566_v26, %v312_v25  ;;  %v344_v25 = vld [vmem:[%s4134_s30 + $0x168] sm:$0xff] }
  0x34   : > { %v568_v30 = vadd.f32 %v567_v28, %v313_v27  ;;  %v345_v27 = vld [vmem:[%s4134_s30 + $0x170] sm:$0xff] }
  0x36   : > { %v569_v32 = vadd.f32 %v568_v30, %v314_v29  ;;  %v346_v29 = vld [vmem:[%s4134_s30 + $0x178] sm:$0xff] }
  0x38   : > { %v570_v34 = vadd.f32 %v569_v32, %v315_v31  ;;  %v347_v31 = vld [vmem:[%s4134_s30 + $0x180] sm:$0xff] }
  0x3a   : > { %v571_v36 = vadd.f32 %v570_v34, %v316_v33  ;;  %v348_v33 = vld [vmem:[%s4134_s30 + $0x188] sm:$0xff] }
  0x3c   : > { %v572_v38 = vadd.f32 %v571_v36, %v317_v35  ;;  %v349_v35 = vld [vmem:[%s4134_s30 + $0x190] sm:$0xff] }
  0x3e   : > { %v573_v40 = vadd.f32 %v572_v38, %v318_v37  ;;  %v350_v37 = vld [vmem:[%s4134_s30 + $0x198] sm:$0xff] }
  0x40   : > { %v574_v42 = vadd.f32 %v573_v40, %v319_v39  ;;  %v351_v39 = vld [vmem:[%s4134_s30 + $0x1a0] sm:$0xff] }
  0x42   : > { %v575_v44 = vadd.f32 %v574_v42, %v320_v41  ;;  %v352_v41 = vld [vmem:[%s4134_s30 + $0x1a8] sm:$0xff] }
  0x44   : > { %v576_v46 = vadd.f32 %v575_v44, %v321_v43  ;;  %v353_v43 = vld [vmem:[%s4134_s30 + $0x1b0] sm:$0xff] }
  0x46   : > { %v577_v48 = vadd.f32 %v576_v46, %v322_v45  ;;  %v354_v45 = vld [vmem:[%s4134_s30 + $0x1b8] sm:$0xff] }
  0x48   : > { %v578_v50 = vadd.f32 %v577_v48, %v323_v47  ;;  %v355_v47 = vld [vmem:[%s4134_s30 + $0x1c0] sm:$0xff] }
  0x4a   : > { %v579_v52 = vadd.f32 %v578_v50, %v324_v49  ;;  %v356_v49 = vld [vmem:[%s4134_s30 + $0x1c8] sm:$0xff] }
  0x4c   : > { %v580_v54 = vadd.f32 %v579_v52, %v325_v51  ;;  %v357_v51 = vld [vmem:[%s4134_s30 + $0x1d0] sm:$0xff] }
  0x4e   : > { %v581_v56 = vadd.f32 %v580_v54, %v326_v53  ;;  %v358_v53 = vld [vmem:[%s4134_s30 + $0x1d8] sm:$0xff] }
  0x50   : > { %v582_v58 = vadd.f32 %v581_v56, %v327_v55  ;;  %v359_v55 = vld [vmem:[%s4134_s30 + $0x1e0] sm:$0xff] }
  0x52   : > { %v583_v60 = vadd.f32 %v582_v58, %v328_v57  ;;  %v360_v57 = vld [vmem:[%s4134_s30 + $0x1e8] sm:$0xff] }
  0x54   : > { %v584_v62 = vadd.f32 %v583_v60, %v329_v59  ;;  %v361_v59 = vld [vmem:[%s4134_s30 + $0x1f0] sm:$0xff] }
  0x56   : > { %v585_v0 = vadd.f32 %v584_v62, %v330_v61  ;;  %v362_v61 = vld [vmem:[%s4134_s30 + $0x1f8] sm:$0xff] }
  0x58   : > { %v586_v2 = vadd.f32 %v585_v0, %v331_v63  ;;  %v363_v63 = vld [vmem:[%s4134_s30 + $0x200] sm:$0xff] }
  0x5a   : > { %v587_v4 = vadd.f32 %v586_v2, %v332_v1  ;;  %v364_v1 = vld [vmem:[%s4134_s30 + $0x208] sm:$0xff] }
  0x5c   : > { %v588_v6 = vadd.f32 %v587_v4, %v333_v3  ;;  %v365_v3 = vld [vmem:[%s4134_s30 + $0x210] sm:$0xff] }
  0x5e   : > { %v589_v8 = vadd.f32 %v588_v6, %v334_v5  ;;  %v366_v5 = vld [vmem:[%s4134_s30 + $0x218] sm:$0xff] }
  0x60   : > { %v590_v10 = vadd.f32 %v589_v8, %v335_v7  ;;  %v367_v7 = vld [vmem:[%s4134_s30 + $0x220] sm:$0xff] }
  0x62   : > { %v591_v12 = vadd.f32 %v590_v10, %v336_v9  ;;  %v368_v9 = vld [vmem:[%s4134_s30 + $0x228] sm:$0xff] }
  0x64   : > { %v592_v14 = vadd.f32 %v591_v12, %v337_v11  ;;  %v369_v11 = vld [vmem:[%s4134_s30 + $0x230] sm:$0xff] }
  0x66   : > { %v593_v16 = vadd.f32 %v592_v14, %v338_v13  ;;  %v370_v13 = vld [vmem:[%s4134_s30 + $0x238] sm:$0xff] }
  0x68   : > { %v594_v18 = vadd.f32 %v593_v16, %v339_v15  ;;  %v371_v15 = vld [vmem:[%s4134_s30 + $0x240] sm:$0xff] }
  0x6a   : > { %v595_v20 = vadd.f32 %v594_v18, %v340_v17  ;;  %v372_v17 = vld [vmem:[%s4134_s30 + $0x248] sm:$0xff] }
  0x6c   : > { %v596_v22 = vadd.f32 %v595_v20, %v341_v19  ;;  %v373_v19 = vld [vmem:[%s4134_s30 + $0x250] sm:$0xff] }
  0x6e   : > { %v597_v24 = vadd.f32 %v596_v22, %v342_v21  ;;  %v374_v21 = vld [vmem:[%s4134_s30 + $0x258] sm:$0xff] }
  0x70   : > { %v598_v26 = vadd.f32 %v597_v24, %v343_v23  ;;  %v375_v23 = vld [vmem:[%s4134_s30 + $0x260] sm:$0xff] }
  0x72   : > { %v599_v28 = vadd.f32 %v598_v26, %v344_v25  ;;  %v376_v25 = vld [vmem:[%s4134_s30 + $0x268] sm:$0xff] }
  0x74   : > { %v600_v30 = vadd.f32 %v599_v28, %v345_v27  ;;  %v377_v27 = vld [vmem:[%s4134_s30 + $0x270] sm:$0xff] }
  0x76   : > { %v601_v32 = vadd.f32 %v600_v30, %v346_v29  ;;  %v378_v29 = vld [vmem:[%s4134_s30 + $0x278] sm:$0xff] }
  0x78   : > { %v602_v34 = vadd.f32 %v601_v32, %v347_v31  ;;  %v379_v31 = vld [vmem:[%s4134_s30 + $0x280] sm:$0xff] }
  0x7a   : > { %v603_v36 = vadd.f32 %v602_v34, %v348_v33  ;;  %v380_v33 = vld [vmem:[%s4134_s30 + $0x288] sm:$0xff] }
  0x7c   : > { %v604_v38 = vadd.f32 %v603_v36, %v349_v35  ;;  %v381_v35 = vld [vmem:[%s4134_s30 + $0x290] sm:$0xff] }
  0x7e   : > { %v605_v40 = vadd.f32 %v604_v38, %v350_v37  ;;  %v382_v37 = vld [vmem:[%s4134_s30 + $0x298] sm:$0xff] }
  0x80   : > { %v606_v42 = vadd.f32 %v605_v40, %v351_v39  ;;  %v383_v39 = vld [vmem:[%s4134_s30 + $0x2a0] sm:$0xff] }
  0x82   : > { %v607_v44 = vadd.f32 %v606_v42, %v352_v41  ;;  %v384_v41 = vld [vmem:[%s4134_s30 + $0x2a8] sm:$0xff] }
  0x84   : > { %v608_v46 = vadd.f32 %v607_v44, %v353_v43  ;;  %v385_v43 = vld [vmem:[%s4134_s30 + $0x2b0] sm:$0xff] }
  0x86   : > { %v609_v48 = vadd.f32 %v608_v46, %v354_v45  ;;  %v386_v45 = vld [vmem:[%s4134_s30 + $0x2b8] sm:$0xff] }
  0x88   : > { %v610_v50 = vadd.f32 %v609_v48, %v355_v47  ;;  %v387_v47 = vld [vmem:[%s4134_s30 + $0x2c0] sm:$0xff] }
  0x8a   : > { %v611_v52 = vadd.f32 %v610_v50, %v356_v49  ;;  %v388_v49 = vld [vmem:[%s4134_s30 + $0x2c8] sm:$0xff] }
  0x8c   : > { %v612_v54 = vadd.f32 %v611_v52, %v357_v51  ;;  %v389_v51 = vld [vmem:[%s4134_s30 + $0x2d0] sm:$0xff] }
  0x8e   : > { %v613_v56 = vadd.f32 %v612_v54, %v358_v53  ;;  %v390_v53 = vld [vmem:[%s4134_s30 + $0x2d8] sm:$0xff] }
  0x90   : > { %v614_v58 = vadd.f32 %v613_v56, %v359_v55  ;;  %v391_v55 = vld [vmem:[%s4134_s30 + $0x2e0] sm:$0xff] }
  0x92   : > { %v615_v60 = vadd.f32 %v614_v58, %v360_v57  ;;  %v392_v57 = vld [vmem:[%s4134_s30 + $0x2e8] sm:$0xff] }
  0x94   : > { %v616_v62 = vadd.f32 %v615_v60, %v361_v59  ;;  %v393_v59 = vld [vmem:[%s4134_s30 + $0x2f0] sm:$0xff] }
  0x96   : > { %v617_v0 = vadd.f32 %v616_v62, %v362_v61  ;;  %v394_v61 = vld [vmem:[%s4134_s30 + $0x2f8] sm:$0xff] }
  0x98   : > { %v618_v2 = vadd.f32 %v617_v0, %v363_v63  ;;  %v395_v63 = vld [vmem:[%s4134_s30 + $0x300] sm:$0xff] }
  0x9a   : > { %v619_v4 = vadd.f32 %v618_v2, %v364_v1  ;;  %v396_v1 = vld [vmem:[%s4134_s30 + $0x308] sm:$0xff] }
  0x9c   : > { %v620_v6 = vadd.f32 %v619_v4, %v365_v3  ;;  %v397_v3 = vld [vmem:[%s4134_s30 + $0x310] sm:$0xff] }
  0x9e   : > { %v621_v8 = vadd.f32 %v620_v6, %v366_v5  ;;  %v398_v5 = vld [vmem:[%s4134_s30 + $0x318] sm:$0xff] }
  0xa0   : > { %v622_v10 = vadd.f32 %v621_v8, %v367_v7  ;;  %v399_v7 = vld [vmem:[%s4134_s30 + $0x320] sm:$0xff] }
  0xa2   : > { %v623_v12 = vadd.f32 %v622_v10, %v368_v9  ;;  %v400_v9 = vld [vmem:[%s4134_s30 + $0x328] sm:$0xff] }
  0xa4   : > { %v624_v14 = vadd.f32 %v623_v12, %v369_v11  ;;  %v401_v11 = vld [vmem:[%s4134_s30 + $0x330] sm:$0xff] }
  0xa6   : > { %v625_v16 = vadd.f32 %v624_v14, %v370_v13  ;;  %v402_v13 = vld [vmem:[%s4134_s30 + $0x338] sm:$0xff] }
  0xa8   : > { %v626_v18 = vadd.f32 %v625_v16, %v371_v15  ;;  %v403_v15 = vld [vmem:[%s4134_s30 + $0x340] sm:$0xff] }
  0xaa   : > { %v627_v20 = vadd.f32 %v626_v18, %v372_v17  ;;  %v404_v17 = vld [vmem:[%s4134_s30 + $0x348] sm:$0xff] }
  0xac   : > { %v628_v22 = vadd.f32 %v627_v20, %v373_v19  ;;  %v405_v19 = vld [vmem:[%s4134_s30 + $0x350] sm:$0xff] }
  0xae   : > { %v629_v24 = vadd.f32 %v628_v22, %v374_v21  ;;  %v406_v21 = vld [vmem:[%s4134_s30 + $0x358] sm:$0xff] }
  0xb0   : > { %v630_v26 = vadd.f32 %v629_v24, %v375_v23  ;;  %v407_v23 = vld [vmem:[%s4134_s30 + $0x360] sm:$0xff] }
  0xb2   : > { %v631_v28 = vadd.f32 %v630_v26, %v376_v25  ;;  %v408_v25 = vld [vmem:[%s4134_s30 + $0x368] sm:$0xff] }
  0xb4   : > { %v632_v30 = vadd.f32 %v631_v28, %v377_v27  ;;  %v409_v27 = vld [vmem:[%s4134_s30 + $0x370] sm:$0xff] }
  0xb6   : > { %v633_v32 = vadd.f32 %v632_v30, %v378_v29  ;;  %v410_v29 = vld [vmem:[%s4134_s30 + $0x378] sm:$0xff] }
  0xb8   : > { %v634_v34 = vadd.f32 %v633_v32, %v379_v31  ;;  %v411_v31 = vld [vmem:[%s4134_s30 + $0x380] sm:$0xff] }
  0xba   : > { %v635_v36 = vadd.f32 %v634_v34, %v380_v33  ;;  %v412_v33 = vld [vmem:[%s4134_s30 + $0x388] sm:$0xff] }
  0xbc   : > { %v636_v38 = vadd.f32 %v635_v36, %v381_v35  ;;  %v413_v35 = vld [vmem:[%s4134_s30 + $0x390] sm:$0xff] }
  0xbe   : > { %v637_v40 = vadd.f32 %v636_v38, %v382_v37  ;;  %v414_v37 = vld [vmem:[%s4134_s30 + $0x398] sm:$0xff] }
  0xc0   : > { %v638_v42 = vadd.f32 %v637_v40, %v383_v39  ;;  %v415_v39 = vld [vmem:[%s4134_s30 + $0x3a0] sm:$0xff] }
  0xc2   : > { %v639_v44 = vadd.f32 %v638_v42, %v384_v41  ;;  %v416_v41 = vld [vmem:[%s4134_s30 + $0x3a8] sm:$0xff] }
  0xc4   : > { %v640_v46 = vadd.f32 %v639_v44, %v385_v43  ;;  %v417_v43 = vld [vmem:[%s4134_s30 + $0x3b0] sm:$0xff] }
  0xc6   : > { %v641_v48 = vadd.f32 %v640_v46, %v386_v45  ;;  %v418_v45 = vld [vmem:[%s4134_s30 + $0x3b8] sm:$0xff] }
  0xc8   : > { %v642_v50 = vadd.f32 %v641_v48, %v387_v47  ;;  %v419_v47 = vld [vmem:[%s4134_s30 + $0x3c0] sm:$0xff] }
  0xca   : > { %v643_v52 = vadd.f32 %v642_v50, %v388_v49  ;;  %v420_v49 = vld [vmem:[%s4134_s30 + $0x3c8] sm:$0xff] }
  0xcc   : > { %v644_v54 = vadd.f32 %v643_v52, %v389_v51  ;;  %v421_v51 = vld [vmem:[%s4134_s30 + $0x3d0] sm:$0xff] }
  0xce   : > { %v645_v56 = vadd.f32 %v644_v54, %v390_v53  ;;  %v422_v53 = vld [vmem:[%s4134_s30 + $0x3d8] sm:$0xff] }
  0xd0   : > { %v646_v58 = vadd.f32 %v645_v56, %v391_v55  ;;  %v423_v55 = vld [vmem:[%s4134_s30 + $0x3e0] sm:$0xff] }
  0xd2   : > { %v647_v60 = vadd.f32 %v646_v58, %v392_v57  ;;  %v424_v57 = vld [vmem:[%s4134_s30 + $0x3e8] sm:$0xff] }
  0xd4   : > { %v648_v62 = vadd.f32 %v647_v60, %v393_v59  ;;  %v425_v59 = vld [vmem:[%s4134_s30 + $0x3f0] sm:$0xff] }
  0xd6   : > { %v649_v0 = vadd.f32 %v648_v62, %v394_v61  ;;  %v426_v61 = vld [vmem:[%s4134_s30 + $0x3f8] sm:$0xff] }
  0xd8   : > { %v650_v2 = vadd.f32 %v649_v0, %v395_v63  ;;  %v427_v63 = vld [vmem:[%s4134_s30 + $0x400] sm:$0xff] }
  0xda   : > { %v651_v4 = vadd.f32 %v650_v2, %v396_v1  ;;  %v428_v1 = vld [vmem:[%s4134_s30 + $0x408] sm:$0xff] }
  0xdc   : > { %v652_v6 = vadd.f32 %v651_v4, %v397_v3  ;;  %v429_v3 = vld [vmem:[%s4134_s30 + $0x410] sm:$0xff] }
  0xde   : > { %v653_v8 = vadd.f32 %v652_v6, %v398_v5  ;;  %v430_v5 = vld [vmem:[%s4134_s30 + $0x418] sm:$0xff] }
  0xe0   : > { %v654_v10 = vadd.f32 %v653_v8, %v399_v7  ;;  %v431_v7 = vld [vmem:[%s4134_s30 + $0x420] sm:$0xff] }
  0xe2   : > { %v655_v12 = vadd.f32 %v654_v10, %v400_v9  ;;  %v432_v9 = vld [vmem:[%s4134_s30 + $0x428] sm:$0xff] }
  0xe4   : > { %v656_v14 = vadd.f32 %v655_v12, %v401_v11  ;;  %v433_v11 = vld [vmem:[%s4134_s30 + $0x430] sm:$0xff] }
  0xe6   : > { %v657_v16 = vadd.f32 %v656_v14, %v402_v13  ;;  %v434_v13 = vld [vmem:[%s4134_s30 + $0x438] sm:$0xff] }
  0xe8   : > { %v658_v18 = vadd.f32 %v657_v16, %v403_v15  ;;  %v435_v15 = vld [vmem:[%s4134_s30 + $0x440] sm:$0xff] }
  0xea   : > { %v659_v20 = vadd.f32 %v658_v18, %v404_v17  ;;  %v436_v17 = vld [vmem:[%s4134_s30 + $0x448] sm:$0xff] }
  0xec   : > { %v660_v22 = vadd.f32 %v659_v20, %v405_v19  ;;  %v437_v19 = vld [vmem:[%s4134_s30 + $0x450] sm:$0xff] }
  0xee   : > { %v661_v24 = vadd.f32 %v660_v22, %v406_v21  ;;  %v438_v21 = vld [vmem:[%s4134_s30 + $0x458] sm:$0xff] }
  0xf0   : > { %v662_v26 = vadd.f32 %v661_v24, %v407_v23  ;;  %v439_v23 = vld [vmem:[%s4134_s30 + $0x460] sm:$0xff] }
  0xf2   : > { %v663_v28 = vadd.f32 %v662_v26, %v408_v25  ;;  %v440_v25 = vld [vmem:[%s4134_s30 + $0x468] sm:$0xff] }
  0xf4   : > { %v664_v30 = vadd.f32 %v663_v28, %v409_v27  ;;  %v441_v27 = vld [vmem:[%s4134_s30 + $0x470] sm:$0xff] }
  0xf6   : > { %v665_v32 = vadd.f32 %v664_v30, %v410_v29  ;;  %v442_v29 = vld [vmem:[%s4134_s30 + $0x478] sm:$0xff] }
  0xf8   : > { %v666_v34 = vadd.f32 %v665_v32, %v411_v31  ;;  %v443_v31 = vld [vmem:[%s4134_s30 + $0x480] sm:$0xff] }
  0xfa   : > { %v667_v36 = vadd.f32 %v666_v34, %v412_v33  ;;  %v444_v33 = vld [vmem:[%s4134_s30 + $0x488] sm:$0xff] }
  0xfc   : > { %v668_v38 = vadd.f32 %v667_v36, %v413_v35  ;;  %v445_v35 = vld [vmem:[%s4134_s30 + $0x490] sm:$0xff] }
  0xfe   : > { %v669_v40 = vadd.f32 %v668_v38, %v414_v37  ;;  %v446_v37 = vld [vmem:[%s4134_s30 + $0x498] sm:$0xff] }
 0x100   : > { %v670_v42 = vadd.f32 %v669_v40, %v415_v39  ;;  %v447_v39 = vld [vmem:[%s4134_s30 + $0x4a0] sm:$0xff] }
 0x102   : > { %v671_v44 = vadd.f32 %v670_v42, %v416_v41  ;;  %v448_v41 = vld [vmem:[%s4134_s30 + $0x4a8] sm:$0xff] }
 0x104   : > { %v672_v46 = vadd.f32 %v671_v44, %v417_v43  ;;  %v449_v43 = vld [vmem:[%s4134_s30 + $0x4b0] sm:$0xff] }
 0x106   : > { %v673_v48 = vadd.f32 %v672_v46, %v418_v45  ;;  %v450_v45 = vld [vmem:[%s4134_s30 + $0x4b8] sm:$0xff] }
 0x108   : > { %v674_v50 = vadd.f32 %v673_v48, %v419_v47  ;;  %v451_v47 = vld [vmem:[%s4134_s30 + $0x4c0] sm:$0xff] }
 0x10a   : > { %v675_v52 = vadd.f32 %v674_v50, %v420_v49  ;;  %v452_v49 = vld [vmem:[%s4134_s30 + $0x4c8] sm:$0xff] }
 0x10c   : > { %v676_v54 = vadd.f32 %v675_v52, %v421_v51  ;;  %v453_v51 = vld [vmem:[%s4134_s30 + $0x4d0] sm:$0xff] }
 0x10e   : > { %v677_v56 = vadd.f32 %v676_v54, %v422_v53  ;;  %v454_v53 = vld [vmem:[%s4134_s30 + $0x4d8] sm:$0xff] }
 0x110   : > { %v678_v58 = vadd.f32 %v677_v56, %v423_v55  ;;  %v455_v55 = vld [vmem:[%s4134_s30 + $0x4e0] sm:$0xff] }
 0x112   : > { %v679_v60 = vadd.f32 %v678_v58, %v424_v57  ;;  %v456_v57 = vld [vmem:[%s4134_s30 + $0x4e8] sm:$0xff] }
 0x114   : > { %v680_v62 = vadd.f32 %v679_v60, %v425_v59  ;;  %v457_v59 = vld [vmem:[%s4134_s30 + $0x4f0] sm:$0xff] }
 0x116   : > { %v681_v0 = vadd.f32 %v680_v62, %v426_v61  ;;  %v458_v61 = vld [vmem:[%s4134_s30 + $0x4f8] sm:$0xff] }
 0x118   : > { %v682_v2 = vadd.f32 %v681_v0, %v427_v63  ;;  %v459_v63 = vld [vmem:[%s4134_s30 + $0x500] sm:$0xff] }
 0x11a   : > { %v683_v4 = vadd.f32 %v682_v2, %v428_v1  ;;  %v460_v1 = vld [vmem:[%s4134_s30 + $0x508] sm:$0xff] }
 0x11c   : > { %v684_v6 = vadd.f32 %v683_v4, %v429_v3  ;;  %v461_v3 = vld [vmem:[%s4134_s30 + $0x510] sm:$0xff] }
 0x11e   : > { %v685_v8 = vadd.f32 %v684_v6, %v430_v5  ;;  %v462_v5 = vld [vmem:[%s4134_s30 + $0x518] sm:$0xff] }
 0x120   : > { %v686_v10 = vadd.f32 %v685_v8, %v431_v7  ;;  %v463_v7 = vld [vmem:[%s4134_s30 + $0x520] sm:$0xff] }
 0x122   : > { %v687_v12 = vadd.f32 %v686_v10, %v432_v9  ;;  %v464_v9 = vld [vmem:[%s4134_s30 + $0x528] sm:$0xff] }
 0x124   : > { %v688_v14 = vadd.f32 %v687_v12, %v433_v11  ;;  %v465_v11 = vld [vmem:[%s4134_s30 + $0x530] sm:$0xff] }
 0x126   : > { %v689_v16 = vadd.f32 %v688_v14, %v434_v13  ;;  %v466_v13 = vld [vmem:[%s4134_s30 + $0x538] sm:$0xff] }
 0x128   : > { %v690_v18 = vadd.f32 %v689_v16, %v435_v15  ;;  %v467_v15 = vld [vmem:[%s4134_s30 + $0x540] sm:$0xff] }
 0x12a   : > { %v691_v20 = vadd.f32 %v690_v18, %v436_v17  ;;  %v468_v17 = vld [vmem:[%s4134_s30 + $0x548] sm:$0xff] }
 0x12c   : > { %v692_v22 = vadd.f32 %v691_v20, %v437_v19  ;;  %v469_v19 = vld [vmem:[%s4134_s30 + $0x550] sm:$0xff] }
 0x12e   : > { %v693_v24 = vadd.f32 %v692_v22, %v438_v21  ;;  %v470_v21 = vld [vmem:[%s4134_s30 + $0x558] sm:$0xff] }
 0x130   : > { %v694_v26 = vadd.f32 %v693_v24, %v439_v23  ;;  %v471_v23 = vld [vmem:[%s4134_s30 + $0x560] sm:$0xff] }
 0x132   : > { %v695_v28 = vadd.f32 %v694_v26, %v440_v25  ;;  %v472_v25 = vld [vmem:[%s4134_s30 + $0x568] sm:$0xff] }
 0x134   : > { %v696_v30 = vadd.f32 %v695_v28, %v441_v27  ;;  %v473_v27 = vld [vmem:[%s4134_s30 + $0x570] sm:$0xff] }
 0x136   : > { %v697_v32 = vadd.f32 %v696_v30, %v442_v29  ;;  %v474_v29 = vld [vmem:[%s4134_s30 + $0x578] sm:$0xff] }
 0x138   : > { %v698_v34 = vadd.f32 %v697_v32, %v443_v31  ;;  %v475_v31 = vld [vmem:[%s4134_s30 + $0x580] sm:$0xff] }
 0x13a   : > { %v699_v36 = vadd.f32 %v698_v34, %v444_v33  ;;  %v476_v33 = vld [vmem:[%s4134_s30 + $0x588] sm:$0xff] }
 0x13c   : > { %v700_v38 = vadd.f32 %v699_v36, %v445_v35  ;;  %v477_v35 = vld [vmem:[%s4134_s30 + $0x590] sm:$0xff] }
 0x13e   : > { %v701_v40 = vadd.f32 %v700_v38, %v446_v37  ;;  %v478_v37 = vld [vmem:[%s4134_s30 + $0x598] sm:$0xff] }
 0x140   : > { %v702_v42 = vadd.f32 %v701_v40, %v447_v39  ;;  %v479_v39 = vld [vmem:[%s4134_s30 + $0x5a0] sm:$0xff] }
 0x142   : > { %v703_v44 = vadd.f32 %v702_v42, %v448_v41  ;;  %v480_v41 = vld [vmem:[%s4134_s30 + $0x5a8] sm:$0xff] }
 0x144   : > { %v704_v46 = vadd.f32 %v703_v44, %v449_v43  ;;  %v481_v43 = vld [vmem:[%s4134_s30 + $0x5b0] sm:$0xff] }
 0x146   : > { %v705_v48 = vadd.f32 %v704_v46, %v450_v45  ;;  %v482_v45 = vld [vmem:[%s4134_s30 + $0x5b8] sm:$0xff] }
 0x148   : > { %v706_v50 = vadd.f32 %v705_v48, %v451_v47  ;;  %v483_v47 = vld [vmem:[%s4134_s30 + $0x5c0] sm:$0xff] }
 0x14a   : > { %v707_v52 = vadd.f32 %v706_v50, %v452_v49  ;;  %v484_v49 = vld [vmem:[%s4134_s30 + $0x5c8] sm:$0xff] }
 0x14c   : > { %v708_v54 = vadd.f32 %v707_v52, %v453_v51  ;;  %v485_v51 = vld [vmem:[%s4134_s30 + $0x5d0] sm:$0xff] }
 0x14e   : > { %v709_v56 = vadd.f32 %v708_v54, %v454_v53  ;;  %v486_v53 = vld [vmem:[%s4134_s30 + $0x5d8] sm:$0xff] }
 0x150   : > { %v710_v58 = vadd.f32 %v709_v56, %v455_v55  ;;  %v487_v55 = vld [vmem:[%s4134_s30 + $0x5e0] sm:$0xff] }
 0x152   : > { %v711_v60 = vadd.f32 %v710_v58, %v456_v57  ;;  %v488_v57 = vld [vmem:[%s4134_s30 + $0x5e8] sm:$0xff] }
 0x154   : > { %v712_v62 = vadd.f32 %v711_v60, %v457_v59  ;;  %v489_v59 = vld [vmem:[%s4134_s30 + $0x5f0] sm:$0xff] }
 0x156   : > { %v713_v0 = vadd.f32 %v712_v62, %v458_v61  ;;  %v490_v61 = vld [vmem:[%s4134_s30 + $0x5f8] sm:$0xff] }
 0x158   : > { %v714_v2 = vadd.f32 %v713_v0, %v459_v63  ;;  %v491_v63 = vld [vmem:[%s4134_s30 + $0x600] sm:$0xff] }
 0x15a   : > { %v715_v4 = vadd.f32 %v714_v2, %v460_v1  ;;  %v492_v1 = vld [vmem:[%s4134_s30 + $0x608] sm:$0xff] }
 0x15c   : > { %v716_v6 = vadd.f32 %v715_v4, %v461_v3  ;;  %v493_v3 = vld [vmem:[%s4134_s30 + $0x610] sm:$0xff] }
 0x15e   : > { %v717_v8 = vadd.f32 %v716_v6, %v462_v5  ;;  %v494_v5 = vld [vmem:[%s4134_s30 + $0x618] sm:$0xff] }
 0x160   : > { %v718_v10 = vadd.f32 %v717_v8, %v463_v7  ;;  %v495_v7 = vld [vmem:[%s4134_s30 + $0x620] sm:$0xff] }
 0x162   : > { %v719_v12 = vadd.f32 %v718_v10, %v464_v9  ;;  %v496_v9 = vld [vmem:[%s4134_s30 + $0x628] sm:$0xff] }
 0x164   : > { %v720_v14 = vadd.f32 %v719_v12, %v465_v11  ;;  %v497_v11 = vld [vmem:[%s4134_s30 + $0x630] sm:$0xff] }
 0x166   : > { %v721_v16 = vadd.f32 %v720_v14, %v466_v13  ;;  %v498_v13 = vld [vmem:[%s4134_s30 + $0x638] sm:$0xff] }
 0x168   : > { %v722_v18 = vadd.f32 %v721_v16, %v467_v15  ;;  %v499_v15 = vld [vmem:[%s4134_s30 + $0x640] sm:$0xff] }
 0x16a   : > { %v723_v20 = vadd.f32 %v722_v18, %v468_v17  ;;  %v500_v17 = vld [vmem:[%s4134_s30 + $0x648] sm:$0xff] }
 0x16c   : > { %v724_v22 = vadd.f32 %v723_v20, %v469_v19  ;;  %v501_v19 = vld [vmem:[%s4134_s30 + $0x650] sm:$0xff] }
 0x16e   : > { %v725_v24 = vadd.f32 %v724_v22, %v470_v21  ;;  %v502_v21 = vld [vmem:[%s4134_s30 + $0x658] sm:$0xff] }
 0x170   : > { %v726_v26 = vadd.f32 %v725_v24, %v471_v23  ;;  %v503_v23 = vld [vmem:[%s4134_s30 + $0x660] sm:$0xff] }
 0x172   : > { %v727_v28 = vadd.f32 %v726_v26, %v472_v25  ;;  %v504_v25 = vld [vmem:[%s4134_s30 + $0x668] sm:$0xff] }
 0x174   : > { %v728_v30 = vadd.f32 %v727_v28, %v473_v27  ;;  %v505_v27 = vld [vmem:[%s4134_s30 + $0x670] sm:$0xff] }
 0x176   : > { %v729_v32 = vadd.f32 %v728_v30, %v474_v29  ;;  %v506_v29 = vld [vmem:[%s4134_s30 + $0x678] sm:$0xff] }
 0x178   : > { %v730_v34 = vadd.f32 %v729_v32, %v475_v31  ;;  %v507_v31 = vld [vmem:[%s4134_s30 + $0x680] sm:$0xff] }
 0x17a   : > { %v731_v36 = vadd.f32 %v730_v34, %v476_v33  ;;  %v508_v33 = vld [vmem:[%s4134_s30 + $0x688] sm:$0xff] }
 0x17c   : > { %v732_v38 = vadd.f32 %v731_v36, %v477_v35  ;;  %v509_v35 = vld [vmem:[%s4134_s30 + $0x690] sm:$0xff] }
 0x17e   : > { %v733_v40 = vadd.f32 %v732_v38, %v478_v37  ;;  %v510_v37 = vld [vmem:[%s4134_s30 + $0x698] sm:$0xff] }
 0x180   : > { %v734_v42 = vadd.f32 %v733_v40, %v479_v39  ;;  %v511_v39 = vld [vmem:[%s4134_s30 + $0x6a0] sm:$0xff] }
 0x182   : > { %v735_v44 = vadd.f32 %v734_v42, %v480_v41  ;;  %v512_v41 = vld [vmem:[%s4134_s30 + $0x6a8] sm:$0xff] }
 0x184   : > { %v736_v46 = vadd.f32 %v735_v44, %v481_v43  ;;  %v513_v43 = vld [vmem:[%s4134_s30 + $0x6b0] sm:$0xff] }
 0x186   : > { %v737_v48 = vadd.f32 %v736_v46, %v482_v45  ;;  %v514_v45 = vld [vmem:[%s4134_s30 + $0x6b8] sm:$0xff] }
 0x188   : > { %v738_v50 = vadd.f32 %v737_v48, %v483_v47  ;;  %v515_v47 = vld [vmem:[%s4134_s30 + $0x6c0] sm:$0xff] }
 0x18a   : > { %v739_v52 = vadd.f32 %v738_v50, %v484_v49  ;;  %v516_v49 = vld [vmem:[%s4134_s30 + $0x6c8] sm:$0xff] }
 0x18c   : > { %v740_v54 = vadd.f32 %v739_v52, %v485_v51  ;;  %v517_v51 = vld [vmem:[%s4134_s30 + $0x6d0] sm:$0xff] }
 0x18e   : > { %v741_v56 = vadd.f32 %v740_v54, %v486_v53  ;;  %v518_v53 = vld [vmem:[%s4134_s30 + $0x6d8] sm:$0xff] }
 0x190   : > { %v742_v58 = vadd.f32 %v741_v56, %v487_v55  ;;  %v519_v55 = vld [vmem:[%s4134_s30 + $0x6e0] sm:$0xff] }
 0x192   : > { %v743_v60 = vadd.f32 %v742_v58, %v488_v57  ;;  %v520_v57 = vld [vmem:[%s4134_s30 + $0x6e8] sm:$0xff] }
 0x194   : > { %v744_v62 = vadd.f32 %v743_v60, %v489_v59  ;;  %v521_v59 = vld [vmem:[%s4134_s30 + $0x6f0] sm:$0xff] }
 0x196   : > { %v745_v0 = vadd.f32 %v744_v62, %v490_v61  ;;  %v522_v61 = vld [vmem:[%s4134_s30 + $0x6f8] sm:$0xff] }
 0x198   : > { %v746_v2 = vadd.f32 %v745_v0, %v491_v63  ;;  %v523_v63 = vld [vmem:[%s4134_s30 + $0x700] sm:$0xff] }
 0x19a   : > { %v747_v4 = vadd.f32 %v746_v2, %v492_v1  ;;  %v524_v1 = vld [vmem:[%s4134_s30 + $0x708] sm:$0xff] }
 0x19c   : > { %v748_v6 = vadd.f32 %v747_v4, %v493_v3  ;;  %v525_v3 = vld [vmem:[%s4134_s30 + $0x710] sm:$0xff] }
 0x19e   : > { %v749_v8 = vadd.f32 %v748_v6, %v494_v5  ;;  %v526_v5 = vld [vmem:[%s4134_s30 + $0x718] sm:$0xff] }
 0x1a0   : > { %v750_v10 = vadd.f32 %v749_v8, %v495_v7  ;;  %v527_v7 = vld [vmem:[%s4134_s30 + $0x720] sm:$0xff] }
 0x1a2   : > { %v751_v12 = vadd.f32 %v750_v10, %v496_v9  ;;  %v528_v9 = vld [vmem:[%s4134_s30 + $0x728] sm:$0xff] }
 0x1a4   : > { %v752_v14 = vadd.f32 %v751_v12, %v497_v11  ;;  %v529_v11 = vld [vmem:[%s4134_s30 + $0x730] sm:$0xff] }
 0x1a6   : > { %v753_v16 = vadd.f32 %v752_v14, %v498_v13  ;;  %v530_v13 = vld [vmem:[%s4134_s30 + $0x738] sm:$0xff] }
 0x1a8   : > { %v754_v18 = vadd.f32 %v753_v16, %v499_v15  ;;  %v531_v15 = vld [vmem:[%s4134_s30 + $0x740] sm:$0xff] }
 0x1aa   : > { %v755_v20 = vadd.f32 %v754_v18, %v500_v17  ;;  %v532_v17 = vld [vmem:[%s4134_s30 + $0x748] sm:$0xff] }
 0x1ac   : > { %v756_v22 = vadd.f32 %v755_v20, %v501_v19  ;;  %v533_v19 = vld [vmem:[%s4134_s30 + $0x750] sm:$0xff] }
 0x1ae   : > { %v757_v24 = vadd.f32 %v756_v22, %v502_v21  ;;  %v534_v21 = vld [vmem:[%s4134_s30 + $0x758] sm:$0xff] }
 0x1b0   : > { %v758_v26 = vadd.f32 %v757_v24, %v503_v23  ;;  %v535_v23 = vld [vmem:[%s4134_s30 + $0x760] sm:$0xff] }
 0x1b2   : > { %v759_v28 = vadd.f32 %v758_v26, %v504_v25  ;;  %v536_v25 = vld [vmem:[%s4134_s30 + $0x768] sm:$0xff] }
 0x1b4   : > { %v760_v30 = vadd.f32 %v759_v28, %v505_v27  ;;  %v537_v27 = vld [vmem:[%s4134_s30 + $0x770] sm:$0xff] }
 0x1b6   : > { %v761_v32 = vadd.f32 %v760_v30, %v506_v29  ;;  %v538_v29 = vld [vmem:[%s4134_s30 + $0x778] sm:$0xff] }
 0x1b8   : > { %v762_v34 = vadd.f32 %v761_v32, %v507_v31  ;;  %v539_v31 = vld [vmem:[%s4134_s30 + $0x780] sm:$0xff] }
 0x1ba   : > { %v763_v36 = vadd.f32 %v762_v34, %v508_v33  ;;  %v540_v33 = vld [vmem:[%s4134_s30 + $0x788] sm:$0xff] }
 0x1bc   : > { %v764_v38 = vadd.f32 %v763_v36, %v509_v35  ;;  %v541_v35 = vld [vmem:[%s4134_s30 + $0x790] sm:$0xff] }
 0x1be   : > { %v765_v40 = vadd.f32 %v764_v38, %v510_v37  ;;  %v542_v37 = vld [vmem:[%s4134_s30 + $0x798] sm:$0xff] }
 0x1c0   : > { %v766_v42 = vadd.f32 %v765_v40, %v511_v39  ;;  %v543_v39 = vld [vmem:[%s4134_s30 + $0x7a0] sm:$0xff] }
 0x1c2   : > { %v767_v44 = vadd.f32 %v766_v42, %v512_v41  ;;  %v544_v41 = vld [vmem:[%s4134_s30 + $0x7a8] sm:$0xff] }
 0x1c4   : > { %v768_v46 = vadd.f32 %v767_v44, %v513_v43  ;;  %v545_v43 = vld [vmem:[%s4134_s30 + $0x7b0] sm:$0xff] }
 0x1c6   : > { %v769_v48 = vadd.f32 %v768_v46, %v514_v45  ;;  %v546_v45 = vld [vmem:[%s4134_s30 + $0x7b8] sm:$0xff] }
 0x1c8   : > { %v770_v50 = vadd.f32 %v769_v48, %v515_v47  ;;  %v547_v47 = vld [vmem:[%s4134_s30 + $0x7c0] sm:$0xff] }
 0x1ca   : > { %v771_v52 = vadd.f32 %v770_v50, %v516_v49  ;;  %v548_v49 = vld [vmem:[%s4134_s30 + $0x7c8] sm:$0xff] }
 0x1cc   : > { %v772_v54 = vadd.f32 %v771_v52, %v517_v51  ;;  %v549_v51 = vld [vmem:[%s4134_s30 + $0x7d0] sm:$0xff] }
 0x1ce   : > { %v773_v56 = vadd.f32 %v772_v54, %v518_v53  ;;  %v550_v53 = vld [vmem:[%s4134_s30 + $0x7d8] sm:$0xff] }
 0x1d0   : > { %v774_v58 = vadd.f32 %v773_v56, %v519_v55  ;;  %v551_v55 = vld [vmem:[%s4134_s30 + $0x7e0] sm:$0xff] }
 0x1d2   : > { %v775_v60 = vadd.f32 %v774_v58, %v520_v57  ;;  %v552_v57 = vld [vmem:[%s4134_s30 + $0x7e8] sm:$0xff] }
 0x1d4   : > { %v776_v62 = vadd.f32 %v775_v60, %v521_v59  ;;  %v553_v59 = vld [vmem:[%s4134_s30 + $0x7f0] sm:$0xff] }
 0x1d6   : > { %v777_v0 = vadd.f32 %v776_v62, %v522_v61  ;;  %v554_v61 = vld [vmem:[%s4134_s30 + $0x7f8] sm:$0xff] }
 0x1d8   : > { %v778_v2 = vadd.f32 %v777_v0, %v523_v63  ;;  %v810_v63 = vld [vmem:[%s4123_s23] sm:$0xff] }
 0x1da   : > { %v779_v4 = vadd.f32 %v778_v2, %v524_v1 }
 0x1dc   : > { %v780_v6 = vadd.f32 %v779_v4, %v525_v3 }
 0x1de   : > { %v781_v8 = vadd.f32 %v780_v6, %v526_v5 }
 0x1e0   : > { %v782_v10 = vadd.f32 %v781_v8, %v527_v7 }
 0x1e2   : > { %v783_v12 = vadd.f32 %v782_v10, %v528_v9 }
 0x1e4   : > { %v784_v14 = vadd.f32 %v783_v12, %v529_v11 }
 0x1e6   : > { %v785_v16 = vadd.f32 %v784_v14, %v530_v13 }
 0x1e8   : > { %v786_v18 = vadd.f32 %v785_v16, %v531_v15 }
 0x1ea   : > { %v787_v20 = vadd.f32 %v786_v18, %v532_v17 }
 0x1ec   : > { %v788_v22 = vadd.f32 %v787_v20, %v533_v19 }
 0x1ee   : > { %v789_v24 = vadd.f32 %v788_v22, %v534_v21 }
 0x1f0   : > { %v790_v26 = vadd.f32 %v789_v24, %v535_v23 }
 0x1f2   : > { %v791_v28 = vadd.f32 %v790_v26, %v536_v25 }
 0x1f4   : > { %v792_v30 = vadd.f32 %v791_v28, %v537_v27 }
 0x1f6   : > { %v793_v32 = vadd.f32 %v792_v30, %v538_v29 }
 0x1f8   : > { %v794_v34 = vadd.f32 %v793_v32, %v539_v31 }
 0x1fa   : > { %v795_v36 = vadd.f32 %v794_v34, %v540_v33 }
 0x1fc   : > { %v796_v38 = vadd.f32 %v795_v36, %v541_v35 }
 0x1fe   : > { %v797_v40 = vadd.f32 %v796_v38, %v542_v37 }
 0x200   : > { %v798_v42 = vadd.f32 %v797_v40, %v543_v39 }
 0x202   : > { %v799_v44 = vadd.f32 %v798_v42, %v544_v41 }
 0x204   : > { %v800_v46 = vadd.f32 %v799_v44, %v545_v43 }
 0x206   : > { %v801_v48 = vadd.f32 %v800_v46, %v546_v45 }
 0x208   : > { %v802_v50 = vadd.f32 %v801_v48, %v547_v47 }
 0x20a   : > { %v803_v52 = vadd.f32 %v802_v50, %v548_v49 }
 0x20c   : > { %v804_v54 = vadd.f32 %v803_v52, %v549_v51 }
 0x20e   : > { %v805_v56 = vadd.f32 %v804_v54, %v550_v53 }
 0x210   : > { %v806_v58 = vadd.f32 %v805_v56, %v551_v55 }
 0x212   : > { %v807_v60 = vadd.f32 %v806_v58, %v552_v57 }
 0x214   : > { %v808_v62 = vadd.f32 %v807_v60, %v553_v59 }
 0x216   : > { %v809_v0 = vadd.f32 %v808_v62, %v554_v61 }
 0x218   : > { %v811_v1 = vadd.f32 %v810_v63, %v809_v0 }
 0x21a   : > { %812 = vst [vmem:[%s4123_s23] sm:$0xff] %v811_v1 }
 0x21b PF: > { %p4021_p9 = scmp.ne.s32.totalorder %s4065_s12, 1 }
 0x21d   : > { %816 = sbr.rel (%p4021_p9) target bundleno = 936 (0x3a8), region = 40 }
 0x222   : > { %v817_v2 = vld [vmem:[%s4134_s30] sm:$0xff]  ;;  %v818_v3 = vld [vmem:[%s4134_s30 + $0x8] sm:$0xff]  ;;  %v819_v4 = vld [vmem:[%s4134_s30 + $0x10] sm:$0xff] }
 0x223   : > { %v1842_v5 = vadd.f32 %v818_v3, %v817_v2  ;;  %v820_v6 = vld [vmem:[%s4134_s30 + $0x18] sm:$0xff]  ;;  %v821_v8 = vld [vmem:[%s4134_s30 + $0x20] sm:$0xff]  ;;  %v822_v10 = vld [vmem:[%s4134_s30 + $0x28] sm:$0xff] }
 0x224   : > { %v823_v12 = vld [vmem:[%s4134_s30 + $0x30] sm:$0xff]  ;;  %v824_v14 = vld [vmem:[%s4134_s30 + $0x38] sm:$0xff]  ;;  %v825_v16 = vld [vmem:[%s4134_s30 + $0x40] sm:$0xff] }
 0x225   : > { %v1843_v7 = vadd.f32 %v1842_v5, %v819_v4  ;;  %v826_v18 = vld [vmem:[%s4134_s30 + $0x48] sm:$0xff]  ;;  %v827_v20 = vld [vmem:[%s4134_s30 + $0x50] sm:$0xff]  ;;  %v828_v22 = vld [vmem:[%s4134_s30 + $0x58] sm:$0xff] }
 0x226   : > { %v829_v24 = vld [vmem:[%s4134_s30 + $0x60] sm:$0xff]  ;;  %v830_v26 = vld [vmem:[%s4134_s30 + $0x68] sm:$0xff]  ;;  %v831_v28 = vld [vmem:[%s4134_s30 + $0x70] sm:$0xff] }
 0x227   : > { %v1844_v9 = vadd.f32 %v1843_v7, %v820_v6  ;;  %v832_v30 = vld [vmem:[%s4134_s30 + $0x78] sm:$0xff]  ;;  %v833_v32 = vld [vmem:[%s4134_s30 + $0x80] sm:$0xff]  ;;  %v834_v34 = vld [vmem:[%s4134_s30 + $0x88] sm:$0xff] }
 0x228   : > { %v835_v36 = vld [vmem:[%s4134_s30 + $0x90] sm:$0xff]  ;;  %v836_v38 = vld [vmem:[%s4134_s30 + $0x98] sm:$0xff]  ;;  %v837_v40 = vld [vmem:[%s4134_s30 + $0xa0] sm:$0xff] }
 0x229   : > { %v1845_v11 = vadd.f32 %v1844_v9, %v821_v8  ;;  %v838_v42 = vld [vmem:[%s4134_s30 + $0xa8] sm:$0xff]  ;;  %v839_v44 = vld [vmem:[%s4134_s30 + $0xb0] sm:$0xff]  ;;  %v840_v46 = vld [vmem:[%s4134_s30 + $0xb8] sm:$0xff] }
 0x22a   : > { %v841_v48 = vld [vmem:[%s4134_s30 + $0xc0] sm:$0xff]  ;;  %v842_v50 = vld [vmem:[%s4134_s30 + $0xc8] sm:$0xff]  ;;  %v843_v52 = vld [vmem:[%s4134_s30 + $0xd0] sm:$0xff] }
 0x22b   : > { %v1846_v13 = vadd.f32 %v1845_v11, %v822_v10  ;;  %v844_v54 = vld [vmem:[%s4134_s30 + $0xd8] sm:$0xff]  ;;  %v845_v56 = vld [vmem:[%s4134_s30 + $0xe0] sm:$0xff]  ;;  %v846_v58 = vld [vmem:[%s4134_s30 + $0xe8] sm:$0xff] }
 0x22c   : > { %v847_v60 = vld [vmem:[%s4134_s30 + $0xf0] sm:$0xff]  ;;  %v848_v62 = vld [vmem:[%s4134_s30 + $0xf8] sm:$0xff]  ;;  %v849_v0 = vld [vmem:[%s4134_s30 + $0x100] sm:$0xff] }
 0x22d   : > { %v1847_v15 = vadd.f32 %v1846_v13, %v823_v12  ;;  %v850_v2 = vld [vmem:[%s4134_s30 + $0x108] sm:$0xff]  ;;  %v851_v4 = vld [vmem:[%s4134_s30 + $0x110] sm:$0xff]  ;;  %v852_v6 = vld [vmem:[%s4134_s30 + $0x118] sm:$0xff] }
 0x22e   : > { %v853_v8 = vld [vmem:[%s4134_s30 + $0x120] sm:$0xff]  ;;  %v854_v10 = vld [vmem:[%s4134_s30 + $0x128] sm:$0xff]  ;;  %v855_v12 = vld [vmem:[%s4134_s30 + $0x130] sm:$0xff] }
 0x22f   : > { %v1848_v17 = vadd.f32 %v1847_v15, %v824_v14  ;;  %v856_v14 = vld [vmem:[%s4134_s30 + $0x138] sm:$0xff] }
 0x231   : > { %v1849_v19 = vadd.f32 %v1848_v17, %v825_v16  ;;  %v857_v16 = vld [vmem:[%s4134_s30 + $0x140] sm:$0xff] }
 0x233   : > { %v1850_v21 = vadd.f32 %v1849_v19, %v826_v18  ;;  %v858_v18 = vld [vmem:[%s4134_s30 + $0x148] sm:$0xff] }
 0x235   : > { %v1851_v23 = vadd.f32 %v1850_v21, %v827_v20  ;;  %v859_v20 = vld [vmem:[%s4134_s30 + $0x150] sm:$0xff] }
 0x237   : > { %v1852_v25 = vadd.f32 %v1851_v23, %v828_v22  ;;  %v860_v22 = vld [vmem:[%s4134_s30 + $0x158] sm:$0xff] }
 0x239   : > { %v1853_v27 = vadd.f32 %v1852_v25, %v829_v24  ;;  %v861_v24 = vld [vmem:[%s4134_s30 + $0x160] sm:$0xff] }
 0x23b   : > { %v1854_v29 = vadd.f32 %v1853_v27, %v830_v26  ;;  %v862_v26 = vld [vmem:[%s4134_s30 + $0x168] sm:$0xff] }
 0x23d   : > { %v1855_v31 = vadd.f32 %v1854_v29, %v831_v28  ;;  %v863_v28 = vld [vmem:[%s4134_s30 + $0x170] sm:$0xff] }
 0x23f   : > { %v1856_v33 = vadd.f32 %v1855_v31, %v832_v30  ;;  %v864_v30 = vld [vmem:[%s4134_s30 + $0x178] sm:$0xff] }
 0x241   : > { %v1857_v35 = vadd.f32 %v1856_v33, %v833_v32  ;;  %v865_v32 = vld [vmem:[%s4134_s30 + $0x180] sm:$0xff] }
 0x243   : > { %v1858_v37 = vadd.f32 %v1857_v35, %v834_v34  ;;  %v866_v34 = vld [vmem:[%s4134_s30 + $0x188] sm:$0xff] }
 0x245   : > { %v1859_v39 = vadd.f32 %v1858_v37, %v835_v36  ;;  %v867_v36 = vld [vmem:[%s4134_s30 + $0x190] sm:$0xff] }
 0x247   : > { %v1860_v41 = vadd.f32 %v1859_v39, %v836_v38  ;;  %v868_v38 = vld [vmem:[%s4134_s30 + $0x198] sm:$0xff] }
 0x249   : > { %v1861_v43 = vadd.f32 %v1860_v41, %v837_v40  ;;  %v869_v40 = vld [vmem:[%s4134_s30 + $0x1a0] sm:$0xff] }
 0x24b   : > { %v1862_v45 = vadd.f32 %v1861_v43, %v838_v42  ;;  %v870_v42 = vld [vmem:[%s4134_s30 + $0x1a8] sm:$0xff] }
 0x24d   : > { %v1863_v47 = vadd.f32 %v1862_v45, %v839_v44  ;;  %v871_v44 = vld [vmem:[%s4134_s30 + $0x1b0] sm:$0xff] }
 0x24f   : > { %v1864_v49 = vadd.f32 %v1863_v47, %v840_v46  ;;  %v872_v46 = vld [vmem:[%s4134_s30 + $0x1b8] sm:$0xff] }
 0x251   : > { %v1865_v51 = vadd.f32 %v1864_v49, %v841_v48  ;;  %v873_v48 = vld [vmem:[%s4134_s30 + $0x1c0] sm:$0xff] }
 0x253   : > { %v1866_v53 = vadd.f32 %v1865_v51, %v842_v50  ;;  %v874_v50 = vld [vmem:[%s4134_s30 + $0x1c8] sm:$0xff] }
 0x255   : > { %v1867_v55 = vadd.f32 %v1866_v53, %v843_v52  ;;  %v875_v52 = vld [vmem:[%s4134_s30 + $0x1d0] sm:$0xff] }
 0x257   : > { %v1868_v57 = vadd.f32 %v1867_v55, %v844_v54  ;;  %v876_v54 = vld [vmem:[%s4134_s30 + $0x1d8] sm:$0xff] }
 0x259   : > { %v1869_v59 = vadd.f32 %v1868_v57, %v845_v56  ;;  %v877_v56 = vld [vmem:[%s4134_s30 + $0x1e0] sm:$0xff] }
 0x25b   : > { %v1870_v61 = vadd.f32 %v1869_v59, %v846_v58  ;;  %v878_v58 = vld [vmem:[%s4134_s30 + $0x1e8] sm:$0xff] }
 0x25d   : > { %v1871_v63 = vadd.f32 %v1870_v61, %v847_v60  ;;  %v879_v60 = vld [vmem:[%s4134_s30 + $0x1f0] sm:$0xff] }
 0x25f   : > { %v1872_v1 = vadd.f32 %v1871_v63, %v848_v62  ;;  %v880_v62 = vld [vmem:[%s4134_s30 + $0x1f8] sm:$0xff] }
 0x261   : > { %v1873_v3 = vadd.f32 %v1872_v1, %v849_v0  ;;  %v881_v0 = vld [vmem:[%s4134_s30 + $0x200] sm:$0xff] }
 0x263   : > { %v1874_v5 = vadd.f32 %v1873_v3, %v850_v2  ;;  %v882_v2 = vld [vmem:[%s4134_s30 + $0x208] sm:$0xff] }
 0x265   : > { %v1875_v7 = vadd.f32 %v1874_v5, %v851_v4  ;;  %v883_v4 = vld [vmem:[%s4134_s30 + $0x210] sm:$0xff] }
 0x267   : > { %v1876_v9 = vadd.f32 %v1875_v7, %v852_v6  ;;  %v884_v6 = vld [vmem:[%s4134_s30 + $0x218] sm:$0xff] }
 0x269   : > { %v1877_v11 = vadd.f32 %v1876_v9, %v853_v8  ;;  %v885_v8 = vld [vmem:[%s4134_s30 + $0x220] sm:$0xff] }
 0x26b   : > { %v1878_v13 = vadd.f32 %v1877_v11, %v854_v10  ;;  %v886_v10 = vld [vmem:[%s4134_s30 + $0x228] sm:$0xff] }
 0x26d   : > { %v1879_v15 = vadd.f32 %v1878_v13, %v855_v12  ;;  %v887_v12 = vld [vmem:[%s4134_s30 + $0x230] sm:$0xff] }
 0x26f   : > { %v1880_v17 = vadd.f32 %v1879_v15, %v856_v14  ;;  %v888_v14 = vld [vmem:[%s4134_s30 + $0x238] sm:$0xff] }
 0x271   : > { %v1881_v19 = vadd.f32 %v1880_v17, %v857_v16  ;;  %v889_v16 = vld [vmem:[%s4134_s30 + $0x240] sm:$0xff] }
 0x273   : > { %v1882_v21 = vadd.f32 %v1881_v19, %v858_v18  ;;  %v890_v18 = vld [vmem:[%s4134_s30 + $0x248] sm:$0xff] }
 0x275   : > { %v1883_v23 = vadd.f32 %v1882_v21, %v859_v20  ;;  %v891_v20 = vld [vmem:[%s4134_s30 + $0x250] sm:$0xff] }
 0x277   : > { %v1884_v25 = vadd.f32 %v1883_v23, %v860_v22  ;;  %v892_v22 = vld [vmem:[%s4134_s30 + $0x258] sm:$0xff] }
 0x279   : > { %v1885_v27 = vadd.f32 %v1884_v25, %v861_v24  ;;  %v893_v24 = vld [vmem:[%s4134_s30 + $0x260] sm:$0xff] }
 0x27b   : > { %v1886_v29 = vadd.f32 %v1885_v27, %v862_v26  ;;  %v894_v26 = vld [vmem:[%s4134_s30 + $0x268] sm:$0xff] }
 0x27d   : > { %v1887_v31 = vadd.f32 %v1886_v29, %v863_v28  ;;  %v895_v28 = vld [vmem:[%s4134_s30 + $0x270] sm:$0xff] }
 0x27f   : > { %v1888_v33 = vadd.f32 %v1887_v31, %v864_v30  ;;  %v896_v30 = vld [vmem:[%s4134_s30 + $0x278] sm:$0xff] }
 0x281   : > { %v1889_v35 = vadd.f32 %v1888_v33, %v865_v32  ;;  %v897_v32 = vld [vmem:[%s4134_s30 + $0x280] sm:$0xff] }
 0x283   : > { %v1890_v37 = vadd.f32 %v1889_v35, %v866_v34  ;;  %v898_v34 = vld [vmem:[%s4134_s30 + $0x288] sm:$0xff] }
 0x285   : > { %v1891_v39 = vadd.f32 %v1890_v37, %v867_v36  ;;  %v899_v36 = vld [vmem:[%s4134_s30 + $0x290] sm:$0xff] }
 0x287   : > { %v1892_v41 = vadd.f32 %v1891_v39, %v868_v38  ;;  %v900_v38 = vld [vmem:[%s4134_s30 + $0x298] sm:$0xff] }
 0x289   : > { %v1893_v43 = vadd.f32 %v1892_v41, %v869_v40  ;;  %v901_v40 = vld [vmem:[%s4134_s30 + $0x2a0] sm:$0xff] }
 0x28b   : > { %v1894_v45 = vadd.f32 %v1893_v43, %v870_v42  ;;  %v902_v42 = vld [vmem:[%s4134_s30 + $0x2a8] sm:$0xff] }
 0x28d   : > { %v1895_v47 = vadd.f32 %v1894_v45, %v871_v44  ;;  %v903_v44 = vld [vmem:[%s4134_s30 + $0x2b0] sm:$0xff] }
 0x28f   : > { %v1896_v49 = vadd.f32 %v1895_v47, %v872_v46  ;;  %v904_v46 = vld [vmem:[%s4134_s30 + $0x2b8] sm:$0xff] }
 0x291   : > { %v1897_v51 = vadd.f32 %v1896_v49, %v873_v48  ;;  %v905_v48 = vld [vmem:[%s4134_s30 + $0x2c0] sm:$0xff] }
 0x293   : > { %v1898_v53 = vadd.f32 %v1897_v51, %v874_v50  ;;  %v906_v50 = vld [vmem:[%s4134_s30 + $0x2c8] sm:$0xff] }
 0x295   : > { %v1899_v55 = vadd.f32 %v1898_v53, %v875_v52  ;;  %v907_v52 = vld [vmem:[%s4134_s30 + $0x2d0] sm:$0xff] }
 0x297   : > { %v1900_v57 = vadd.f32 %v1899_v55, %v876_v54  ;;  %v908_v54 = vld [vmem:[%s4134_s30 + $0x2d8] sm:$0xff] }
 0x299   : > { %v1901_v59 = vadd.f32 %v1900_v57, %v877_v56  ;;  %v909_v56 = vld [vmem:[%s4134_s30 + $0x2e0] sm:$0xff] }
 0x29b   : > { %v1902_v61 = vadd.f32 %v1901_v59, %v878_v58  ;;  %v910_v58 = vld [vmem:[%s4134_s30 + $0x2e8] sm:$0xff] }
 0x29d   : > { %v1903_v63 = vadd.f32 %v1902_v61, %v879_v60  ;;  %v911_v60 = vld [vmem:[%s4134_s30 + $0x2f0] sm:$0xff] }
 0x29f   : > { %v1904_v1 = vadd.f32 %v1903_v63, %v880_v62  ;;  %v912_v62 = vld [vmem:[%s4134_s30 + $0x2f8] sm:$0xff] }
 0x2a1   : > { %v1905_v3 = vadd.f32 %v1904_v1, %v881_v0  ;;  %v913_v0 = vld [vmem:[%s4134_s30 + $0x300] sm:$0xff] }
 0x2a3   : > { %v1906_v5 = vadd.f32 %v1905_v3, %v882_v2  ;;  %v914_v2 = vld [vmem:[%s4134_s30 + $0x308] sm:$0xff] }
 0x2a5   : > { %v1907_v7 = vadd.f32 %v1906_v5, %v883_v4  ;;  %v915_v4 = vld [vmem:[%s4134_s30 + $0x310] sm:$0xff] }
 0x2a7   : > { %v1908_v9 = vadd.f32 %v1907_v7, %v884_v6  ;;  %v916_v6 = vld [vmem:[%s4134_s30 + $0x318] sm:$0xff] }
 0x2a9   : > { %v1909_v11 = vadd.f32 %v1908_v9, %v885_v8  ;;  %v917_v8 = vld [vmem:[%s4134_s30 + $0x320] sm:$0xff] }
 0x2ab   : > { %v1910_v13 = vadd.f32 %v1909_v11, %v886_v10  ;;  %v918_v10 = vld [vmem:[%s4134_s30 + $0x328] sm:$0xff] }
 0x2ad   : > { %v1911_v15 = vadd.f32 %v1910_v13, %v887_v12  ;;  %v919_v12 = vld [vmem:[%s4134_s30 + $0x330] sm:$0xff] }
 0x2af   : > { %v1912_v17 = vadd.f32 %v1911_v15, %v888_v14  ;;  %v920_v14 = vld [vmem:[%s4134_s30 + $0x338] sm:$0xff] }
 0x2b1   : > { %v1913_v19 = vadd.f32 %v1912_v17, %v889_v16  ;;  %v921_v16 = vld [vmem:[%s4134_s30 + $0x340] sm:$0xff] }
 0x2b3   : > { %v1914_v21 = vadd.f32 %v1913_v19, %v890_v18  ;;  %v922_v18 = vld [vmem:[%s4134_s30 + $0x348] sm:$0xff] }
 0x2b5   : > { %v1915_v23 = vadd.f32 %v1914_v21, %v891_v20  ;;  %v923_v20 = vld [vmem:[%s4134_s30 + $0x350] sm:$0xff] }
 0x2b7   : > { %v1916_v25 = vadd.f32 %v1915_v23, %v892_v22  ;;  %v924_v22 = vld [vmem:[%s4134_s30 + $0x358] sm:$0xff] }
 0x2b9   : > { %v1917_v27 = vadd.f32 %v1916_v25, %v893_v24  ;;  %v925_v24 = vld [vmem:[%s4134_s30 + $0x360] sm:$0xff] }
 0x2bb   : > { %v1918_v29 = vadd.f32 %v1917_v27, %v894_v26  ;;  %v926_v26 = vld [vmem:[%s4134_s30 + $0x368] sm:$0xff] }
 0x2bd   : > { %v1919_v31 = vadd.f32 %v1918_v29, %v895_v28  ;;  %v927_v28 = vld [vmem:[%s4134_s30 + $0x370] sm:$0xff] }
 0x2bf   : > { %v1920_v33 = vadd.f32 %v1919_v31, %v896_v30  ;;  %v928_v30 = vld [vmem:[%s4134_s30 + $0x378] sm:$0xff] }
 0x2c1   : > { %v1921_v35 = vadd.f32 %v1920_v33, %v897_v32  ;;  %v929_v32 = vld [vmem:[%s4134_s30 + $0x380] sm:$0xff] }
 0x2c3   : > { %v1922_v37 = vadd.f32 %v1921_v35, %v898_v34  ;;  %v930_v34 = vld [vmem:[%s4134_s30 + $0x388] sm:$0xff] }
 0x2c5   : > { %v1923_v39 = vadd.f32 %v1922_v37, %v899_v36  ;;  %v931_v36 = vld [vmem:[%s4134_s30 + $0x390] sm:$0xff] }
 0x2c7   : > { %v1924_v41 = vadd.f32 %v1923_v39, %v900_v38  ;;  %v932_v38 = vld [vmem:[%s4134_s30 + $0x398] sm:$0xff] }
 0x2c9   : > { %v1925_v43 = vadd.f32 %v1924_v41, %v901_v40  ;;  %v933_v40 = vld [vmem:[%s4134_s30 + $0x3a0] sm:$0xff] }
 0x2cb   : > { %v1926_v45 = vadd.f32 %v1925_v43, %v902_v42  ;;  %v934_v42 = vld [vmem:[%s4134_s30 + $0x3a8] sm:$0xff] }
 0x2cd   : > { %v1927_v47 = vadd.f32 %v1926_v45, %v903_v44  ;;  %v935_v44 = vld [vmem:[%s4134_s30 + $0x3b0] sm:$0xff] }
 0x2cf   : > { %v1928_v49 = vadd.f32 %v1927_v47, %v904_v46  ;;  %v936_v46 = vld [vmem:[%s4134_s30 + $0x3b8] sm:$0xff] }
 0x2d1   : > { %v1929_v51 = vadd.f32 %v1928_v49, %v905_v48  ;;  %v937_v48 = vld [vmem:[%s4134_s30 + $0x3c0] sm:$0xff] }
 0x2d3   : > { %v1930_v53 = vadd.f32 %v1929_v51, %v906_v50  ;;  %v938_v50 = vld [vmem:[%s4134_s30 + $0x3c8] sm:$0xff] }
 0x2d5   : > { %v1931_v55 = vadd.f32 %v1930_v53, %v907_v52  ;;  %v939_v52 = vld [vmem:[%s4134_s30 + $0x3d0] sm:$0xff] }
 0x2d7   : > { %v1932_v57 = vadd.f32 %v1931_v55, %v908_v54  ;;  %v940_v54 = vld [vmem:[%s4134_s30 + $0x3d8] sm:$0xff] }
 0x2d9   : > { %v1933_v59 = vadd.f32 %v1932_v57, %v909_v56  ;;  %v941_v56 = vld [vmem:[%s4134_s30 + $0x3e0] sm:$0xff] }
 0x2db   : > { %v1934_v61 = vadd.f32 %v1933_v59, %v910_v58  ;;  %v942_v58 = vld [vmem:[%s4134_s30 + $0x3e8] sm:$0xff] }
 0x2dd   : > { %v1935_v63 = vadd.f32 %v1934_v61, %v911_v60  ;;  %v943_v60 = vld [vmem:[%s4134_s30 + $0x3f0] sm:$0xff] }
 0x2df   : > { %v1936_v1 = vadd.f32 %v1935_v63, %v912_v62  ;;  %v944_v62 = vld [vmem:[%s4134_s30 + $0x3f8] sm:$0xff] }
 0x2e1   : > { %v1937_v3 = vadd.f32 %v1936_v1, %v913_v0  ;;  %v945_v0 = vld [vmem:[%s4134_s30 + $0x400] sm:$0xff] }
 0x2e3   : > { %v1938_v5 = vadd.f32 %v1937_v3, %v914_v2  ;;  %v946_v2 = vld [vmem:[%s4134_s30 + $0x408] sm:$0xff] }
 0x2e5   : > { %v1939_v7 = vadd.f32 %v1938_v5, %v915_v4  ;;  %v947_v4 = vld [vmem:[%s4134_s30 + $0x410] sm:$0xff] }
 0x2e7   : > { %v1940_v9 = vadd.f32 %v1939_v7, %v916_v6  ;;  %v948_v6 = vld [vmem:[%s4134_s30 + $0x418] sm:$0xff] }
 0x2e9   : > { %v1941_v11 = vadd.f32 %v1940_v9, %v917_v8  ;;  %v949_v8 = vld [vmem:[%s4134_s30 + $0x420] sm:$0xff] }
 0x2eb   : > { %v1942_v13 = vadd.f32 %v1941_v11, %v918_v10  ;;  %v950_v10 = vld [vmem:[%s4134_s30 + $0x428] sm:$0xff] }
 0x2ed   : > { %v1943_v15 = vadd.f32 %v1942_v13, %v919_v12  ;;  %v951_v12 = vld [vmem:[%s4134_s30 + $0x430] sm:$0xff] }
 0x2ef   : > { %v1944_v17 = vadd.f32 %v1943_v15, %v920_v14  ;;  %v952_v14 = vld [vmem:[%s4134_s30 + $0x438] sm:$0xff] }
 0x2f1   : > { %v1945_v19 = vadd.f32 %v1944_v17, %v921_v16  ;;  %v953_v16 = vld [vmem:[%s4134_s30 + $0x440] sm:$0xff] }
 0x2f3   : > { %v1946_v21 = vadd.f32 %v1945_v19, %v922_v18  ;;  %v954_v18 = vld [vmem:[%s4134_s30 + $0x448] sm:$0xff] }
 0x2f5   : > { %v1947_v23 = vadd.f32 %v1946_v21, %v923_v20  ;;  %v955_v20 = vld [vmem:[%s4134_s30 + $0x450] sm:$0xff] }
 0x2f7   : > { %v1948_v25 = vadd.f32 %v1947_v23, %v924_v22  ;;  %v956_v22 = vld [vmem:[%s4134_s30 + $0x458] sm:$0xff] }
 0x2f9   : > { %v1949_v27 = vadd.f32 %v1948_v25, %v925_v24  ;;  %v957_v24 = vld [vmem:[%s4134_s30 + $0x460] sm:$0xff] }
 0x2fb   : > { %v1950_v29 = vadd.f32 %v1949_v27, %v926_v26  ;;  %v958_v26 = vld [vmem:[%s4134_s30 + $0x468] sm:$0xff] }
 0x2fd   : > { %v1951_v31 = vadd.f32 %v1950_v29, %v927_v28  ;;  %v959_v28 = vld [vmem:[%s4134_s30 + $0x470] sm:$0xff] }
 0x2ff   : > { %v1952_v33 = vadd.f32 %v1951_v31, %v928_v30  ;;  %v960_v30 = vld [vmem:[%s4134_s30 + $0x478] sm:$0xff] }
 0x301   : > { %v1953_v35 = vadd.f32 %v1952_v33, %v929_v32  ;;  %v961_v32 = vld [vmem:[%s4134_s30 + $0x480] sm:$0xff] }
 0x303   : > { %v1954_v37 = vadd.f32 %v1953_v35, %v930_v34  ;;  %v962_v34 = vld [vmem:[%s4134_s30 + $0x488] sm:$0xff] }
 0x305   : > { %v1955_v39 = vadd.f32 %v1954_v37, %v931_v36  ;;  %v963_v36 = vld [vmem:[%s4134_s30 + $0x490] sm:$0xff] }
 0x307   : > { %v1956_v41 = vadd.f32 %v1955_v39, %v932_v38  ;;  %v964_v38 = vld [vmem:[%s4134_s30 + $0x498] sm:$0xff] }
 0x309   : > { %v1957_v43 = vadd.f32 %v1956_v41, %v933_v40  ;;  %v965_v40 = vld [vmem:[%s4134_s30 + $0x4a0] sm:$0xff] }
 0x30b   : > { %v1958_v45 = vadd.f32 %v1957_v43, %v934_v42  ;;  %v966_v42 = vld [vmem:[%s4134_s30 + $0x4a8] sm:$0xff] }
 0x30d   : > { %v1959_v47 = vadd.f32 %v1958_v45, %v935_v44  ;;  %v967_v44 = vld [vmem:[%s4134_s30 + $0x4b0] sm:$0xff] }
 0x30f   : > { %v1960_v49 = vadd.f32 %v1959_v47, %v936_v46  ;;  %v968_v46 = vld [vmem:[%s4134_s30 + $0x4b8] sm:$0xff] }
 0x311   : > { %v1961_v51 = vadd.f32 %v1960_v49, %v937_v48  ;;  %v969_v48 = vld [vmem:[%s4134_s30 + $0x4c0] sm:$0xff] }
 0x313   : > { %v1962_v53 = vadd.f32 %v1961_v51, %v938_v50  ;;  %v970_v50 = vld [vmem:[%s4134_s30 + $0x4c8] sm:$0xff] }
 0x315   : > { %v1963_v55 = vadd.f32 %v1962_v53, %v939_v52  ;;  %v971_v52 = vld [vmem:[%s4134_s30 + $0x4d0] sm:$0xff] }
 0x317   : > { %v1964_v57 = vadd.f32 %v1963_v55, %v940_v54  ;;  %v972_v54 = vld [vmem:[%s4134_s30 + $0x4d8] sm:$0xff] }
 0x319   : > { %v1965_v59 = vadd.f32 %v1964_v57, %v941_v56  ;;  %v973_v56 = vld [vmem:[%s4134_s30 + $0x4e0] sm:$0xff] }
 0x31b   : > { %v1966_v61 = vadd.f32 %v1965_v59, %v942_v58  ;;  %v974_v58 = vld [vmem:[%s4134_s30 + $0x4e8] sm:$0xff] }
 0x31d   : > { %v1967_v63 = vadd.f32 %v1966_v61, %v943_v60  ;;  %v975_v60 = vld [vmem:[%s4134_s30 + $0x4f0] sm:$0xff] }
 0x31f   : > { %v1968_v1 = vadd.f32 %v1967_v63, %v944_v62  ;;  %v976_v62 = vld [vmem:[%s4134_s30 + $0x4f8] sm:$0xff] }
 0x321   : > { %v1969_v3 = vadd.f32 %v1968_v1, %v945_v0  ;;  %v977_v0 = vld [vmem:[%s4134_s30 + $0x500] sm:$0xff] }
 0x323   : > { %v1970_v5 = vadd.f32 %v1969_v3, %v946_v2  ;;  %v978_v2 = vld [vmem:[%s4134_s30 + $0x508] sm:$0xff] }
 0x325   : > { %v1971_v7 = vadd.f32 %v1970_v5, %v947_v4  ;;  %v979_v4 = vld [vmem:[%s4134_s30 + $0x510] sm:$0xff] }
 0x327   : > { %v1972_v9 = vadd.f32 %v1971_v7, %v948_v6  ;;  %v980_v6 = vld [vmem:[%s4134_s30 + $0x518] sm:$0xff] }
 0x329   : > { %v1973_v11 = vadd.f32 %v1972_v9, %v949_v8  ;;  %v981_v8 = vld [vmem:[%s4134_s30 + $0x520] sm:$0xff] }
 0x32b   : > { %v1974_v13 = vadd.f32 %v1973_v11, %v950_v10  ;;  %v982_v10 = vld [vmem:[%s4134_s30 + $0x528] sm:$0xff] }
 0x32d   : > { %v1975_v15 = vadd.f32 %v1974_v13, %v951_v12  ;;  %v983_v12 = vld [vmem:[%s4134_s30 + $0x530] sm:$0xff] }
 0x32f   : > { %v1976_v17 = vadd.f32 %v1975_v15, %v952_v14  ;;  %v984_v14 = vld [vmem:[%s4134_s30 + $0x538] sm:$0xff] }
 0x331   : > { %v1977_v19 = vadd.f32 %v1976_v17, %v953_v16  ;;  %v985_v16 = vld [vmem:[%s4134_s30 + $0x540] sm:$0xff] }
 0x333   : > { %v1978_v21 = vadd.f32 %v1977_v19, %v954_v18  ;;  %v986_v18 = vld [vmem:[%s4134_s30 + $0x548] sm:$0xff] }
 0x335   : > { %v1979_v23 = vadd.f32 %v1978_v21, %v955_v20  ;;  %v987_v20 = vld [vmem:[%s4134_s30 + $0x550] sm:$0xff] }
 0x337   : > { %v1980_v25 = vadd.f32 %v1979_v23, %v956_v22  ;;  %v988_v22 = vld [vmem:[%s4134_s30 + $0x558] sm:$0xff] }
 0x339   : > { %v1981_v27 = vadd.f32 %v1980_v25, %v957_v24  ;;  %v989_v24 = vld [vmem:[%s4134_s30 + $0x560] sm:$0xff] }
 0x33b   : > { %v1982_v29 = vadd.f32 %v1981_v27, %v958_v26  ;;  %v990_v26 = vld [vmem:[%s4134_s30 + $0x568] sm:$0xff] }
 0x33d   : > { %v1983_v31 = vadd.f32 %v1982_v29, %v959_v28  ;;  %v991_v28 = vld [vmem:[%s4134_s30 + $0x570] sm:$0xff] }
 0x33f   : > { %v1984_v33 = vadd.f32 %v1983_v31, %v960_v30  ;;  %v992_v30 = vld [vmem:[%s4134_s30 + $0x578] sm:$0xff] }
 0x341   : > { %v1985_v35 = vadd.f32 %v1984_v33, %v961_v32  ;;  %v993_v32 = vld [vmem:[%s4134_s30 + $0x580] sm:$0xff] }
 0x343   : > { %v1986_v37 = vadd.f32 %v1985_v35, %v962_v34  ;;  %v994_v34 = vld [vmem:[%s4134_s30 + $0x588] sm:$0xff] }
 0x345   : > { %v1987_v39 = vadd.f32 %v1986_v37, %v963_v36  ;;  %v995_v36 = vld [vmem:[%s4134_s30 + $0x590] sm:$0xff] }
 0x347   : > { %v1988_v41 = vadd.f32 %v1987_v39, %v964_v38  ;;  %v996_v38 = vld [vmem:[%s4134_s30 + $0x598] sm:$0xff] }
 0x349   : > { %v1989_v43 = vadd.f32 %v1988_v41, %v965_v40  ;;  %v997_v40 = vld [vmem:[%s4134_s30 + $0x5a0] sm:$0xff] }
 0x34b   : > { %v1990_v45 = vadd.f32 %v1989_v43, %v966_v42  ;;  %v998_v42 = vld [vmem:[%s4134_s30 + $0x5a8] sm:$0xff] }
 0x34d   : > { %v1991_v47 = vadd.f32 %v1990_v45, %v967_v44  ;;  %v999_v44 = vld [vmem:[%s4134_s30 + $0x5b0] sm:$0xff] }
 0x34f   : > { %v1992_v49 = vadd.f32 %v1991_v47, %v968_v46  ;;  %v1000_v46 = vld [vmem:[%s4134_s30 + $0x5b8] sm:$0xff] }
 0x351   : > { %v1993_v51 = vadd.f32 %v1992_v49, %v969_v48  ;;  %v1001_v48 = vld [vmem:[%s4134_s30 + $0x5c0] sm:$0xff] }
 0x353   : > { %v1994_v53 = vadd.f32 %v1993_v51, %v970_v50  ;;  %v1002_v50 = vld [vmem:[%s4134_s30 + $0x5c8] sm:$0xff] }
 0x355   : > { %v1995_v55 = vadd.f32 %v1994_v53, %v971_v52  ;;  %v1003_v52 = vld [vmem:[%s4134_s30 + $0x5d0] sm:$0xff] }
 0x357   : > { %v1996_v57 = vadd.f32 %v1995_v55, %v972_v54  ;;  %v1004_v54 = vld [vmem:[%s4134_s30 + $0x5d8] sm:$0xff] }
 0x359   : > { %v1997_v59 = vadd.f32 %v1996_v57, %v973_v56  ;;  %v1005_v56 = vld [vmem:[%s4134_s30 + $0x5e0] sm:$0xff] }
 0x35b   : > { %v1998_v61 = vadd.f32 %v1997_v59, %v974_v58  ;;  %v1006_v58 = vld [vmem:[%s4134_s30 + $0x5e8] sm:$0xff] }
 0x35d   : > { %v1999_v63 = vadd.f32 %v1998_v61, %v975_v60  ;;  %v1007_v60 = vld [vmem:[%s4134_s30 + $0x5f0] sm:$0xff] }
 0x35f   : > { %v2000_v1 = vadd.f32 %v1999_v63, %v976_v62  ;;  %v1008_v62 = vld [vmem:[%s4134_s30 + $0x5f8] sm:$0xff] }
 0x361   : > { %v2001_v3 = vadd.f32 %v2000_v1, %v977_v0  ;;  %v1009_v0 = vld [vmem:[%s4134_s30 + $0x600] sm:$0xff] }
 0x363   : > { %v2002_v5 = vadd.f32 %v2001_v3, %v978_v2  ;;  %v1010_v2 = vld [vmem:[%s4134_s30 + $0x608] sm:$0xff] }
 0x365   : > { %v2003_v7 = vadd.f32 %v2002_v5, %v979_v4  ;;  %v2097_v4 = vld [vmem:[%s4123_s23] sm:$0xff] }
 0x367   : > { %v2004_v9 = vadd.f32 %v2003_v7, %v980_v6 }
 0x369   : > { %v2005_v11 = vadd.f32 %v2004_v9, %v981_v8 }
 0x36b   : > { %v2006_v13 = vadd.f32 %v2005_v11, %v982_v10 }
 0x36d   : > { %v2007_v15 = vadd.f32 %v2006_v13, %v983_v12 }
 0x36f   : > { %v2008_v17 = vadd.f32 %v2007_v15, %v984_v14 }
 0x371   : > { %v2009_v19 = vadd.f32 %v2008_v17, %v985_v16 }
 0x373   : > { %v2010_v21 = vadd.f32 %v2009_v19, %v986_v18 }
 0x375   : > { %v2011_v23 = vadd.f32 %v2010_v21, %v987_v20 }
 0x377   : > { %v2012_v25 = vadd.f32 %v2011_v23, %v988_v22 }
 0x379   : > { %v2013_v27 = vadd.f32 %v2012_v25, %v989_v24 }
 0x37b   : > { %v2014_v29 = vadd.f32 %v2013_v27, %v990_v26 }
 0x37d   : > { %v2015_v31 = vadd.f32 %v2014_v29, %v991_v28 }
 0x37f   : > { %v2016_v33 = vadd.f32 %v2015_v31, %v992_v30 }
 0x381   : > { %v2017_v35 = vadd.f32 %v2016_v33, %v993_v32 }
 0x383   : > { %v2018_v37 = vadd.f32 %v2017_v35, %v994_v34 }
 0x385   : > { %v2019_v39 = vadd.f32 %v2018_v37, %v995_v36 }
 0x387   : > { %v2020_v41 = vadd.f32 %v2019_v39, %v996_v38 }
 0x389   : > { %v2021_v43 = vadd.f32 %v2020_v41, %v997_v40 }
 0x38b   : > { %v2022_v45 = vadd.f32 %v2021_v43, %v998_v42 }
 0x38d   : > { %v2023_v47 = vadd.f32 %v2022_v45, %v999_v44 }
 0x38f   : > { %v2024_v49 = vadd.f32 %v2023_v47, %v1000_v46 }
 0x391   : > { %v2025_v51 = vadd.f32 %v2024_v49, %v1001_v48 }
 0x393   : > { %v2026_v53 = vadd.f32 %v2025_v51, %v1002_v50 }
 0x395   : > { %v2027_v55 = vadd.f32 %v2026_v53, %v1003_v52 }
 0x397   : > { %v2028_v57 = vadd.f32 %v2027_v55, %v1004_v54 }
 0x399   : > { %v2029_v59 = vadd.f32 %v2028_v57, %v1005_v56 }
 0x39b   : > { %v2030_v61 = vadd.f32 %v2029_v59, %v1006_v58 }
 0x39d   : > { %v2031_v63 = vadd.f32 %v2030_v61, %v1007_v60 }
 0x39f   : > { %v2032_v1 = vadd.f32 %v2031_v63, %v1008_v62 }
 0x3a1   : > { %v2033_v3 = vadd.f32 %v2032_v1, %v1009_v0 }
 0x3a3   : > { %v2034_v5 = vadd.f32 %v2033_v3, %v1010_v2 }
 0x3a5   : > { %v2098_v6 = vadd.f32 %v2097_v4, %v2034_v5 }
 0x3a7   : > { %2099 = vst [vmem:[%s4123_s23] sm:$0xff] %v2098_v6 }
 0x3a8 PF: > { %p4022_p10 = scmp.ge.s32.totalorder %s4065_s12, 0 }
 0x3aa   : > { %2103 = sbr.rel (%p4022_p10) target bundleno = 1457 (0x5b1), region = 44 }
 0x3af   : > { %v2104_v7 = vld [vmem:[%s4140_s7] sm:$0xff]  ;;  %v2105_v8 = vld [vmem:[%s4140_s7 + $0x8] sm:$0xff]  ;;  %v2106_v9 = vld [vmem:[%s4140_s7 + $0x10] sm:$0xff] }
 0x3b0   : > { %v2360_v10 = vadd.f32 %v2105_v8, %v2104_v7  ;;  %v2107_v11 = vld [vmem:[%s4140_s7 + $0x18] sm:$0xff]  ;;  %v2108_v13 = vld [vmem:[%s4140_s7 + $0x20] sm:$0xff]  ;;  %v2109_v15 = vld [vmem:[%s4140_s7 + $0x28] sm:$0xff] }
 0x3b1   : > { %v2110_v17 = vld [vmem:[%s4140_s7 + $0x30] sm:$0xff]  ;;  %v2111_v19 = vld [vmem:[%s4140_s7 + $0x38] sm:$0xff]  ;;  %v2112_v21 = vld [vmem:[%s4140_s7 + $0x40] sm:$0xff] }
 0x3b2   : > { %v2361_v12 = vadd.f32 %v2360_v10, %v2106_v9  ;;  %v2113_v23 = vld [vmem:[%s4140_s7 + $0x48] sm:$0xff]  ;;  %v2114_v25 = vld [vmem:[%s4140_s7 + $0x50] sm:$0xff]  ;;  %v2115_v27 = vld [vmem:[%s4140_s7 + $0x58] sm:$0xff] }
 0x3b3   : > { %v2116_v29 = vld [vmem:[%s4140_s7 + $0x60] sm:$0xff]  ;;  %v2117_v31 = vld [vmem:[%s4140_s7 + $0x68] sm:$0xff]  ;;  %v2118_v33 = vld [vmem:[%s4140_s7 + $0x70] sm:$0xff] }
 0x3b4   : > { %v2362_v14 = vadd.f32 %v2361_v12, %v2107_v11  ;;  %v2119_v35 = vld [vmem:[%s4140_s7 + $0x78] sm:$0xff]  ;;  %v2120_v37 = vld [vmem:[%s4140_s7 + $0x80] sm:$0xff]  ;;  %v2121_v39 = vld [vmem:[%s4140_s7 + $0x88] sm:$0xff] }
 0x3b5   : > { %v2122_v41 = vld [vmem:[%s4140_s7 + $0x90] sm:$0xff]  ;;  %v2123_v43 = vld [vmem:[%s4140_s7 + $0x98] sm:$0xff]  ;;  %v2124_v45 = vld [vmem:[%s4140_s7 + $0xa0] sm:$0xff] }
 0x3b6   : > { %v2363_v16 = vadd.f32 %v2362_v14, %v2108_v13  ;;  %v2125_v47 = vld [vmem:[%s4140_s7 + $0xa8] sm:$0xff]  ;;  %v2126_v49 = vld [vmem:[%s4140_s7 + $0xb0] sm:$0xff]  ;;  %v2127_v51 = vld [vmem:[%s4140_s7 + $0xb8] sm:$0xff] }
 0x3b7   : > { %v2128_v53 = vld [vmem:[%s4140_s7 + $0xc0] sm:$0xff]  ;;  %v2129_v55 = vld [vmem:[%s4140_s7 + $0xc8] sm:$0xff]  ;;  %v2130_v57 = vld [vmem:[%s4140_s7 + $0xd0] sm:$0xff] }
 0x3b8   : > { %v2364_v18 = vadd.f32 %v2363_v16, %v2109_v15  ;;  %v2131_v59 = vld [vmem:[%s4140_s7 + $0xd8] sm:$0xff]  ;;  %v2132_v61 = vld [vmem:[%s4140_s7 + $0xe0] sm:$0xff]  ;;  %v2133_v63 = vld [vmem:[%s4140_s7 + $0xe8] sm:$0xff] }
 0x3b9   : > { %v2134_v1 = vld [vmem:[%s4140_s7 + $0xf0] sm:$0xff]  ;;  %v2135_v3 = vld [vmem:[%s4140_s7 + $0xf8] sm:$0xff]  ;;  %v2136_v5 = vld [vmem:[%s4140_s7 + $0x100] sm:$0xff] }
 0x3ba   : > { %v2365_v20 = vadd.f32 %v2364_v18, %v2110_v17  ;;  %v2137_v7 = vld [vmem:[%s4140_s7 + $0x108] sm:$0xff]  ;;  %v2138_v9 = vld [vmem:[%s4140_s7 + $0x110] sm:$0xff]  ;;  %v2139_v11 = vld [vmem:[%s4140_s7 + $0x118] sm:$0xff] }
 0x3bb   : > { %v2140_v13 = vld [vmem:[%s4140_s7 + $0x120] sm:$0xff]  ;;  %v2141_v15 = vld [vmem:[%s4140_s7 + $0x128] sm:$0xff]  ;;  %v2142_v17 = vld [vmem:[%s4140_s7 + $0x130] sm:$0xff] }
 0x3bc   : > { %v2366_v22 = vadd.f32 %v2365_v20, %v2111_v19  ;;  %v2143_v19 = vld [vmem:[%s4140_s7 + $0x138] sm:$0xff] }
 0x3be   : > { %v2367_v24 = vadd.f32 %v2366_v22, %v2112_v21  ;;  %v2144_v21 = vld [vmem:[%s4140_s7 + $0x140] sm:$0xff] }
 0x3c0   : > { %v2368_v26 = vadd.f32 %v2367_v24, %v2113_v23  ;;  %v2145_v23 = vld [vmem:[%s4140_s7 + $0x148] sm:$0xff] }
 0x3c2   : > { %v2369_v28 = vadd.f32 %v2368_v26, %v2114_v25  ;;  %v2146_v25 = vld [vmem:[%s4140_s7 + $0x150] sm:$0xff] }
 0x3c4   : > { %v2370_v30 = vadd.f32 %v2369_v28, %v2115_v27  ;;  %v2147_v27 = vld [vmem:[%s4140_s7 + $0x158] sm:$0xff] }
 0x3c6   : > { %v2371_v32 = vadd.f32 %v2370_v30, %v2116_v29  ;;  %v2148_v29 = vld [vmem:[%s4140_s7 + $0x160] sm:$0xff] }
 0x3c8   : > { %v2372_v34 = vadd.f32 %v2371_v32, %v2117_v31  ;;  %v2149_v31 = vld [vmem:[%s4140_s7 + $0x168] sm:$0xff] }
 0x3ca   : > { %v2373_v36 = vadd.f32 %v2372_v34, %v2118_v33  ;;  %v2150_v33 = vld [vmem:[%s4140_s7 + $0x170] sm:$0xff] }
 0x3cc   : > { %v2374_v38 = vadd.f32 %v2373_v36, %v2119_v35  ;;  %v2151_v35 = vld [vmem:[%s4140_s7 + $0x178] sm:$0xff] }
 0x3ce   : > { %v2375_v40 = vadd.f32 %v2374_v38, %v2120_v37  ;;  %v2152_v37 = vld [vmem:[%s4140_s7 + $0x180] sm:$0xff] }
 0x3d0   : > { %v2376_v42 = vadd.f32 %v2375_v40, %v2121_v39  ;;  %v2153_v39 = vld [vmem:[%s4140_s7 + $0x188] sm:$0xff] }
 0x3d2   : > { %v2377_v44 = vadd.f32 %v2376_v42, %v2122_v41  ;;  %v2154_v41 = vld [vmem:[%s4140_s7 + $0x190] sm:$0xff] }
 0x3d4   : > { %v2378_v46 = vadd.f32 %v2377_v44, %v2123_v43  ;;  %v2155_v43 = vld [vmem:[%s4140_s7 + $0x198] sm:$0xff] }
 0x3d6   : > { %v2379_v48 = vadd.f32 %v2378_v46, %v2124_v45  ;;  %v2156_v45 = vld [vmem:[%s4140_s7 + $0x1a0] sm:$0xff] }
 0x3d8   : > { %v2380_v50 = vadd.f32 %v2379_v48, %v2125_v47  ;;  %v2157_v47 = vld [vmem:[%s4140_s7 + $0x1a8] sm:$0xff] }
 0x3da   : > { %v2381_v52 = vadd.f32 %v2380_v50, %v2126_v49  ;;  %v2158_v49 = vld [vmem:[%s4140_s7 + $0x1b0] sm:$0xff] }
 0x3dc   : > { %v2382_v54 = vadd.f32 %v2381_v52, %v2127_v51  ;;  %v2159_v51 = vld [vmem:[%s4140_s7 + $0x1b8] sm:$0xff] }
 0x3de   : > { %v2383_v56 = vadd.f32 %v2382_v54, %v2128_v53  ;;  %v2160_v53 = vld [vmem:[%s4140_s7 + $0x1c0] sm:$0xff] }
 0x3e0   : > { %v2384_v58 = vadd.f32 %v2383_v56, %v2129_v55  ;;  %v2161_v55 = vld [vmem:[%s4140_s7 + $0x1c8] sm:$0xff] }
 0x3e2   : > { %v2385_v60 = vadd.f32 %v2384_v58, %v2130_v57  ;;  %v2162_v57 = vld [vmem:[%s4140_s7 + $0x1d0] sm:$0xff] }
 0x3e4   : > { %v2386_v62 = vadd.f32 %v2385_v60, %v2131_v59  ;;  %v2163_v59 = vld [vmem:[%s4140_s7 + $0x1d8] sm:$0xff] }
 0x3e6   : > { %v2387_v0 = vadd.f32 %v2386_v62, %v2132_v61  ;;  %v2164_v61 = vld [vmem:[%s4140_s7 + $0x1e0] sm:$0xff] }
 0x3e8   : > { %v2388_v2 = vadd.f32 %v2387_v0, %v2133_v63  ;;  %v2165_v63 = vld [vmem:[%s4140_s7 + $0x1e8] sm:$0xff] }
 0x3ea   : > { %v2389_v4 = vadd.f32 %v2388_v2, %v2134_v1  ;;  %v2166_v1 = vld [vmem:[%s4140_s7 + $0x1f0] sm:$0xff] }
 0x3ec   : > { %v2390_v6 = vadd.f32 %v2389_v4, %v2135_v3  ;;  %v2167_v3 = vld [vmem:[%s4140_s7 + $0x1f8] sm:$0xff] }
 0x3ee   : > { %v2391_v8 = vadd.f32 %v2390_v6, %v2136_v5  ;;  %v2168_v5 = vld [vmem:[%s4140_s7 + $0x200] sm:$0xff] }
 0x3f0   : > { %v2392_v10 = vadd.f32 %v2391_v8, %v2137_v7  ;;  %v2169_v7 = vld [vmem:[%s4140_s7 + $0x208] sm:$0xff] }
 0x3f2   : > { %v2393_v12 = vadd.f32 %v2392_v10, %v2138_v9  ;;  %v2170_v9 = vld [vmem:[%s4140_s7 + $0x210] sm:$0xff] }
 0x3f4   : > { %v2394_v14 = vadd.f32 %v2393_v12, %v2139_v11  ;;  %v2171_v11 = vld [vmem:[%s4140_s7 + $0x218] sm:$0xff] }
 0x3f6   : > { %v2395_v16 = vadd.f32 %v2394_v14, %v2140_v13  ;;  %v2172_v13 = vld [vmem:[%s4140_s7 + $0x220] sm:$0xff] }
 0x3f8   : > { %v2396_v18 = vadd.f32 %v2395_v16, %v2141_v15  ;;  %v2173_v15 = vld [vmem:[%s4140_s7 + $0x228] sm:$0xff] }
 0x3fa   : > { %v2397_v20 = vadd.f32 %v2396_v18, %v2142_v17  ;;  %v2174_v17 = vld [vmem:[%s4140_s7 + $0x230] sm:$0xff] }
 0x3fc   : > { %v2398_v22 = vadd.f32 %v2397_v20, %v2143_v19  ;;  %v2175_v19 = vld [vmem:[%s4140_s7 + $0x238] sm:$0xff] }
 0x3fe   : > { %v2399_v24 = vadd.f32 %v2398_v22, %v2144_v21  ;;  %v2176_v21 = vld [vmem:[%s4140_s7 + $0x240] sm:$0xff] }
 0x400   : > { %v2400_v26 = vadd.f32 %v2399_v24, %v2145_v23  ;;  %v2177_v23 = vld [vmem:[%s4140_s7 + $0x248] sm:$0xff] }
 0x402   : > { %v2401_v28 = vadd.f32 %v2400_v26, %v2146_v25  ;;  %v2178_v25 = vld [vmem:[%s4140_s7 + $0x250] sm:$0xff] }
 0x404   : > { %v2402_v30 = vadd.f32 %v2401_v28, %v2147_v27  ;;  %v2179_v27 = vld [vmem:[%s4140_s7 + $0x258] sm:$0xff] }
 0x406   : > { %v2403_v32 = vadd.f32 %v2402_v30, %v2148_v29  ;;  %v2180_v29 = vld [vmem:[%s4140_s7 + $0x260] sm:$0xff] }
 0x408   : > { %v2404_v34 = vadd.f32 %v2403_v32, %v2149_v31  ;;  %v2181_v31 = vld [vmem:[%s4140_s7 + $0x268] sm:$0xff] }
 0x40a   : > { %v2405_v36 = vadd.f32 %v2404_v34, %v2150_v33  ;;  %v2182_v33 = vld [vmem:[%s4140_s7 + $0x270] sm:$0xff] }
 0x40c   : > { %v2406_v38 = vadd.f32 %v2405_v36, %v2151_v35  ;;  %v2183_v35 = vld [vmem:[%s4140_s7 + $0x278] sm:$0xff] }
 0x40e   : > { %v2407_v40 = vadd.f32 %v2406_v38, %v2152_v37  ;;  %v2184_v37 = vld [vmem:[%s4140_s7 + $0x280] sm:$0xff] }
 0x410   : > { %v2408_v42 = vadd.f32 %v2407_v40, %v2153_v39  ;;  %v2185_v39 = vld [vmem:[%s4140_s7 + $0x288] sm:$0xff] }
 0x412   : > { %v2409_v44 = vadd.f32 %v2408_v42, %v2154_v41  ;;  %v2186_v41 = vld [vmem:[%s4140_s7 + $0x290] sm:$0xff] }
 0x414   : > { %v2410_v46 = vadd.f32 %v2409_v44, %v2155_v43  ;;  %v2187_v43 = vld [vmem:[%s4140_s7 + $0x298] sm:$0xff] }
 0x416   : > { %v2411_v48 = vadd.f32 %v2410_v46, %v2156_v45  ;;  %v2188_v45 = vld [vmem:[%s4140_s7 + $0x2a0] sm:$0xff] }
 0x418   : > { %v2412_v50 = vadd.f32 %v2411_v48, %v2157_v47  ;;  %v2189_v47 = vld [vmem:[%s4140_s7 + $0x2a8] sm:$0xff] }
 0x41a   : > { %v2413_v52 = vadd.f32 %v2412_v50, %v2158_v49  ;;  %v2190_v49 = vld [vmem:[%s4140_s7 + $0x2b0] sm:$0xff] }
 0x41c   : > { %v2414_v54 = vadd.f32 %v2413_v52, %v2159_v51  ;;  %v2191_v51 = vld [vmem:[%s4140_s7 + $0x2b8] sm:$0xff] }
 0x41e   : > { %v2415_v56 = vadd.f32 %v2414_v54, %v2160_v53  ;;  %v2192_v53 = vld [vmem:[%s4140_s7 + $0x2c0] sm:$0xff] }
 0x420   : > { %v2416_v58 = vadd.f32 %v2415_v56, %v2161_v55  ;;  %v2193_v55 = vld [vmem:[%s4140_s7 + $0x2c8] sm:$0xff] }
 0x422   : > { %v2417_v60 = vadd.f32 %v2416_v58, %v2162_v57  ;;  %v2194_v57 = vld [vmem:[%s4140_s7 + $0x2d0] sm:$0xff] }
 0x424   : > { %v2418_v62 = vadd.f32 %v2417_v60, %v2163_v59  ;;  %v2195_v59 = vld [vmem:[%s4140_s7 + $0x2d8] sm:$0xff] }
 0x426   : > { %v2419_v0 = vadd.f32 %v2418_v62, %v2164_v61  ;;  %v2196_v61 = vld [vmem:[%s4140_s7 + $0x2e0] sm:$0xff] }
 0x428   : > { %v2420_v2 = vadd.f32 %v2419_v0, %v2165_v63  ;;  %v2197_v63 = vld [vmem:[%s4140_s7 + $0x2e8] sm:$0xff] }
 0x42a   : > { %v2421_v4 = vadd.f32 %v2420_v2, %v2166_v1  ;;  %v2198_v1 = vld [vmem:[%s4140_s7 + $0x2f0] sm:$0xff] }
 0x42c   : > { %v2422_v6 = vadd.f32 %v2421_v4, %v2167_v3  ;;  %v2199_v3 = vld [vmem:[%s4140_s7 + $0x2f8] sm:$0xff] }
 0x42e   : > { %v2423_v8 = vadd.f32 %v2422_v6, %v2168_v5  ;;  %v2200_v5 = vld [vmem:[%s4140_s7 + $0x300] sm:$0xff] }
 0x430   : > { %v2424_v10 = vadd.f32 %v2423_v8, %v2169_v7  ;;  %v2201_v7 = vld [vmem:[%s4140_s7 + $0x308] sm:$0xff] }
 0x432   : > { %v2425_v12 = vadd.f32 %v2424_v10, %v2170_v9  ;;  %v2202_v9 = vld [vmem:[%s4140_s7 + $0x310] sm:$0xff] }
 0x434   : > { %v2426_v14 = vadd.f32 %v2425_v12, %v2171_v11  ;;  %v2203_v11 = vld [vmem:[%s4140_s7 + $0x318] sm:$0xff] }
 0x436   : > { %v2427_v16 = vadd.f32 %v2426_v14, %v2172_v13  ;;  %v2204_v13 = vld [vmem:[%s4140_s7 + $0x320] sm:$0xff] }
 0x438   : > { %v2428_v18 = vadd.f32 %v2427_v16, %v2173_v15  ;;  %v2205_v15 = vld [vmem:[%s4140_s7 + $0x328] sm:$0xff] }
 0x43a   : > { %v2429_v20 = vadd.f32 %v2428_v18, %v2174_v17  ;;  %v2206_v17 = vld [vmem:[%s4140_s7 + $0x330] sm:$0xff] }
 0x43c   : > { %v2430_v22 = vadd.f32 %v2429_v20, %v2175_v19  ;;  %v2207_v19 = vld [vmem:[%s4140_s7 + $0x338] sm:$0xff] }
 0x43e   : > { %v2431_v24 = vadd.f32 %v2430_v22, %v2176_v21  ;;  %v2208_v21 = vld [vmem:[%s4140_s7 + $0x340] sm:$0xff] }
 0x440   : > { %v2432_v26 = vadd.f32 %v2431_v24, %v2177_v23  ;;  %v2209_v23 = vld [vmem:[%s4140_s7 + $0x348] sm:$0xff] }
 0x442   : > { %v2433_v28 = vadd.f32 %v2432_v26, %v2178_v25  ;;  %v2210_v25 = vld [vmem:[%s4140_s7 + $0x350] sm:$0xff] }
 0x444   : > { %v2434_v30 = vadd.f32 %v2433_v28, %v2179_v27  ;;  %v2211_v27 = vld [vmem:[%s4140_s7 + $0x358] sm:$0xff] }
 0x446   : > { %v2435_v32 = vadd.f32 %v2434_v30, %v2180_v29  ;;  %v2212_v29 = vld [vmem:[%s4140_s7 + $0x360] sm:$0xff] }
 0x448   : > { %v2436_v34 = vadd.f32 %v2435_v32, %v2181_v31  ;;  %v2213_v31 = vld [vmem:[%s4140_s7 + $0x368] sm:$0xff] }
 0x44a   : > { %v2437_v36 = vadd.f32 %v2436_v34, %v2182_v33  ;;  %v2214_v33 = vld [vmem:[%s4140_s7 + $0x370] sm:$0xff] }
 0x44c   : > { %v2438_v38 = vadd.f32 %v2437_v36, %v2183_v35  ;;  %v2215_v35 = vld [vmem:[%s4140_s7 + $0x378] sm:$0xff] }
 0x44e   : > { %v2439_v40 = vadd.f32 %v2438_v38, %v2184_v37  ;;  %v2216_v37 = vld [vmem:[%s4140_s7 + $0x380] sm:$0xff] }
 0x450   : > { %v2440_v42 = vadd.f32 %v2439_v40, %v2185_v39  ;;  %v2217_v39 = vld [vmem:[%s4140_s7 + $0x388] sm:$0xff] }
 0x452   : > { %v2441_v44 = vadd.f32 %v2440_v42, %v2186_v41  ;;  %v2218_v41 = vld [vmem:[%s4140_s7 + $0x390] sm:$0xff] }
 0x454   : > { %v2442_v46 = vadd.f32 %v2441_v44, %v2187_v43  ;;  %v2219_v43 = vld [vmem:[%s4140_s7 + $0x398] sm:$0xff] }
 0x456   : > { %v2443_v48 = vadd.f32 %v2442_v46, %v2188_v45  ;;  %v2220_v45 = vld [vmem:[%s4140_s7 + $0x3a0] sm:$0xff] }
 0x458   : > { %v2444_v50 = vadd.f32 %v2443_v48, %v2189_v47  ;;  %v2221_v47 = vld [vmem:[%s4140_s7 + $0x3a8] sm:$0xff] }
 0x45a   : > { %v2445_v52 = vadd.f32 %v2444_v50, %v2190_v49  ;;  %v2222_v49 = vld [vmem:[%s4140_s7 + $0x3b0] sm:$0xff] }
 0x45c   : > { %v2446_v54 = vadd.f32 %v2445_v52, %v2191_v51  ;;  %v2223_v51 = vld [vmem:[%s4140_s7 + $0x3b8] sm:$0xff] }
 0x45e   : > { %v2447_v56 = vadd.f32 %v2446_v54, %v2192_v53  ;;  %v2224_v53 = vld [vmem:[%s4140_s7 + $0x3c0] sm:$0xff] }
 0x460   : > { %v2448_v58 = vadd.f32 %v2447_v56, %v2193_v55  ;;  %v2225_v55 = vld [vmem:[%s4140_s7 + $0x3c8] sm:$0xff] }
 0x462   : > { %v2449_v60 = vadd.f32 %v2448_v58, %v2194_v57  ;;  %v2226_v57 = vld [vmem:[%s4140_s7 + $0x3d0] sm:$0xff] }
 0x464   : > { %v2450_v62 = vadd.f32 %v2449_v60, %v2195_v59  ;;  %v2227_v59 = vld [vmem:[%s4140_s7 + $0x3d8] sm:$0xff] }
 0x466   : > { %v2451_v0 = vadd.f32 %v2450_v62, %v2196_v61  ;;  %v2228_v61 = vld [vmem:[%s4140_s7 + $0x3e0] sm:$0xff] }
 0x468   : > { %v2452_v2 = vadd.f32 %v2451_v0, %v2197_v63  ;;  %v2229_v63 = vld [vmem:[%s4140_s7 + $0x3e8] sm:$0xff] }
 0x46a   : > { %v2453_v4 = vadd.f32 %v2452_v2, %v2198_v1  ;;  %v2230_v1 = vld [vmem:[%s4140_s7 + $0x3f0] sm:$0xff] }
 0x46c   : > { %v2454_v6 = vadd.f32 %v2453_v4, %v2199_v3  ;;  %v2231_v3 = vld [vmem:[%s4140_s7 + $0x3f8] sm:$0xff] }
 0x46e   : > { %v2455_v8 = vadd.f32 %v2454_v6, %v2200_v5  ;;  %v2232_v5 = vld [vmem:[%s4140_s7 + $0x400] sm:$0xff] }
 0x470   : > { %v2456_v10 = vadd.f32 %v2455_v8, %v2201_v7  ;;  %v2233_v7 = vld [vmem:[%s4140_s7 + $0x408] sm:$0xff] }
 0x472   : > { %v2457_v12 = vadd.f32 %v2456_v10, %v2202_v9  ;;  %v2234_v9 = vld [vmem:[%s4140_s7 + $0x410] sm:$0xff] }
 0x474   : > { %v2458_v14 = vadd.f32 %v2457_v12, %v2203_v11  ;;  %v2235_v11 = vld [vmem:[%s4140_s7 + $0x418] sm:$0xff] }
 0x476   : > { %v2459_v16 = vadd.f32 %v2458_v14, %v2204_v13  ;;  %v2236_v13 = vld [vmem:[%s4140_s7 + $0x420] sm:$0xff] }
 0x478   : > { %v2460_v18 = vadd.f32 %v2459_v16, %v2205_v15  ;;  %v2237_v15 = vld [vmem:[%s4140_s7 + $0x428] sm:$0xff] }
 0x47a   : > { %v2461_v20 = vadd.f32 %v2460_v18, %v2206_v17  ;;  %v2238_v17 = vld [vmem:[%s4140_s7 + $0x430] sm:$0xff] }
 0x47c   : > { %v2462_v22 = vadd.f32 %v2461_v20, %v2207_v19  ;;  %v2239_v19 = vld [vmem:[%s4140_s7 + $0x438] sm:$0xff] }
 0x47e   : > { %v2463_v24 = vadd.f32 %v2462_v22, %v2208_v21  ;;  %v2240_v21 = vld [vmem:[%s4140_s7 + $0x440] sm:$0xff] }
 0x480   : > { %v2464_v26 = vadd.f32 %v2463_v24, %v2209_v23  ;;  %v2241_v23 = vld [vmem:[%s4140_s7 + $0x448] sm:$0xff] }
 0x482   : > { %v2465_v28 = vadd.f32 %v2464_v26, %v2210_v25  ;;  %v2242_v25 = vld [vmem:[%s4140_s7 + $0x450] sm:$0xff] }
 0x484   : > { %v2466_v30 = vadd.f32 %v2465_v28, %v2211_v27  ;;  %v2243_v27 = vld [vmem:[%s4140_s7 + $0x458] sm:$0xff] }
 0x486   : > { %v2467_v32 = vadd.f32 %v2466_v30, %v2212_v29  ;;  %v2244_v29 = vld [vmem:[%s4140_s7 + $0x460] sm:$0xff] }
 0x488   : > { %v2468_v34 = vadd.f32 %v2467_v32, %v2213_v31  ;;  %v2245_v31 = vld [vmem:[%s4140_s7 + $0x468] sm:$0xff] }
 0x48a   : > { %v2469_v36 = vadd.f32 %v2468_v34, %v2214_v33  ;;  %v2246_v33 = vld [vmem:[%s4140_s7 + $0x470] sm:$0xff] }
 0x48c   : > { %v2470_v38 = vadd.f32 %v2469_v36, %v2215_v35  ;;  %v2247_v35 = vld [vmem:[%s4140_s7 + $0x478] sm:$0xff] }
 0x48e   : > { %v2471_v40 = vadd.f32 %v2470_v38, %v2216_v37  ;;  %v2248_v37 = vld [vmem:[%s4140_s7 + $0x480] sm:$0xff] }
 0x490   : > { %v2472_v42 = vadd.f32 %v2471_v40, %v2217_v39  ;;  %v2249_v39 = vld [vmem:[%s4140_s7 + $0x488] sm:$0xff] }
 0x492   : > { %v2473_v44 = vadd.f32 %v2472_v42, %v2218_v41  ;;  %v2250_v41 = vld [vmem:[%s4140_s7 + $0x490] sm:$0xff] }
 0x494   : > { %v2474_v46 = vadd.f32 %v2473_v44, %v2219_v43  ;;  %v2251_v43 = vld [vmem:[%s4140_s7 + $0x498] sm:$0xff] }
 0x496   : > { %v2475_v48 = vadd.f32 %v2474_v46, %v2220_v45  ;;  %v2252_v45 = vld [vmem:[%s4140_s7 + $0x4a0] sm:$0xff] }
 0x498   : > { %v2476_v50 = vadd.f32 %v2475_v48, %v2221_v47  ;;  %v2253_v47 = vld [vmem:[%s4140_s7 + $0x4a8] sm:$0xff] }
 0x49a   : > { %v2477_v52 = vadd.f32 %v2476_v50, %v2222_v49  ;;  %v2254_v49 = vld [vmem:[%s4140_s7 + $0x4b0] sm:$0xff] }
 0x49c   : > { %v2478_v54 = vadd.f32 %v2477_v52, %v2223_v51  ;;  %v2255_v51 = vld [vmem:[%s4140_s7 + $0x4b8] sm:$0xff] }
 0x49e   : > { %v2479_v56 = vadd.f32 %v2478_v54, %v2224_v53  ;;  %v2256_v53 = vld [vmem:[%s4140_s7 + $0x4c0] sm:$0xff] }
 0x4a0   : > { %v2480_v58 = vadd.f32 %v2479_v56, %v2225_v55  ;;  %v2257_v55 = vld [vmem:[%s4140_s7 + $0x4c8] sm:$0xff] }
 0x4a2   : > { %v2481_v60 = vadd.f32 %v2480_v58, %v2226_v57  ;;  %v2258_v57 = vld [vmem:[%s4140_s7 + $0x4d0] sm:$0xff] }
 0x4a4   : > { %v2482_v62 = vadd.f32 %v2481_v60, %v2227_v59  ;;  %v2259_v59 = vld [vmem:[%s4140_s7 + $0x4d8] sm:$0xff] }
 0x4a6   : > { %v2483_v0 = vadd.f32 %v2482_v62, %v2228_v61  ;;  %v2260_v61 = vld [vmem:[%s4140_s7 + $0x4e0] sm:$0xff] }
 0x4a8   : > { %v2484_v2 = vadd.f32 %v2483_v0, %v2229_v63  ;;  %v2261_v63 = vld [vmem:[%s4140_s7 + $0x4e8] sm:$0xff] }
 0x4aa   : > { %v2485_v4 = vadd.f32 %v2484_v2, %v2230_v1  ;;  %v2262_v1 = vld [vmem:[%s4140_s7 + $0x4f0] sm:$0xff] }
 0x4ac   : > { %v2486_v6 = vadd.f32 %v2485_v4, %v2231_v3  ;;  %v2263_v3 = vld [vmem:[%s4140_s7 + $0x4f8] sm:$0xff] }
 0x4ae   : > { %v2487_v8 = vadd.f32 %v2486_v6, %v2232_v5  ;;  %v2264_v5 = vld [vmem:[%s4140_s7 + $0x500] sm:$0xff] }
 0x4b0   : > { %v2488_v10 = vadd.f32 %v2487_v8, %v2233_v7  ;;  %v2265_v7 = vld [vmem:[%s4140_s7 + $0x508] sm:$0xff] }
 0x4b2   : > { %v2489_v12 = vadd.f32 %v2488_v10, %v2234_v9  ;;  %v2266_v9 = vld [vmem:[%s4140_s7 + $0x510] sm:$0xff] }
 0x4b4   : > { %v2490_v14 = vadd.f32 %v2489_v12, %v2235_v11  ;;  %v2267_v11 = vld [vmem:[%s4140_s7 + $0x518] sm:$0xff] }
 0x4b6   : > { %v2491_v16 = vadd.f32 %v2490_v14, %v2236_v13  ;;  %v2268_v13 = vld [vmem:[%s4140_s7 + $0x520] sm:$0xff] }
 0x4b8   : > { %v2492_v18 = vadd.f32 %v2491_v16, %v2237_v15  ;;  %v2269_v15 = vld [vmem:[%s4140_s7 + $0x528] sm:$0xff] }
 0x4ba   : > { %v2493_v20 = vadd.f32 %v2492_v18, %v2238_v17  ;;  %v2270_v17 = vld [vmem:[%s4140_s7 + $0x530] sm:$0xff] }
 0x4bc   : > { %v2494_v22 = vadd.f32 %v2493_v20, %v2239_v19  ;;  %v2271_v19 = vld [vmem:[%s4140_s7 + $0x538] sm:$0xff] }
 0x4be   : > { %v2495_v24 = vadd.f32 %v2494_v22, %v2240_v21  ;;  %v2272_v21 = vld [vmem:[%s4140_s7 + $0x540] sm:$0xff] }
 0x4c0   : > { %v2496_v26 = vadd.f32 %v2495_v24, %v2241_v23  ;;  %v2273_v23 = vld [vmem:[%s4140_s7 + $0x548] sm:$0xff] }
 0x4c2   : > { %v2497_v28 = vadd.f32 %v2496_v26, %v2242_v25  ;;  %v2274_v25 = vld [vmem:[%s4140_s7 + $0x550] sm:$0xff] }
 0x4c4   : > { %v2498_v30 = vadd.f32 %v2497_v28, %v2243_v27  ;;  %v2275_v27 = vld [vmem:[%s4140_s7 + $0x558] sm:$0xff] }
 0x4c6   : > { %v2499_v32 = vadd.f32 %v2498_v30, %v2244_v29  ;;  %v2276_v29 = vld [vmem:[%s4140_s7 + $0x560] sm:$0xff] }
 0x4c8   : > { %v2500_v34 = vadd.f32 %v2499_v32, %v2245_v31  ;;  %v2277_v31 = vld [vmem:[%s4140_s7 + $0x568] sm:$0xff] }
 0x4ca   : > { %v2501_v36 = vadd.f32 %v2500_v34, %v2246_v33  ;;  %v2278_v33 = vld [vmem:[%s4140_s7 + $0x570] sm:$0xff] }
 0x4cc   : > { %v2502_v38 = vadd.f32 %v2501_v36, %v2247_v35  ;;  %v2279_v35 = vld [vmem:[%s4140_s7 + $0x578] sm:$0xff] }
 0x4ce   : > { %v2503_v40 = vadd.f32 %v2502_v38, %v2248_v37  ;;  %v2280_v37 = vld [vmem:[%s4140_s7 + $0x580] sm:$0xff] }
 0x4d0   : > { %v2504_v42 = vadd.f32 %v2503_v40, %v2249_v39  ;;  %v2281_v39 = vld [vmem:[%s4140_s7 + $0x588] sm:$0xff] }
 0x4d2   : > { %v2505_v44 = vadd.f32 %v2504_v42, %v2250_v41  ;;  %v2282_v41 = vld [vmem:[%s4140_s7 + $0x590] sm:$0xff] }
 0x4d4   : > { %v2506_v46 = vadd.f32 %v2505_v44, %v2251_v43  ;;  %v2283_v43 = vld [vmem:[%s4140_s7 + $0x598] sm:$0xff] }
 0x4d6   : > { %v2507_v48 = vadd.f32 %v2506_v46, %v2252_v45  ;;  %v2284_v45 = vld [vmem:[%s4140_s7 + $0x5a0] sm:$0xff] }
 0x4d8   : > { %v2508_v50 = vadd.f32 %v2507_v48, %v2253_v47  ;;  %v2285_v47 = vld [vmem:[%s4140_s7 + $0x5a8] sm:$0xff] }
 0x4da   : > { %v2509_v52 = vadd.f32 %v2508_v50, %v2254_v49  ;;  %v2286_v49 = vld [vmem:[%s4140_s7 + $0x5b0] sm:$0xff] }
 0x4dc   : > { %v2510_v54 = vadd.f32 %v2509_v52, %v2255_v51  ;;  %v2287_v51 = vld [vmem:[%s4140_s7 + $0x5b8] sm:$0xff] }
 0x4de   : > { %v2511_v56 = vadd.f32 %v2510_v54, %v2256_v53  ;;  %v2288_v53 = vld [vmem:[%s4140_s7 + $0x5c0] sm:$0xff] }
 0x4e0   : > { %v2512_v58 = vadd.f32 %v2511_v56, %v2257_v55  ;;  %v2289_v55 = vld [vmem:[%s4140_s7 + $0x5c8] sm:$0xff] }
 0x4e2   : > { %v2513_v60 = vadd.f32 %v2512_v58, %v2258_v57  ;;  %v2290_v57 = vld [vmem:[%s4140_s7 + $0x5d0] sm:$0xff] }
 0x4e4   : > { %v2514_v62 = vadd.f32 %v2513_v60, %v2259_v59  ;;  %v2291_v59 = vld [vmem:[%s4140_s7 + $0x5d8] sm:$0xff] }
 0x4e6   : > { %v2515_v0 = vadd.f32 %v2514_v62, %v2260_v61  ;;  %v2292_v61 = vld [vmem:[%s4140_s7 + $0x5e0] sm:$0xff] }
 0x4e8   : > { %v2516_v2 = vadd.f32 %v2515_v0, %v2261_v63  ;;  %v2293_v63 = vld [vmem:[%s4140_s7 + $0x5e8] sm:$0xff] }
 0x4ea   : > { %v2517_v4 = vadd.f32 %v2516_v2, %v2262_v1  ;;  %v2294_v1 = vld [vmem:[%s4140_s7 + $0x5f0] sm:$0xff] }
 0x4ec   : > { %v2518_v6 = vadd.f32 %v2517_v4, %v2263_v3  ;;  %v2295_v3 = vld [vmem:[%s4140_s7 + $0x5f8] sm:$0xff] }
 0x4ee   : > { %v2519_v8 = vadd.f32 %v2518_v6, %v2264_v5  ;;  %v2296_v5 = vld [vmem:[%s4140_s7 + $0x600] sm:$0xff] }
 0x4f0   : > { %v2520_v10 = vadd.f32 %v2519_v8, %v2265_v7  ;;  %v2297_v7 = vld [vmem:[%s4140_s7 + $0x608] sm:$0xff] }
 0x4f2   : > { %v2521_v12 = vadd.f32 %v2520_v10, %v2266_v9  ;;  %v2298_v9 = vld [vmem:[%s4140_s7 + $0x610] sm:$0xff] }
 0x4f4   : > { %v2522_v14 = vadd.f32 %v2521_v12, %v2267_v11  ;;  %v2299_v11 = vld [vmem:[%s4140_s7 + $0x618] sm:$0xff] }
 0x4f6   : > { %v2523_v16 = vadd.f32 %v2522_v14, %v2268_v13  ;;  %v2300_v13 = vld [vmem:[%s4140_s7 + $0x620] sm:$0xff] }
 0x4f8   : > { %v2524_v18 = vadd.f32 %v2523_v16, %v2269_v15  ;;  %v2301_v15 = vld [vmem:[%s4140_s7 + $0x628] sm:$0xff] }
 0x4fa   : > { %v2525_v20 = vadd.f32 %v2524_v18, %v2270_v17  ;;  %v2302_v17 = vld [vmem:[%s4140_s7 + $0x630] sm:$0xff] }
 0x4fc   : > { %v2526_v22 = vadd.f32 %v2525_v20, %v2271_v19  ;;  %v2303_v19 = vld [vmem:[%s4140_s7 + $0x638] sm:$0xff] }
 0x4fe   : > { %v2527_v24 = vadd.f32 %v2526_v22, %v2272_v21  ;;  %v2304_v21 = vld [vmem:[%s4140_s7 + $0x640] sm:$0xff] }
 0x500   : > { %v2528_v26 = vadd.f32 %v2527_v24, %v2273_v23  ;;  %v2305_v23 = vld [vmem:[%s4140_s7 + $0x648] sm:$0xff] }
 0x502   : > { %v2529_v28 = vadd.f32 %v2528_v26, %v2274_v25  ;;  %v2306_v25 = vld [vmem:[%s4140_s7 + $0x650] sm:$0xff] }
 0x504   : > { %v2530_v30 = vadd.f32 %v2529_v28, %v2275_v27  ;;  %v2307_v27 = vld [vmem:[%s4140_s7 + $0x658] sm:$0xff] }
 0x506   : > { %v2531_v32 = vadd.f32 %v2530_v30, %v2276_v29  ;;  %v2308_v29 = vld [vmem:[%s4140_s7 + $0x660] sm:$0xff] }
 0x508   : > { %v2532_v34 = vadd.f32 %v2531_v32, %v2277_v31  ;;  %v2309_v31 = vld [vmem:[%s4140_s7 + $0x668] sm:$0xff] }
 0x50a   : > { %v2533_v36 = vadd.f32 %v2532_v34, %v2278_v33  ;;  %v2310_v33 = vld [vmem:[%s4140_s7 + $0x670] sm:$0xff] }
 0x50c   : > { %v2534_v38 = vadd.f32 %v2533_v36, %v2279_v35  ;;  %v2311_v35 = vld [vmem:[%s4140_s7 + $0x678] sm:$0xff] }
 0x50e   : > { %v2535_v40 = vadd.f32 %v2534_v38, %v2280_v37  ;;  %v2312_v37 = vld [vmem:[%s4140_s7 + $0x680] sm:$0xff] }
 0x510   : > { %v2536_v42 = vadd.f32 %v2535_v40, %v2281_v39  ;;  %v2313_v39 = vld [vmem:[%s4140_s7 + $0x688] sm:$0xff] }
 0x512   : > { %v2537_v44 = vadd.f32 %v2536_v42, %v2282_v41  ;;  %v2314_v41 = vld [vmem:[%s4140_s7 + $0x690] sm:$0xff] }
 0x514   : > { %v2538_v46 = vadd.f32 %v2537_v44, %v2283_v43  ;;  %v2315_v43 = vld [vmem:[%s4140_s7 + $0x698] sm:$0xff] }
 0x516   : > { %v2539_v48 = vadd.f32 %v2538_v46, %v2284_v45  ;;  %v2316_v45 = vld [vmem:[%s4140_s7 + $0x6a0] sm:$0xff] }
 0x518   : > { %v2540_v50 = vadd.f32 %v2539_v48, %v2285_v47  ;;  %v2317_v47 = vld [vmem:[%s4140_s7 + $0x6a8] sm:$0xff] }
 0x51a   : > { %v2541_v52 = vadd.f32 %v2540_v50, %v2286_v49  ;;  %v2318_v49 = vld [vmem:[%s4140_s7 + $0x6b0] sm:$0xff] }
 0x51c   : > { %v2542_v54 = vadd.f32 %v2541_v52, %v2287_v51  ;;  %v2319_v51 = vld [vmem:[%s4140_s7 + $0x6b8] sm:$0xff] }
 0x51e   : > { %v2543_v56 = vadd.f32 %v2542_v54, %v2288_v53  ;;  %v2320_v53 = vld [vmem:[%s4140_s7 + $0x6c0] sm:$0xff] }
 0x520   : > { %v2544_v58 = vadd.f32 %v2543_v56, %v2289_v55  ;;  %v2321_v55 = vld [vmem:[%s4140_s7 + $0x6c8] sm:$0xff] }
 0x522   : > { %v2545_v60 = vadd.f32 %v2544_v58, %v2290_v57  ;;  %v2322_v57 = vld [vmem:[%s4140_s7 + $0x6d0] sm:$0xff] }
 0x524   : > { %v2546_v62 = vadd.f32 %v2545_v60, %v2291_v59  ;;  %v2323_v59 = vld [vmem:[%s4140_s7 + $0x6d8] sm:$0xff] }
 0x526   : > { %v2547_v0 = vadd.f32 %v2546_v62, %v2292_v61  ;;  %v2324_v61 = vld [vmem:[%s4140_s7 + $0x6e0] sm:$0xff] }
 0x528   : > { %v2548_v2 = vadd.f32 %v2547_v0, %v2293_v63  ;;  %v2325_v63 = vld [vmem:[%s4140_s7 + $0x6e8] sm:$0xff] }
 0x52a   : > { %v2549_v4 = vadd.f32 %v2548_v2, %v2294_v1  ;;  %v2326_v1 = vld [vmem:[%s4140_s7 + $0x6f0] sm:$0xff] }
 0x52c   : > { %v2550_v6 = vadd.f32 %v2549_v4, %v2295_v3  ;;  %v2327_v3 = vld [vmem:[%s4140_s7 + $0x6f8] sm:$0xff] }
 0x52e   : > { %v2551_v8 = vadd.f32 %v2550_v6, %v2296_v5  ;;  %v2328_v5 = vld [vmem:[%s4140_s7 + $0x700] sm:$0xff] }
 0x530   : > { %v2552_v10 = vadd.f32 %v2551_v8, %v2297_v7  ;;  %v2329_v7 = vld [vmem:[%s4140_s7 + $0x708] sm:$0xff] }
 0x532   : > { %v2553_v12 = vadd.f32 %v2552_v10, %v2298_v9  ;;  %v2330_v9 = vld [vmem:[%s4140_s7 + $0x710] sm:$0xff] }
 0x534   : > { %v2554_v14 = vadd.f32 %v2553_v12, %v2299_v11  ;;  %v2331_v11 = vld [vmem:[%s4140_s7 + $0x718] sm:$0xff] }
 0x536   : > { %v2555_v16 = vadd.f32 %v2554_v14, %v2300_v13  ;;  %v2332_v13 = vld [vmem:[%s4140_s7 + $0x720] sm:$0xff] }
 0x538   : > { %v2556_v18 = vadd.f32 %v2555_v16, %v2301_v15  ;;  %v2333_v15 = vld [vmem:[%s4140_s7 + $0x728] sm:$0xff] }
 0x53a   : > { %v2557_v20 = vadd.f32 %v2556_v18, %v2302_v17  ;;  %v2334_v17 = vld [vmem:[%s4140_s7 + $0x730] sm:$0xff] }
 0x53c   : > { %v2558_v22 = vadd.f32 %v2557_v20, %v2303_v19  ;;  %v2335_v19 = vld [vmem:[%s4140_s7 + $0x738] sm:$0xff] }
 0x53e   : > { %v2559_v24 = vadd.f32 %v2558_v22, %v2304_v21  ;;  %v2336_v21 = vld [vmem:[%s4140_s7 + $0x740] sm:$0xff] }
 0x540   : > { %v2560_v26 = vadd.f32 %v2559_v24, %v2305_v23  ;;  %v2337_v23 = vld [vmem:[%s4140_s7 + $0x748] sm:$0xff] }
 0x542   : > { %v2561_v28 = vadd.f32 %v2560_v26, %v2306_v25  ;;  %v2338_v25 = vld [vmem:[%s4140_s7 + $0x750] sm:$0xff] }
 0x544   : > { %v2562_v30 = vadd.f32 %v2561_v28, %v2307_v27  ;;  %v2339_v27 = vld [vmem:[%s4140_s7 + $0x758] sm:$0xff] }
 0x546   : > { %v2563_v32 = vadd.f32 %v2562_v30, %v2308_v29  ;;  %v2340_v29 = vld [vmem:[%s4140_s7 + $0x760] sm:$0xff] }
 0x548   : > { %v2564_v34 = vadd.f32 %v2563_v32, %v2309_v31  ;;  %v2341_v31 = vld [vmem:[%s4140_s7 + $0x768] sm:$0xff] }
 0x54a   : > { %v2565_v36 = vadd.f32 %v2564_v34, %v2310_v33  ;;  %v2342_v33 = vld [vmem:[%s4140_s7 + $0x770] sm:$0xff] }
 0x54c   : > { %v2566_v38 = vadd.f32 %v2565_v36, %v2311_v35  ;;  %v2343_v35 = vld [vmem:[%s4140_s7 + $0x778] sm:$0xff] }
 0x54e   : > { %v2567_v40 = vadd.f32 %v2566_v38, %v2312_v37  ;;  %v2344_v37 = vld [vmem:[%s4140_s7 + $0x780] sm:$0xff] }
 0x550   : > { %v2568_v42 = vadd.f32 %v2567_v40, %v2313_v39  ;;  %v2345_v39 = vld [vmem:[%s4140_s7 + $0x788] sm:$0xff] }
 0x552   : > { %v2569_v44 = vadd.f32 %v2568_v42, %v2314_v41  ;;  %v2346_v41 = vld [vmem:[%s4140_s7 + $0x790] sm:$0xff] }
 0x554   : > { %v2570_v46 = vadd.f32 %v2569_v44, %v2315_v43  ;;  %v2347_v43 = vld [vmem:[%s4140_s7 + $0x798] sm:$0xff] }
 0x556   : > { %v2571_v48 = vadd.f32 %v2570_v46, %v2316_v45  ;;  %v2348_v45 = vld [vmem:[%s4140_s7 + $0x7a0] sm:$0xff] }
 0x558   : > { %v2572_v50 = vadd.f32 %v2571_v48, %v2317_v47  ;;  %v2349_v47 = vld [vmem:[%s4140_s7 + $0x7a8] sm:$0xff] }
 0x55a   : > { %v2573_v52 = vadd.f32 %v2572_v50, %v2318_v49  ;;  %v2350_v49 = vld [vmem:[%s4140_s7 + $0x7b0] sm:$0xff] }
 0x55c   : > { %v2574_v54 = vadd.f32 %v2573_v52, %v2319_v51  ;;  %v2351_v51 = vld [vmem:[%s4140_s7 + $0x7b8] sm:$0xff] }
 0x55e   : > { %v2575_v56 = vadd.f32 %v2574_v54, %v2320_v53  ;;  %v2352_v53 = vld [vmem:[%s4140_s7 + $0x7c0] sm:$0xff] }
 0x560   : > { %v2576_v58 = vadd.f32 %v2575_v56, %v2321_v55  ;;  %v2353_v55 = vld [vmem:[%s4140_s7 + $0x7c8] sm:$0xff] }
 0x562   : > { %v2577_v60 = vadd.f32 %v2576_v58, %v2322_v57  ;;  %v2354_v57 = vld [vmem:[%s4140_s7 + $0x7d0] sm:$0xff] }
 0x564   : > { %v2578_v62 = vadd.f32 %v2577_v60, %v2323_v59  ;;  %v2355_v59 = vld [vmem:[%s4140_s7 + $0x7d8] sm:$0xff] }
 0x566   : > { %v2579_v0 = vadd.f32 %v2578_v62, %v2324_v61  ;;  %v2356_v61 = vld [vmem:[%s4140_s7 + $0x7e0] sm:$0xff] }
 0x568   : > { %v2580_v2 = vadd.f32 %v2579_v0, %v2325_v63  ;;  %v2357_v63 = vld [vmem:[%s4140_s7 + $0x7e8] sm:$0xff] }
 0x56a   : > { %v2581_v4 = vadd.f32 %v2580_v2, %v2326_v1  ;;  %v2358_v1 = vld [vmem:[%s4140_s7 + $0x7f0] sm:$0xff] }
 0x56c   : > { %v2582_v6 = vadd.f32 %v2581_v4, %v2327_v3  ;;  %v2359_v3 = vld [vmem:[%s4140_s7 + $0x7f8] sm:$0xff] }
 0x56e   : > { %v2583_v8 = vadd.f32 %v2582_v6, %v2328_v5  ;;  %v2615_v5 = vld [vmem:[%s4129_s27] sm:$0xff] }
 0x570   : > { %v2584_v10 = vadd.f32 %v2583_v8, %v2329_v7 }
 0x572   : > { %v2585_v12 = vadd.f32 %v2584_v10, %v2330_v9 }
 0x574   : > { %v2586_v14 = vadd.f32 %v2585_v12, %v2331_v11 }
 0x576   : > { %v2587_v16 = vadd.f32 %v2586_v14, %v2332_v13 }
 0x578   : > { %v2588_v18 = vadd.f32 %v2587_v16, %v2333_v15 }
 0x57a   : > { %v2589_v20 = vadd.f32 %v2588_v18, %v2334_v17 }
 0x57c   : > { %v2590_v22 = vadd.f32 %v2589_v20, %v2335_v19 }
 0x57e   : > { %v2591_v24 = vadd.f32 %v2590_v22, %v2336_v21 }
 0x580   : > { %v2592_v26 = vadd.f32 %v2591_v24, %v2337_v23 }
 0x582   : > { %v2593_v28 = vadd.f32 %v2592_v26, %v2338_v25 }
 0x584   : > { %v2594_v30 = vadd.f32 %v2593_v28, %v2339_v27 }
 0x586   : > { %v2595_v32 = vadd.f32 %v2594_v30, %v2340_v29 }
 0x588   : > { %v2596_v34 = vadd.f32 %v2595_v32, %v2341_v31 }
 0x58a   : > { %v2597_v36 = vadd.f32 %v2596_v34, %v2342_v33 }
 0x58c   : > { %v2598_v38 = vadd.f32 %v2597_v36, %v2343_v35 }
 0x58e   : > { %v2599_v40 = vadd.f32 %v2598_v38, %v2344_v37 }
 0x590   : > { %v2600_v42 = vadd.f32 %v2599_v40, %v2345_v39 }
 0x592   : > { %v2601_v44 = vadd.f32 %v2600_v42, %v2346_v41 }
 0x594   : > { %v2602_v46 = vadd.f32 %v2601_v44, %v2347_v43 }
 0x596   : > { %v2603_v48 = vadd.f32 %v2602_v46, %v2348_v45 }
 0x598   : > { %v2604_v50 = vadd.f32 %v2603_v48, %v2349_v47 }
 0x59a   : > { %v2605_v52 = vadd.f32 %v2604_v50, %v2350_v49 }
 0x59c   : > { %v2606_v54 = vadd.f32 %v2605_v52, %v2351_v51 }
 0x59e   : > { %v2607_v56 = vadd.f32 %v2606_v54, %v2352_v53 }
 0x5a0   : > { %v2608_v58 = vadd.f32 %v2607_v56, %v2353_v55 }
 0x5a2   : > { %v2609_v60 = vadd.f32 %v2608_v58, %v2354_v57 }
 0x5a4   : > { %v2610_v62 = vadd.f32 %v2609_v60, %v2355_v59 }
 0x5a6   : > { %v2611_v0 = vadd.f32 %v2610_v62, %v2356_v61 }
 0x5a8   : > { %v2612_v2 = vadd.f32 %v2611_v0, %v2357_v63 }
 0x5aa   : > { %v2613_v4 = vadd.f32 %v2612_v2, %v2358_v1 }
 0x5ac   : > { %v2614_v6 = vadd.f32 %v2613_v4, %v2359_v3 }
 0x5ae   : > { %v2616_v7 = vadd.f32 %v2615_v5, %v2614_v6 }
 0x5b0   : > { %2617 = vst [vmem:[%s4129_s27] sm:$0xff] %v2616_v7 }
 0x5b1 PF: > { %p4023_p11 = scmp.ne.s32.totalorder %s4065_s12, 0 }
 0x5b3   : > { %2621 = sbr.rel (%p4023_p11) target bundleno = 1804 (0x70c), region = 48 }
 0x5b8   : > { %v2622_v8 = vld [vmem:[%s4140_s7] sm:$0xff]  ;;  %v2623_v9 = vld [vmem:[%s4140_s7 + $0x8] sm:$0xff]  ;;  %v2624_v10 = vld [vmem:[%s4140_s7 + $0x10] sm:$0xff] }
 0x5b9   : > { %v3647_v11 = vadd.f32 %v2623_v9, %v2622_v8  ;;  %v2625_v12 = vld [vmem:[%s4140_s7 + $0x18] sm:$0xff]  ;;  %v2626_v14 = vld [vmem:[%s4140_s7 + $0x20] sm:$0xff]  ;;  %v2627_v16 = vld [vmem:[%s4140_s7 + $0x28] sm:$0xff] }
 0x5ba   : > { %v2628_v18 = vld [vmem:[%s4140_s7 + $0x30] sm:$0xff]  ;;  %v2629_v20 = vld [vmem:[%s4140_s7 + $0x38] sm:$0xff]  ;;  %v2630_v22 = vld [vmem:[%s4140_s7 + $0x40] sm:$0xff] }
 0x5bb   : > { %v3648_v13 = vadd.f32 %v3647_v11, %v2624_v10  ;;  %v2631_v24 = vld [vmem:[%s4140_s7 + $0x48] sm:$0xff]  ;;  %v2632_v26 = vld [vmem:[%s4140_s7 + $0x50] sm:$0xff]  ;;  %v2633_v28 = vld [vmem:[%s4140_s7 + $0x58] sm:$0xff] }
 0x5bc   : > { %v2634_v30 = vld [vmem:[%s4140_s7 + $0x60] sm:$0xff]  ;;  %v2635_v32 = vld [vmem:[%s4140_s7 + $0x68] sm:$0xff]  ;;  %v2636_v34 = vld [vmem:[%s4140_s7 + $0x70] sm:$0xff] }
 0x5bd   : > { %v3649_v15 = vadd.f32 %v3648_v13, %v2625_v12  ;;  %v2637_v36 = vld [vmem:[%s4140_s7 + $0x78] sm:$0xff]  ;;  %v2638_v38 = vld [vmem:[%s4140_s7 + $0x80] sm:$0xff]  ;;  %v2639_v40 = vld [vmem:[%s4140_s7 + $0x88] sm:$0xff] }
 0x5be   : > { %v2640_v42 = vld [vmem:[%s4140_s7 + $0x90] sm:$0xff]  ;;  %v2641_v44 = vld [vmem:[%s4140_s7 + $0x98] sm:$0xff]  ;;  %v2642_v46 = vld [vmem:[%s4140_s7 + $0xa0] sm:$0xff] }
 0x5bf   : > { %v3650_v17 = vadd.f32 %v3649_v15, %v2626_v14  ;;  %v2643_v48 = vld [vmem:[%s4140_s7 + $0xa8] sm:$0xff]  ;;  %v2644_v50 = vld [vmem:[%s4140_s7 + $0xb0] sm:$0xff]  ;;  %v2645_v52 = vld [vmem:[%s4140_s7 + $0xb8] sm:$0xff] }
 0x5c0   : > { %v2646_v54 = vld [vmem:[%s4140_s7 + $0xc0] sm:$0xff]  ;;  %v2647_v56 = vld [vmem:[%s4140_s7 + $0xc8] sm:$0xff]  ;;  %v2648_v58 = vld [vmem:[%s4140_s7 + $0xd0] sm:$0xff] }
 0x5c1   : > { %v3651_v19 = vadd.f32 %v3650_v17, %v2627_v16  ;;  %v2649_v60 = vld [vmem:[%s4140_s7 + $0xd8] sm:$0xff]  ;;  %v2650_v62 = vld [vmem:[%s4140_s7 + $0xe0] sm:$0xff]  ;;  %v2651_v0 = vld [vmem:[%s4140_s7 + $0xe8] sm:$0xff] }
 0x5c2   : > { %v2652_v2 = vld [vmem:[%s4140_s7 + $0xf0] sm:$0xff]  ;;  %v2653_v4 = vld [vmem:[%s4140_s7 + $0xf8] sm:$0xff]  ;;  %v2654_v6 = vld [vmem:[%s4140_s7 + $0x100] sm:$0xff] }
 0x5c3   : > { %v3652_v21 = vadd.f32 %v3651_v19, %v2628_v18  ;;  %v2655_v8 = vld [vmem:[%s4140_s7 + $0x108] sm:$0xff]  ;;  %v2656_v10 = vld [vmem:[%s4140_s7 + $0x110] sm:$0xff]  ;;  %v2657_v12 = vld [vmem:[%s4140_s7 + $0x118] sm:$0xff] }
 0x5c4   : > { %v2658_v14 = vld [vmem:[%s4140_s7 + $0x120] sm:$0xff]  ;;  %v2659_v16 = vld [vmem:[%s4140_s7 + $0x128] sm:$0xff]  ;;  %v2660_v18 = vld [vmem:[%s4140_s7 + $0x130] sm:$0xff] }
 0x5c5   : > { %v3653_v23 = vadd.f32 %v3652_v21, %v2629_v20  ;;  %v2661_v20 = vld [vmem:[%s4140_s7 + $0x138] sm:$0xff] }
 0x5c7   : > { %v3654_v25 = vadd.f32 %v3653_v23, %v2630_v22  ;;  %v2662_v22 = vld [vmem:[%s4140_s7 + $0x140] sm:$0xff] }
 0x5c9   : > { %v3655_v27 = vadd.f32 %v3654_v25, %v2631_v24  ;;  %v2663_v24 = vld [vmem:[%s4140_s7 + $0x148] sm:$0xff] }
 0x5cb   : > { %v3656_v29 = vadd.f32 %v3655_v27, %v2632_v26  ;;  %v2664_v26 = vld [vmem:[%s4140_s7 + $0x150] sm:$0xff] }
 0x5cd   : > { %v3657_v31 = vadd.f32 %v3656_v29, %v2633_v28  ;;  %v2665_v28 = vld [vmem:[%s4140_s7 + $0x158] sm:$0xff] }
 0x5cf   : > { %v3658_v33 = vadd.f32 %v3657_v31, %v2634_v30  ;;  %v2666_v30 = vld [vmem:[%s4140_s7 + $0x160] sm:$0xff] }
 0x5d1   : > { %v3659_v35 = vadd.f32 %v3658_v33, %v2635_v32  ;;  %v2667_v32 = vld [vmem:[%s4140_s7 + $0x168] sm:$0xff] }
 0x5d3   : > { %v3660_v37 = vadd.f32 %v3659_v35, %v2636_v34  ;;  %v2668_v34 = vld [vmem:[%s4140_s7 + $0x170] sm:$0xff] }
 0x5d5   : > { %v3661_v39 = vadd.f32 %v3660_v37, %v2637_v36  ;;  %v2669_v36 = vld [vmem:[%s4140_s7 + $0x178] sm:$0xff] }
 0x5d7   : > { %v3662_v41 = vadd.f32 %v3661_v39, %v2638_v38  ;;  %v2670_v38 = vld [vmem:[%s4140_s7 + $0x180] sm:$0xff] }
 0x5d9   : > { %v3663_v43 = vadd.f32 %v3662_v41, %v2639_v40  ;;  %v2671_v40 = vld [vmem:[%s4140_s7 + $0x188] sm:$0xff] }
 0x5db   : > { %v3664_v45 = vadd.f32 %v3663_v43, %v2640_v42  ;;  %v2672_v42 = vld [vmem:[%s4140_s7 + $0x190] sm:$0xff] }
 0x5dd   : > { %v3665_v47 = vadd.f32 %v3664_v45, %v2641_v44  ;;  %v2673_v44 = vld [vmem:[%s4140_s7 + $0x198] sm:$0xff] }
 0x5df   : > { %v3666_v49 = vadd.f32 %v3665_v47, %v2642_v46  ;;  %v2674_v46 = vld [vmem:[%s4140_s7 + $0x1a0] sm:$0xff] }
 0x5e1   : > { %v3667_v51 = vadd.f32 %v3666_v49, %v2643_v48  ;;  %v2675_v48 = vld [vmem:[%s4140_s7 + $0x1a8] sm:$0xff] }
 0x5e3   : > { %v3668_v53 = vadd.f32 %v3667_v51, %v2644_v50  ;;  %v2676_v50 = vld [vmem:[%s4140_s7 + $0x1b0] sm:$0xff] }
 0x5e5   : > { %v3669_v55 = vadd.f32 %v3668_v53, %v2645_v52  ;;  %v2677_v52 = vld [vmem:[%s4140_s7 + $0x1b8] sm:$0xff] }
 0x5e7   : > { %v3670_v57 = vadd.f32 %v3669_v55, %v2646_v54  ;;  %v2678_v54 = vld [vmem:[%s4140_s7 + $0x1c0] sm:$0xff] }
 0x5e9   : > { %v3671_v59 = vadd.f32 %v3670_v57, %v2647_v56  ;;  %v2679_v56 = vld [vmem:[%s4140_s7 + $0x1c8] sm:$0xff] }
 0x5eb   : > { %v3672_v61 = vadd.f32 %v3671_v59, %v2648_v58  ;;  %v2680_v58 = vld [vmem:[%s4140_s7 + $0x1d0] sm:$0xff] }
 0x5ed   : > { %v3673_v63 = vadd.f32 %v3672_v61, %v2649_v60  ;;  %v2681_v60 = vld [vmem:[%s4140_s7 + $0x1d8] sm:$0xff] }
 0x5ef   : > { %v3674_v1 = vadd.f32 %v3673_v63, %v2650_v62  ;;  %v2682_v62 = vld [vmem:[%s4140_s7 + $0x1e0] sm:$0xff] }
 0x5f1   : > { %v3675_v3 = vadd.f32 %v3674_v1, %v2651_v0  ;;  %v2683_v0 = vld [vmem:[%s4140_s7 + $0x1e8] sm:$0xff] }
 0x5f3   : > { %v3676_v5 = vadd.f32 %v3675_v3, %v2652_v2  ;;  %v2684_v2 = vld [vmem:[%s4140_s7 + $0x1f0] sm:$0xff] }
 0x5f5   : > { %v3677_v7 = vadd.f32 %v3676_v5, %v2653_v4  ;;  %v2685_v4 = vld [vmem:[%s4140_s7 + $0x1f8] sm:$0xff] }
 0x5f7   : > { %v3678_v9 = vadd.f32 %v3677_v7, %v2654_v6  ;;  %v2686_v6 = vld [vmem:[%s4140_s7 + $0x200] sm:$0xff] }
 0x5f9   : > { %v3679_v11 = vadd.f32 %v3678_v9, %v2655_v8  ;;  %v2687_v8 = vld [vmem:[%s4140_s7 + $0x208] sm:$0xff] }
 0x5fb   : > { %v3680_v13 = vadd.f32 %v3679_v11, %v2656_v10  ;;  %v2688_v10 = vld [vmem:[%s4140_s7 + $0x210] sm:$0xff] }
 0x5fd   : > { %v3681_v15 = vadd.f32 %v3680_v13, %v2657_v12  ;;  %v2689_v12 = vld [vmem:[%s4140_s7 + $0x218] sm:$0xff] }
 0x5ff   : > { %v3682_v17 = vadd.f32 %v3681_v15, %v2658_v14  ;;  %v2690_v14 = vld [vmem:[%s4140_s7 + $0x220] sm:$0xff] }
 0x601   : > { %v3683_v19 = vadd.f32 %v3682_v17, %v2659_v16  ;;  %v2691_v16 = vld [vmem:[%s4140_s7 + $0x228] sm:$0xff] }
 0x603   : > { %v3684_v21 = vadd.f32 %v3683_v19, %v2660_v18  ;;  %v2692_v18 = vld [vmem:[%s4140_s7 + $0x230] sm:$0xff] }
 0x605   : > { %v3685_v23 = vadd.f32 %v3684_v21, %v2661_v20  ;;  %v2693_v20 = vld [vmem:[%s4140_s7 + $0x238] sm:$0xff] }
 0x607   : > { %v3686_v25 = vadd.f32 %v3685_v23, %v2662_v22  ;;  %v2694_v22 = vld [vmem:[%s4140_s7 + $0x240] sm:$0xff] }
 0x609   : > { %v3687_v27 = vadd.f32 %v3686_v25, %v2663_v24  ;;  %v2695_v24 = vld [vmem:[%s4140_s7 + $0x248] sm:$0xff] }
 0x60b   : > { %v3688_v29 = vadd.f32 %v3687_v27, %v2664_v26  ;;  %v2696_v26 = vld [vmem:[%s4140_s7 + $0x250] sm:$0xff] }
 0x60d   : > { %v3689_v31 = vadd.f32 %v3688_v29, %v2665_v28  ;;  %v2697_v28 = vld [vmem:[%s4140_s7 + $0x258] sm:$0xff] }
 0x60f   : > { %v3690_v33 = vadd.f32 %v3689_v31, %v2666_v30  ;;  %v2698_v30 = vld [vmem:[%s4140_s7 + $0x260] sm:$0xff] }
 0x611   : > { %v3691_v35 = vadd.f32 %v3690_v33, %v2667_v32  ;;  %v2699_v32 = vld [vmem:[%s4140_s7 + $0x268] sm:$0xff] }
 0x613   : > { %v3692_v37 = vadd.f32 %v3691_v35, %v2668_v34  ;;  %v2700_v34 = vld [vmem:[%s4140_s7 + $0x270] sm:$0xff] }
 0x615   : > { %v3693_v39 = vadd.f32 %v3692_v37, %v2669_v36  ;;  %v2701_v36 = vld [vmem:[%s4140_s7 + $0x278] sm:$0xff] }
 0x617   : > { %v3694_v41 = vadd.f32 %v3693_v39, %v2670_v38  ;;  %v2702_v38 = vld [vmem:[%s4140_s7 + $0x280] sm:$0xff] }
 0x619   : > { %v3695_v43 = vadd.f32 %v3694_v41, %v2671_v40  ;;  %v2703_v40 = vld [vmem:[%s4140_s7 + $0x288] sm:$0xff] }
 0x61b   : > { %v3696_v45 = vadd.f32 %v3695_v43, %v2672_v42  ;;  %v2704_v42 = vld [vmem:[%s4140_s7 + $0x290] sm:$0xff] }
 0x61d   : > { %v3697_v47 = vadd.f32 %v3696_v45, %v2673_v44  ;;  %v2705_v44 = vld [vmem:[%s4140_s7 + $0x298] sm:$0xff] }
 0x61f   : > { %v3698_v49 = vadd.f32 %v3697_v47, %v2674_v46  ;;  %v2706_v46 = vld [vmem:[%s4140_s7 + $0x2a0] sm:$0xff] }
 0x621   : > { %v3699_v51 = vadd.f32 %v3698_v49, %v2675_v48  ;;  %v2707_v48 = vld [vmem:[%s4140_s7 + $0x2a8] sm:$0xff] }
 0x623   : > { %v3700_v53 = vadd.f32 %v3699_v51, %v2676_v50  ;;  %v2708_v50 = vld [vmem:[%s4140_s7 + $0x2b0] sm:$0xff] }
 0x625   : > { %v3701_v55 = vadd.f32 %v3700_v53, %v2677_v52  ;;  %v2709_v52 = vld [vmem:[%s4140_s7 + $0x2b8] sm:$0xff] }
 0x627   : > { %v3702_v57 = vadd.f32 %v3701_v55, %v2678_v54  ;;  %v2710_v54 = vld [vmem:[%s4140_s7 + $0x2c0] sm:$0xff] }
 0x629   : > { %v3703_v59 = vadd.f32 %v3702_v57, %v2679_v56  ;;  %v2711_v56 = vld [vmem:[%s4140_s7 + $0x2c8] sm:$0xff] }
 0x62b   : > { %v3704_v61 = vadd.f32 %v3703_v59, %v2680_v58  ;;  %v2712_v58 = vld [vmem:[%s4140_s7 + $0x2d0] sm:$0xff] }
 0x62d   : > { %v3705_v63 = vadd.f32 %v3704_v61, %v2681_v60  ;;  %v2713_v60 = vld [vmem:[%s4140_s7 + $0x2d8] sm:$0xff] }
 0x62f   : > { %v3706_v1 = vadd.f32 %v3705_v63, %v2682_v62  ;;  %v2714_v62 = vld [vmem:[%s4140_s7 + $0x2e0] sm:$0xff] }
 0x631   : > { %v3707_v3 = vadd.f32 %v3706_v1, %v2683_v0  ;;  %v2715_v0 = vld [vmem:[%s4140_s7 + $0x2e8] sm:$0xff] }
 0x633   : > { %v3708_v5 = vadd.f32 %v3707_v3, %v2684_v2  ;;  %v2716_v2 = vld [vmem:[%s4140_s7 + $0x2f0] sm:$0xff] }
 0x635   : > { %v3709_v7 = vadd.f32 %v3708_v5, %v2685_v4  ;;  %v2717_v4 = vld [vmem:[%s4140_s7 + $0x2f8] sm:$0xff] }
 0x637   : > { %v3710_v9 = vadd.f32 %v3709_v7, %v2686_v6  ;;  %v2718_v6 = vld [vmem:[%s4140_s7 + $0x300] sm:$0xff] }
 0x639   : > { %v3711_v11 = vadd.f32 %v3710_v9, %v2687_v8  ;;  %v2719_v8 = vld [vmem:[%s4140_s7 + $0x308] sm:$0xff] }
 0x63b   : > { %v3712_v13 = vadd.f32 %v3711_v11, %v2688_v10  ;;  %v2720_v10 = vld [vmem:[%s4140_s7 + $0x310] sm:$0xff] }
 0x63d   : > { %v3713_v15 = vadd.f32 %v3712_v13, %v2689_v12  ;;  %v2721_v12 = vld [vmem:[%s4140_s7 + $0x318] sm:$0xff] }
 0x63f   : > { %v3714_v17 = vadd.f32 %v3713_v15, %v2690_v14  ;;  %v2722_v14 = vld [vmem:[%s4140_s7 + $0x320] sm:$0xff] }
 0x641   : > { %v3715_v19 = vadd.f32 %v3714_v17, %v2691_v16  ;;  %v2723_v16 = vld [vmem:[%s4140_s7 + $0x328] sm:$0xff] }
 0x643   : > { %v3716_v21 = vadd.f32 %v3715_v19, %v2692_v18  ;;  %v2724_v18 = vld [vmem:[%s4140_s7 + $0x330] sm:$0xff] }
 0x645   : > { %v3717_v23 = vadd.f32 %v3716_v21, %v2693_v20  ;;  %v2725_v20 = vld [vmem:[%s4140_s7 + $0x338] sm:$0xff] }
 0x647   : > { %v3718_v25 = vadd.f32 %v3717_v23, %v2694_v22  ;;  %v2726_v22 = vld [vmem:[%s4140_s7 + $0x340] sm:$0xff] }
 0x649   : > { %v3719_v27 = vadd.f32 %v3718_v25, %v2695_v24  ;;  %v2727_v24 = vld [vmem:[%s4140_s7 + $0x348] sm:$0xff] }
 0x64b   : > { %v3720_v29 = vadd.f32 %v3719_v27, %v2696_v26  ;;  %v2728_v26 = vld [vmem:[%s4140_s7 + $0x350] sm:$0xff] }
 0x64d   : > { %v3721_v31 = vadd.f32 %v3720_v29, %v2697_v28  ;;  %v2729_v28 = vld [vmem:[%s4140_s7 + $0x358] sm:$0xff] }
 0x64f   : > { %v3722_v33 = vadd.f32 %v3721_v31, %v2698_v30  ;;  %v2730_v30 = vld [vmem:[%s4140_s7 + $0x360] sm:$0xff] }
 0x651   : > { %v3723_v35 = vadd.f32 %v3722_v33, %v2699_v32  ;;  %v2731_v32 = vld [vmem:[%s4140_s7 + $0x368] sm:$0xff] }
 0x653   : > { %v3724_v37 = vadd.f32 %v3723_v35, %v2700_v34  ;;  %v2732_v34 = vld [vmem:[%s4140_s7 + $0x370] sm:$0xff] }
 0x655   : > { %v3725_v39 = vadd.f32 %v3724_v37, %v2701_v36  ;;  %v2733_v36 = vld [vmem:[%s4140_s7 + $0x378] sm:$0xff] }
 0x657   : > { %v3726_v41 = vadd.f32 %v3725_v39, %v2702_v38  ;;  %v2734_v38 = vld [vmem:[%s4140_s7 + $0x380] sm:$0xff] }
 0x659   : > { %v3727_v43 = vadd.f32 %v3726_v41, %v2703_v40  ;;  %v2735_v40 = vld [vmem:[%s4140_s7 + $0x388] sm:$0xff] }
 0x65b   : > { %v3728_v45 = vadd.f32 %v3727_v43, %v2704_v42  ;;  %v2736_v42 = vld [vmem:[%s4140_s7 + $0x390] sm:$0xff] }
 0x65d   : > { %v3729_v47 = vadd.f32 %v3728_v45, %v2705_v44  ;;  %v2737_v44 = vld [vmem:[%s4140_s7 + $0x398] sm:$0xff] }
 0x65f   : > { %v3730_v49 = vadd.f32 %v3729_v47, %v2706_v46  ;;  %v2738_v46 = vld [vmem:[%s4140_s7 + $0x3a0] sm:$0xff] }
 0x661   : > { %v3731_v51 = vadd.f32 %v3730_v49, %v2707_v48  ;;  %v2739_v48 = vld [vmem:[%s4140_s7 + $0x3a8] sm:$0xff] }
 0x663   : > { %v3732_v53 = vadd.f32 %v3731_v51, %v2708_v50  ;;  %v2740_v50 = vld [vmem:[%s4140_s7 + $0x3b0] sm:$0xff] }
 0x665   : > { %v3733_v55 = vadd.f32 %v3732_v53, %v2709_v52  ;;  %v2741_v52 = vld [vmem:[%s4140_s7 + $0x3b8] sm:$0xff] }
 0x667   : > { %v3734_v57 = vadd.f32 %v3733_v55, %v2710_v54  ;;  %v2742_v54 = vld [vmem:[%s4140_s7 + $0x3c0] sm:$0xff] }
 0x669   : > { %v3735_v59 = vadd.f32 %v3734_v57, %v2711_v56  ;;  %v2743_v56 = vld [vmem:[%s4140_s7 + $0x3c8] sm:$0xff] }
 0x66b   : > { %v3736_v61 = vadd.f32 %v3735_v59, %v2712_v58  ;;  %v2744_v58 = vld [vmem:[%s4140_s7 + $0x3d0] sm:$0xff] }
 0x66d   : > { %v3737_v63 = vadd.f32 %v3736_v61, %v2713_v60  ;;  %v2745_v60 = vld [vmem:[%s4140_s7 + $0x3d8] sm:$0xff] }
 0x66f   : > { %v3738_v1 = vadd.f32 %v3737_v63, %v2714_v62  ;;  %v2746_v62 = vld [vmem:[%s4140_s7 + $0x3e0] sm:$0xff] }
 0x671   : > { %v3739_v3 = vadd.f32 %v3738_v1, %v2715_v0  ;;  %v2747_v0 = vld [vmem:[%s4140_s7 + $0x3e8] sm:$0xff] }
 0x673   : > { %v3740_v5 = vadd.f32 %v3739_v3, %v2716_v2  ;;  %v2748_v2 = vld [vmem:[%s4140_s7 + $0x3f0] sm:$0xff] }
 0x675   : > { %v3741_v7 = vadd.f32 %v3740_v5, %v2717_v4  ;;  %v2749_v4 = vld [vmem:[%s4140_s7 + $0x3f8] sm:$0xff] }
 0x677   : > { %v3742_v9 = vadd.f32 %v3741_v7, %v2718_v6  ;;  %v2750_v6 = vld [vmem:[%s4140_s7 + $0x400] sm:$0xff] }
 0x679   : > { %v3743_v11 = vadd.f32 %v3742_v9, %v2719_v8  ;;  %v2751_v8 = vld [vmem:[%s4140_s7 + $0x408] sm:$0xff] }
 0x67b   : > { %v3744_v13 = vadd.f32 %v3743_v11, %v2720_v10  ;;  %v2752_v10 = vld [vmem:[%s4140_s7 + $0x410] sm:$0xff] }
 0x67d   : > { %v3745_v15 = vadd.f32 %v3744_v13, %v2721_v12  ;;  %v2753_v12 = vld [vmem:[%s4140_s7 + $0x418] sm:$0xff] }
 0x67f   : > { %v3746_v17 = vadd.f32 %v3745_v15, %v2722_v14  ;;  %v2754_v14 = vld [vmem:[%s4140_s7 + $0x420] sm:$0xff] }
 0x681   : > { %v3747_v19 = vadd.f32 %v3746_v17, %v2723_v16  ;;  %v2755_v16 = vld [vmem:[%s4140_s7 + $0x428] sm:$0xff] }
 0x683   : > { %v3748_v21 = vadd.f32 %v3747_v19, %v2724_v18  ;;  %v2756_v18 = vld [vmem:[%s4140_s7 + $0x430] sm:$0xff] }
 0x685   : > { %v3749_v23 = vadd.f32 %v3748_v21, %v2725_v20  ;;  %v2757_v20 = vld [vmem:[%s4140_s7 + $0x438] sm:$0xff] }
 0x687   : > { %v3750_v25 = vadd.f32 %v3749_v23, %v2726_v22  ;;  %v2758_v22 = vld [vmem:[%s4140_s7 + $0x440] sm:$0xff] }
 0x689   : > { %v3751_v27 = vadd.f32 %v3750_v25, %v2727_v24  ;;  %v2759_v24 = vld [vmem:[%s4140_s7 + $0x448] sm:$0xff] }
 0x68b   : > { %v3752_v29 = vadd.f32 %v3751_v27, %v2728_v26  ;;  %v2760_v26 = vld [vmem:[%s4140_s7 + $0x450] sm:$0xff] }
 0x68d   : > { %v3753_v31 = vadd.f32 %v3752_v29, %v2729_v28  ;;  %v2761_v28 = vld [vmem:[%s4140_s7 + $0x458] sm:$0xff] }
 0x68f   : > { %v3754_v33 = vadd.f32 %v3753_v31, %v2730_v30  ;;  %v2762_v30 = vld [vmem:[%s4140_s7 + $0x460] sm:$0xff] }
 0x691   : > { %v3755_v35 = vadd.f32 %v3754_v33, %v2731_v32  ;;  %v2763_v32 = vld [vmem:[%s4140_s7 + $0x468] sm:$0xff] }
 0x693   : > { %v3756_v37 = vadd.f32 %v3755_v35, %v2732_v34  ;;  %v2764_v34 = vld [vmem:[%s4140_s7 + $0x470] sm:$0xff] }
 0x695   : > { %v3757_v39 = vadd.f32 %v3756_v37, %v2733_v36  ;;  %v2765_v36 = vld [vmem:[%s4140_s7 + $0x478] sm:$0xff] }
 0x697   : > { %v3758_v41 = vadd.f32 %v3757_v39, %v2734_v38  ;;  %v2766_v38 = vld [vmem:[%s4140_s7 + $0x480] sm:$0xff] }
 0x699   : > { %v3759_v43 = vadd.f32 %v3758_v41, %v2735_v40  ;;  %v2767_v40 = vld [vmem:[%s4140_s7 + $0x488] sm:$0xff] }
 0x69b   : > { %v3760_v45 = vadd.f32 %v3759_v43, %v2736_v42  ;;  %v2768_v42 = vld [vmem:[%s4140_s7 + $0x490] sm:$0xff] }
 0x69d   : > { %v3761_v47 = vadd.f32 %v3760_v45, %v2737_v44  ;;  %v2769_v44 = vld [vmem:[%s4140_s7 + $0x498] sm:$0xff] }
 0x69f   : > { %v3762_v49 = vadd.f32 %v3761_v47, %v2738_v46  ;;  %v2770_v46 = vld [vmem:[%s4140_s7 + $0x4a0] sm:$0xff] }
 0x6a1   : > { %v3763_v51 = vadd.f32 %v3762_v49, %v2739_v48  ;;  %v2771_v48 = vld [vmem:[%s4140_s7 + $0x4a8] sm:$0xff] }
 0x6a3   : > { %v3764_v53 = vadd.f32 %v3763_v51, %v2740_v50  ;;  %v2772_v50 = vld [vmem:[%s4140_s7 + $0x4b0] sm:$0xff] }
 0x6a5   : > { %v3765_v55 = vadd.f32 %v3764_v53, %v2741_v52  ;;  %v2773_v52 = vld [vmem:[%s4140_s7 + $0x4b8] sm:$0xff] }
 0x6a7   : > { %v3766_v57 = vadd.f32 %v3765_v55, %v2742_v54  ;;  %v2774_v54 = vld [vmem:[%s4140_s7 + $0x4c0] sm:$0xff] }
 0x6a9   : > { %v3767_v59 = vadd.f32 %v3766_v57, %v2743_v56  ;;  %v2775_v56 = vld [vmem:[%s4140_s7 + $0x4c8] sm:$0xff] }
 0x6ab   : > { %v3768_v61 = vadd.f32 %v3767_v59, %v2744_v58  ;;  %v2776_v58 = vld [vmem:[%s4140_s7 + $0x4d0] sm:$0xff] }
 0x6ad   : > { %v3769_v63 = vadd.f32 %v3768_v61, %v2745_v60  ;;  %v2777_v60 = vld [vmem:[%s4140_s7 + $0x4d8] sm:$0xff] }
 0x6af   : > { %v3770_v1 = vadd.f32 %v3769_v63, %v2746_v62  ;;  %v2778_v62 = vld [vmem:[%s4140_s7 + $0x4e0] sm:$0xff] }
 0x6b1   : > { %v3771_v3 = vadd.f32 %v3770_v1, %v2747_v0  ;;  %v2779_v0 = vld [vmem:[%s4140_s7 + $0x4e8] sm:$0xff] }
 0x6b3   : > { %v3772_v5 = vadd.f32 %v3771_v3, %v2748_v2  ;;  %v2780_v2 = vld [vmem:[%s4140_s7 + $0x4f0] sm:$0xff] }
 0x6b5   : > { %v3773_v7 = vadd.f32 %v3772_v5, %v2749_v4  ;;  %v2781_v4 = vld [vmem:[%s4140_s7 + $0x4f8] sm:$0xff] }
 0x6b7   : > { %v3774_v9 = vadd.f32 %v3773_v7, %v2750_v6  ;;  %v2782_v6 = vld [vmem:[%s4140_s7 + $0x500] sm:$0xff] }
 0x6b9   : > { %v3775_v11 = vadd.f32 %v3774_v9, %v2751_v8  ;;  %v2783_v8 = vld [vmem:[%s4140_s7 + $0x508] sm:$0xff] }
 0x6bb   : > { %v3776_v13 = vadd.f32 %v3775_v11, %v2752_v10  ;;  %v2784_v10 = vld [vmem:[%s4140_s7 + $0x510] sm:$0xff] }
 0x6bd   : > { %v3777_v15 = vadd.f32 %v3776_v13, %v2753_v12  ;;  %v2785_v12 = vld [vmem:[%s4140_s7 + $0x518] sm:$0xff] }
 0x6bf   : > { %v3778_v17 = vadd.f32 %v3777_v15, %v2754_v14  ;;  %v2786_v14 = vld [vmem:[%s4140_s7 + $0x520] sm:$0xff] }
 0x6c1   : > { %v3779_v19 = vadd.f32 %v3778_v17, %v2755_v16  ;;  %v2787_v16 = vld [vmem:[%s4140_s7 + $0x528] sm:$0xff] }
 0x6c3   : > { %v3780_v21 = vadd.f32 %v3779_v19, %v2756_v18  ;;  %v2788_v18 = vld [vmem:[%s4140_s7 + $0x530] sm:$0xff] }
 0x6c5   : > { %v3781_v23 = vadd.f32 %v3780_v21, %v2757_v20  ;;  %v2789_v20 = vld [vmem:[%s4140_s7 + $0x538] sm:$0xff] }
 0x6c7   : > { %v3782_v25 = vadd.f32 %v3781_v23, %v2758_v22  ;;  %v2790_v22 = vld [vmem:[%s4140_s7 + $0x540] sm:$0xff] }
 0x6c9   : > { %v3783_v27 = vadd.f32 %v3782_v25, %v2759_v24  ;;  %v3902_v24 = vld [vmem:[%s4129_s27] sm:$0xff] }
 0x6cb   : > { %v3784_v29 = vadd.f32 %v3783_v27, %v2760_v26 }
 0x6cd   : > { %v3785_v31 = vadd.f32 %v3784_v29, %v2761_v28 }
 0x6cf   : > { %v3786_v33 = vadd.f32 %v3785_v31, %v2762_v30 }
 0x6d1   : > { %v3787_v35 = vadd.f32 %v3786_v33, %v2763_v32 }
 0x6d3   : > { %v3788_v37 = vadd.f32 %v3787_v35, %v2764_v34 }
 0x6d5   : > { %v3789_v39 = vadd.f32 %v3788_v37, %v2765_v36 }
 0x6d7   : > { %v3790_v41 = vadd.f32 %v3789_v39, %v2766_v38 }
 0x6d9   : > { %v3791_v43 = vadd.f32 %v3790_v41, %v2767_v40 }
 0x6db   : > { %v3792_v45 = vadd.f32 %v3791_v43, %v2768_v42 }
 0x6dd   : > { %v3793_v47 = vadd.f32 %v3792_v45, %v2769_v44 }
 0x6df   : > { %v3794_v49 = vadd.f32 %v3793_v47, %v2770_v46 }
 0x6e1   : > { %v3795_v51 = vadd.f32 %v3794_v49, %v2771_v48 }
 0x6e3   : > { %v3796_v53 = vadd.f32 %v3795_v51, %v2772_v50 }
 0x6e5   : > { %v3797_v55 = vadd.f32 %v3796_v53, %v2773_v52 }
 0x6e7   : > { %v3798_v57 = vadd.f32 %v3797_v55, %v2774_v54 }
 0x6e9   : > { %v3799_v59 = vadd.f32 %v3798_v57, %v2775_v56 }
 0x6eb   : > { %v3800_v61 = vadd.f32 %v3799_v59, %v2776_v58 }
 0x6ed   : > { %v3801_v63 = vadd.f32 %v3800_v61, %v2777_v60 }
 0x6ef   : > { %v3802_v1 = vadd.f32 %v3801_v63, %v2778_v62 }
 0x6f1   : > { %v3803_v3 = vadd.f32 %v3802_v1, %v2779_v0 }
 0x6f3   : > { %v3804_v5 = vadd.f32 %v3803_v3, %v2780_v2 }
 0x6f5   : > { %v3805_v7 = vadd.f32 %v3804_v5, %v2781_v4 }
 0x6f7   : > { %v3806_v9 = vadd.f32 %v3805_v7, %v2782_v6 }
 0x6f9   : > { %v3807_v11 = vadd.f32 %v3806_v9, %v2783_v8 }
 0x6fb   : > { %v3808_v13 = vadd.f32 %v3807_v11, %v2784_v10 }
 0x6fd   : > { %v3809_v15 = vadd.f32 %v3808_v13, %v2785_v12 }
 0x6ff   : > { %v3810_v17 = vadd.f32 %v3809_v15, %v2786_v14 }
 0x701   : > { %v3811_v19 = vadd.f32 %v3810_v17, %v2787_v16 }
 0x703   : > { %v3812_v21 = vadd.f32 %v3811_v19, %v2788_v18 }
 0x705   : > { %v3813_v23 = vadd.f32 %v3812_v21, %v2789_v20 }
 0x707   : > { %v3814_v25 = vadd.f32 %v3813_v23, %v2790_v22 }
 0x709   : > { %v3903_v26 = vadd.f32 %v3902_v24, %v3814_v25 }
 0x70b   : > { %3904 = vst [vmem:[%s4129_s27] sm:$0xff] %v3903_v26 }
 0x70c PF: > { %s14_s14 = sadd.s32 1, %s4073_s14   ;;  %s5042_s12 = smov %s4069_s13 }
 0x70d   : > { %p11_p12 = scmp.ge.s32.totalorder %s14_s14, 4   ;;  %s5043_s13 = smov %s5045_s15 }
 0x70f   :  { %13 = sbr.rel (!%p11_p12) target bundleno = 2 (0x2), region = 93 }

</bundles_post_ra>
